<compile_context>
chip_gen: v5e
topology: v5e:2x2
jax: 0.10.0
libtpu: 0.0.40
codegen_flags: <defaults>
</compile_context>

<pallas_src>
import functools

import numpy as np
import jax
import jax.numpy as jnp
from jax.experimental import pallas as pl
from jax.experimental.pallas import tpu as pltpu

BN_EPS = 1e-5


# ---------------------------------------------------------------------------
# Kernel
# ---------------------------------------------------------------------------
def _ghost_bottleneck_kernel(x_ref, mask_ref,
                             wa_ref, ba_ref,
                             kb_ref, wb_ref, bb_ref,
                             wc_ref, bc_ref,
                             kd_ref, wd_ref, bd_ref,
                             o_ref, *, H, W):
    P = H * W
    x = x_ref[0]                     # (C, P) f32 — channels on sublanes, pixels on lanes
    C = x.shape[0]
    C2 = C // 2
    C4 = C // 4
    masks = mask_ref[...]            # (25, P) f32 zero-padding masks, one per 5x5 tap

    def pconv(blocks, b):
        """Folded 1x1 conv:  sum_k W_k @ v_k + b  via VPU broadcast-FMAs.

        blocks: list of (w (Co, Ci), v (Ci, P)).  Ci is tiny (<=16) here, so an
        unrolled FMA loop beats a heavily padded MXU contraction and keeps the
        MXU slot free (perf-review suggestion)."""
        co = blocks[0][0].shape[0]
        acc = jnp.zeros((co, P), jnp.float32) + b          # bias (Co, 1) -> lanes
        for w, v in blocks:
            for ci in range(w.shape[1]):
                acc = acc + w[:, ci:ci + 1] * v[ci:ci + 1, :]
        return acc

    def dwconv5(v, k):
        """Folded depthwise 5x5 (zero pad 2) on the flattened pixel axis.

        v: (Cd, P), k: (Cd, 25).  Each tap is an XLU lane roll of the flattened
        image + a precomputed boundary mask + a VPU FMA."""
        acc = jnp.zeros(v.shape, jnp.float32)
        t = 0
        for di in range(-2, 3):
            for dj in range(-2, 3):
                s = di * W + dj
                shifted = v if s == 0 else pltpu.roll(v, shift=(-s) % P, axis=1)
                acc = acc + k[:, t:t + 1] * (shifted * masks[t:t + 1, :])
                t += 1
        return acc

    def silu(h):
        return h * jax.nn.sigmoid(h)

    wa = wa_ref[...]
    wb = wb_ref[...]
    wc = wc_ref[...]
    wd = wd_ref[...]

    # ---- GhostConv #1 (SiLU) ----
    y1 = silu(pconv([(wa, x)], ba_ref[...]))                               # (C/4, P)
    y2 = silu(dwconv5(y1, kb_ref[...]) + pconv([(wb, y1)], bb_ref[...]))   # (C/4, P)

    # ---- GhostConv #2 (no activation) ----
    # z = cat([y1, y2]) is handled by splitting W_C's input channels, so we never
    # concatenate along sublanes inside the kernel.
    w1 = pconv([(wc[:, :C4], y1), (wc[:, C4:], y2)], bc_ref[...])          # (C/2, P)
    w2 = dwconv5(w1, kd_ref[...]) + pconv([(wd, w1)], bd_ref[...])         # (C/2, P)

    # out = cat([w1, w2]) + x  (identity shortcut); store half-by-half.
    o_ref[0, :C2, :] = (w1 + x[:C2, :]).astype(o_ref.dtype)
    o_ref[0, C2:, :] = (w2 + x[C2:, :]).astype(o_ref.dtype)


# ---------------------------------------------------------------------------
# Wrapper
# ---------------------------------------------------------------------------
def ghost_bottleneck_forward(x, folded):
    """x: (N, C, H, W) NCHW float32; folded: dict of folded GhostBottleneck params."""
    N, C, H, W = x.shape
    P = H * W
    # Free reshape: NCHW is already contiguous as (N, C, H*W).  No HBM transpose.
    x_flat = x.reshape(N, C, P)

    # Precomputed zero-padding masks for the 25 depthwise taps:
    # masks[t, p] == 1 iff pixel p shifted by tap t stays inside the HxW image.
    rows = jnp.arange(P, dtype=jnp.int32) // W
    cols = jnp.arange(P, dtype=jnp.int32) % W
    taps = [(di, dj) for di in range(-2, 3) for dj in range(-2, 3)]
    masks = jnp.stack(
        [((rows + di >= 0) & (rows + di < H) &
          (cols + dj >= 0) & (cols + dj < W)).astype(jnp.float32)
         for di, dj in taps], axis=0)                                    # (25, P)

    params = (folded["wa"], folded["ba"],
              folded["kb"], folded["wb"], folded["bb"],
              folded["wc"], folded["bc"],
              folded["kd"], folded["wd"], folded["bd"])

    def full(a):  # whole-array block, resident across all grid steps
        return pl.BlockSpec(a.shape, lambda n: (0,) * a.ndim)

    kernel = functools.partial(_ghost_bottleneck_kernel, H=H, W=W)

    out_flat = pl.pallas_call(
        kernel,
        out_shape=jax.ShapeDtypeStruct((N, C, P), jnp.float32),
        grid_spec=pltpu.PrefetchScalarGridSpec(
            num_scalar_prefetch=0,
            grid=(N,),
            in_specs=[pl.BlockSpec((1, C, P), lambda n: (n, 0, 0)),
                      full(masks)] + [full(p) for p in params],
            out_specs=pl.BlockSpec((1, C, P), lambda n: (n, 0, 0)),
        ),
        compiler_params=pltpu.CompilerParams(dimension_semantics=("parallel",)),
    )(x_flat, masks, *params)

    return out_flat.reshape(N, C, H, W)


# ---------------------------------------------------------------------------
# Parameter construction, folding, and pure-JAX reference
# ---------------------------------------------------------------------------
def make_raw_params(c, key):
    """Random weights / BN stats matching GhostBottleneck(c, c, k=3, s=1)."""
    c2, c4 = c // 2, c // 4
    ks = iter(jax.random.split(key, 64))

    def bn(co):
        return (1.0 + 0.1 * jax.random.normal(next(ks), (co,), jnp.float32),    # gamma
                0.1 * jax.random.normal(next(ks), (co,), jnp.float32),          # beta
                0.1 * jax.random.normal(next(ks), (co,), jnp.float32),          # running_mean
                jnp.abs(jax.random.normal(next(ks), (co,), jnp.float32)) + 0.5)  # running_var

    def w(shape):
        return 0.1 * jax.random.normal(next(ks), shape, jnp.float32)

    # A: GhostConv#1.cv1 = Conv(c -> c4, k=1, g=1, act=True); in != out -> no t3
    A = dict(k=1, g=1, co=c4, act=True,
             w1=w((c4, c, 1, 1)), bn1=bn(c4),
             w2=w((c4, c, 1, 1)), bn2=bn(c4))
    # B: GhostConv#1.cv2 = Conv(c4 -> c4, k=5, g=c4, act=True); t3 on
    B = dict(k=5, g=c4, co=c4, act=True,
             w1=w((c4, 1, 5, 5)), bn1=bn(c4),
             w2=w((c4, c4, 1, 1)), bn2=bn(c4),
             w3=w((c4, 1, 5, 5)), bn3=bn(c4))
    # C: GhostConv#2.cv1 = Conv(c2 -> c2, k=1, g=1, act=False); t3 on (depthwise 1x1)
    Cb = dict(k=1, g=1, co=c2, act=False,
              w1=w((c2, c2, 1, 1)), bn1=bn(c2),
              w2=w((c2, c2, 1, 1)), bn2=bn(c2),
              w3=w((c2, 1, 1, 1)), bn3=bn(c2))
    # D: GhostConv#2.cv2 = Conv(c2 -> c2, k=5, g=c2, act=False); t3 on
    D = dict(k=5, g=c2, co=c2, act=False,
             w1=w((c2, 1, 5, 5)), bn1=bn(c2),
             w2=w((c2, c2, 1, 1)), bn2=bn(c2),
             w3=w((c2, 1, 5, 5)), bn3=bn(c2))
    return dict(A=A, B=B, C=Cb, D=D)


def _fold(wt, bnp):
    """Fold a bias-free conv weight (Co, ., kh, kw) with eval-mode BN."""
    gamma, beta, mean, var = bnp
    scale = gamma / jnp.sqrt(var + BN_EPS)
    return wt * scale[:, None, None, None], beta - mean * scale


def fold_params(raw):
    A, B, Cb, D = raw["A"], raw["B"], raw["C"], raw["D"]

    # A: two full 1x1 branches -> single (c4, c) matmul + bias
    wa1, ba1 = _fold(A["w1"], A["bn1"])
    wa2, ba2 = _fold(A["w2"], A["bn2"])
    wa = (wa1 + wa2)[:, :, 0, 0]
    ba = (ba1 + ba2)[:, None]

    # B: two depthwise 5x5 branches summed + one full 1x1
    kb1, bb1 = _fold(B["w1"], B["bn1"])
    kb3, bb3 = _fold(B["w3"], B["bn3"])
    wb2, bb2 = _fold(B["w2"], B["bn2"])
    kb = (kb1 + kb3)[:, 0].reshape(kb1.shape[0], 25)
    wb = wb2[:, :, 0, 0]
    bb = (bb1 + bb2 + bb3)[:, None]

    # C: two full 1x1 + one depthwise 1x1 (diagonal) -> single (c2, c2) matmul
    wc1, bc1 = _fold(Cb["w1"], Cb["bn1"])
    wc2, bc2 = _fold(Cb["w2"], Cb["bn2"])
    wc3, bc3 = _fold(Cb["w3"], Cb["bn3"])
    wc = wc1[:, :, 0, 0] + wc2[:, :, 0, 0] + jnp.diag(wc3[:, 0, 0, 0])
    bc = (bc1 + bc2 + bc3)[:, None]

    # D: same structure as B at c2 channels
    kd1, bd1 = _fold(D["w1"], D["bn1"])
    kd3, bd3 = _fold(D["w3"], D["bn3"])
    wd2, bd2 = _fold(D["w2"], D["bn2"])
    kd = (kd1 + kd3)[:, 0].reshape(kd1.shape[0], 25)
    wd = wd2[:, :, 0, 0]
    bd = (bd1 + bd2 + bd3)[:, None]

    return dict(wa=wa, ba=ba, kb=kb, wb=wb, bb=bb,
                wc=wc, bc=bc, kd=kd, wd=wd, bd=bd)


def _conv2d(x, wt, pad, groups):
    return jax.lax.conv_general_dilated(
        x, wt, window_strides=(1, 1), padding=[(pad, pad), (pad, pad)],
        dimension_numbers=("NCHW", "OIHW", "NCHW"), feature_group_count=groups)


def _bn(y, bnp):
    gamma, beta, mean, var = bnp
    scale = gamma / jnp.sqrt(var + BN_EPS)
    return y * scale[None, :, None, None] + (beta - mean * scale)[None, :, None, None]


def _repvgg_conv(x, p):
    pad = p["k"] // 2
    y = _bn(_conv2d(x, p["w1"], pad, p["g"]), p["bn1"])
    y = y + _bn(_conv2d(x, p["w2"], 0, 1), p["bn2"])
    if "w3" in p:
        y = y + _bn(_conv2d(x, p["w3"], pad, p["co"]), p["bn3"])
    return jax.nn.silu(y) if p["act"] else y


def reference_forward(x, raw):
    """Pure-JAX GhostBottleneck (s=1) with unfolded convs + BN (NCHW)."""
    y1 = _repvgg_conv(x, raw["A"])
    y2 = _repvgg_conv(y1, raw["B"])
    z = jnp.concatenate([y1, y2], axis=1)
    w1 = _repvgg_conv(z, raw["C"])
    w2 = _repvgg_conv(w1, raw["D"])
    return jnp.concatenate([w1, w2], axis=1) + x


# ---------------------------------------------------------------------------
if __name__ == "__main__":
    key = jax.random.PRNGKey(0)
    k_x, k_p = jax.random.split(key)

    # GhostBottleneck(c1=16, c2=16, k=3, s=1), NCHW input
    N, C, H, W = 2, 16, 16, 16
    x = jax.random.normal(k_x, (N, C, H, W), jnp.float32)

    raw = make_raw_params(C, k_p)
    folded = fold_params(raw)

    out = ghost_bottleneck_forward(x, folded)
    out = jax.block_until_ready(out)

    ref = reference_forward(x, raw)
    assert out.shape == (N, C, H, W)
    np.testing.assert_allclose(np.asarray(out), np.asarray(ref), rtol=1e-4, atol=1e-4)

    print("KERNEL_OK")
</pallas_src>

<mosaic_0001>
module attributes {stable_mosaic.version = 11 : i64} {
  func.func @_ghost_bottleneck_kernel(%arg0: i32, %arg1: memref<1x16x256xf32, #tpu.memory_space<vmem>>, %arg2: memref<25x256xf32, #tpu.memory_space<vmem>>, %arg3: memref<4x16xf32, #tpu.memory_space<vmem>>, %arg4: memref<4x1xf32, #tpu.memory_space<vmem>>, %arg5: memref<4x25xf32, #tpu.memory_space<vmem>>, %arg6: memref<4x4xf32, #tpu.memory_space<vmem>>, %arg7: memref<4x1xf32, #tpu.memory_space<vmem>>, %arg8: memref<8x8xf32, #tpu.memory_space<vmem>>, %arg9: memref<8x1xf32, #tpu.memory_space<vmem>>, %arg10: memref<8x25xf32, #tpu.memory_space<vmem>>, %arg11: memref<8x8xf32, #tpu.memory_space<vmem>>, %arg12: memref<8x1xf32, #tpu.memory_space<vmem>>, %arg13: memref<1x16x256xf32, #tpu.memory_space<vmem>>) attributes {dimension_semantics = [#tpu.dimension_semantics<parallel>], iteration_bounds = array<i64: 2>, scalar_prefetch = 0 : i64, scratch_operands = 0 : i64, tpu.core_type = #tpu.core_type<tc>, window_params = [{transform_indices = @transform_0, window_bounds = array<i64: 1, 16, 256>}, {pipeline_mode = #tpu.pipeline_mode<synchronous>, transform_indices = @transform_1, window_bounds = array<i64: 25, 256>}, {pipeline_mode = #tpu.pipeline_mode<synchronous>, transform_indices = @transform_2, window_bounds = array<i64: 4, 16>}, {pipeline_mode = #tpu.pipeline_mode<synchronous>, transform_indices = @transform_3, window_bounds = array<i64: 4, 1>}, {pipeline_mode = #tpu.pipeline_mode<synchronous>, transform_indices = @transform_4, window_bounds = array<i64: 4, 25>}, {pipeline_mode = #tpu.pipeline_mode<synchronous>, transform_indices = @transform_5, window_bounds = array<i64: 4, 4>}, {pipeline_mode = #tpu.pipeline_mode<synchronous>, transform_indices = @transform_6, window_bounds = array<i64: 4, 1>}, {pipeline_mode = #tpu.pipeline_mode<synchronous>, transform_indices = @transform_7, window_bounds = array<i64: 8, 8>}, {pipeline_mode = #tpu.pipeline_mode<synchronous>, transform_indices = @transform_8, window_bounds = array<i64: 8, 1>}, {pipeline_mode = #tpu.pipeline_mode<synchronous>, transform_indices = @transform_9, window_bounds = array<i64: 8, 25>}, {pipeline_mode = #tpu.pipeline_mode<synchronous>, transform_indices = @transform_10, window_bounds = array<i64: 8, 8>}, {pipeline_mode = #tpu.pipeline_mode<synchronous>, transform_indices = @transform_11, window_bounds = array<i64: 8, 1>}, {transform_indices = @transform_12, window_bounds = array<i64: 1, 16, 256>}]} {
    %c0 = arith.constant 0 : index
    %c0_0 = arith.constant 0 : index
    %c0_1 = arith.constant 0 : index
    %0 = vector.load %arg1[%c0, %c0_0, %c0_1] : memref<1x16x256xf32, #tpu.memory_space<vmem>>, vector<1x16x256xf32>
    %1 = vector.shape_cast %0 : vector<1x16x256xf32> to vector<16x256xf32>
    %c0_2 = arith.constant 0 : index
    %c0_3 = arith.constant 0 : index
    %2 = vector.load %arg2[%c0_2, %c0_3] : memref<25x256xf32, #tpu.memory_space<vmem>>, vector<25x256xf32>
    %c0_4 = arith.constant 0 : index
    %c0_5 = arith.constant 0 : index
    %3 = vector.load %arg3[%c0_4, %c0_5] : memref<4x16xf32, #tpu.memory_space<vmem>>, vector<4x16xf32>
    %c0_6 = arith.constant 0 : index
    %c0_7 = arith.constant 0 : index
    %4 = vector.load %arg6[%c0_6, %c0_7] : memref<4x4xf32, #tpu.memory_space<vmem>>, vector<4x4xf32>
    %c0_8 = arith.constant 0 : index
    %c0_9 = arith.constant 0 : index
    %5 = vector.load %arg8[%c0_8, %c0_9] : memref<8x8xf32, #tpu.memory_space<vmem>>, vector<8x8xf32>
    %c0_10 = arith.constant 0 : index
    %c0_11 = arith.constant 0 : index
    %6 = vector.load %arg11[%c0_10, %c0_11] : memref<8x8xf32, #tpu.memory_space<vmem>>, vector<8x8xf32>
    %c0_12 = arith.constant 0 : index
    %c0_13 = arith.constant 0 : index
    %7 = vector.load %arg4[%c0_12, %c0_13] : memref<4x1xf32, #tpu.memory_space<vmem>>, vector<4x1xf32>
    %cst = arith.constant 0.000000e+00 : f32
    %8 = vector.broadcast %cst : f32 to vector<4x256xf32>
    %9 = vector.broadcast %7 : vector<4x1xf32> to vector<4x256xf32>
    %10 = arith.addf %8, %9 : vector<4x256xf32>
    %11 = vector.extract_strided_slice %3 {offsets = [0, 0], sizes = [4, 1], strides = [1, 1]} : vector<4x16xf32> to vector<4x1xf32>
    %12 = vector.extract_strided_slice %1 {offsets = [0, 0], sizes = [1, 256], strides = [1, 1]} : vector<16x256xf32> to vector<1x256xf32>
    %13 = vector.broadcast %11 : vector<4x1xf32> to vector<4x256xf32>
    %14 = vector.broadcast %12 : vector<1x256xf32> to vector<4x256xf32>
    %15 = arith.mulf %13, %14 : vector<4x256xf32>
    %16 = arith.addf %10, %15 : vector<4x256xf32>
    %17 = vector.extract_strided_slice %3 {offsets = [0, 1], sizes = [4, 1], strides = [1, 1]} : vector<4x16xf32> to vector<4x1xf32>
    %18 = vector.extract_strided_slice %1 {offsets = [1, 0], sizes = [1, 256], strides = [1, 1]} : vector<16x256xf32> to vector<1x256xf32>
    %19 = vector.broadcast %17 : vector<4x1xf32> to vector<4x256xf32>
    %20 = vector.broadcast %18 : vector<1x256xf32> to vector<4x256xf32>
    %21 = arith.mulf %19, %20 : vector<4x256xf32>
    %22 = arith.addf %16, %21 : vector<4x256xf32>
    %23 = vector.extract_strided_slice %3 {offsets = [0, 2], sizes = [4, 1], strides = [1, 1]} : vector<4x16xf32> to vector<4x1xf32>
    %24 = vector.extract_strided_slice %1 {offsets = [2, 0], sizes = [1, 256], strides = [1, 1]} : vector<16x256xf32> to vector<1x256xf32>
    %25 = vector.broadcast %23 : vector<4x1xf32> to vector<4x256xf32>
    %26 = vector.broadcast %24 : vector<1x256xf32> to vector<4x256xf32>
    %27 = arith.mulf %25, %26 : vector<4x256xf32>
    %28 = arith.addf %22, %27 : vector<4x256xf32>
    %29 = vector.extract_strided_slice %3 {offsets = [0, 3], sizes = [4, 1], strides = [1, 1]} : vector<4x16xf32> to vector<4x1xf32>
    %30 = vector.extract_strided_slice %1 {offsets = [3, 0], sizes = [1, 256], strides = [1, 1]} : vector<16x256xf32> to vector<1x256xf32>
    %31 = vector.broadcast %29 : vector<4x1xf32> to vector<4x256xf32>
    %32 = vector.broadcast %30 : vector<1x256xf32> to vector<4x256xf32>
    %33 = arith.mulf %31, %32 : vector<4x256xf32>
    %34 = arith.addf %28, %33 : vector<4x256xf32>
    %35 = vector.extract_strided_slice %3 {offsets = [0, 4], sizes = [4, 1], strides = [1, 1]} : vector<4x16xf32> to vector<4x1xf32>
    %36 = vector.extract_strided_slice %1 {offsets = [4, 0], sizes = [1, 256], strides = [1, 1]} : vector<16x256xf32> to vector<1x256xf32>
    %37 = vector.broadcast %35 : vector<4x1xf32> to vector<4x256xf32>
    %38 = vector.broadcast %36 : vector<1x256xf32> to vector<4x256xf32>
    %39 = arith.mulf %37, %38 : vector<4x256xf32>
    %40 = arith.addf %34, %39 : vector<4x256xf32>
    %41 = vector.extract_strided_slice %3 {offsets = [0, 5], sizes = [4, 1], strides = [1, 1]} : vector<4x16xf32> to vector<4x1xf32>
    %42 = vector.extract_strided_slice %1 {offsets = [5, 0], sizes = [1, 256], strides = [1, 1]} : vector<16x256xf32> to vector<1x256xf32>
    %43 = vector.broadcast %41 : vector<4x1xf32> to vector<4x256xf32>
    %44 = vector.broadcast %42 : vector<1x256xf32> to vector<4x256xf32>
    %45 = arith.mulf %43, %44 : vector<4x256xf32>
    %46 = arith.addf %40, %45 : vector<4x256xf32>
    %47 = vector.extract_strided_slice %3 {offsets = [0, 6], sizes = [4, 1], strides = [1, 1]} : vector<4x16xf32> to vector<4x1xf32>
    %48 = vector.extract_strided_slice %1 {offsets = [6, 0], sizes = [1, 256], strides = [1, 1]} : vector<16x256xf32> to vector<1x256xf32>
    %49 = vector.broadcast %47 : vector<4x1xf32> to vector<4x256xf32>
    %50 = vector.broadcast %48 : vector<1x256xf32> to vector<4x256xf32>
    %51 = arith.mulf %49, %50 : vector<4x256xf32>
    %52 = arith.addf %46, %51 : vector<4x256xf32>
    %53 = vector.extract_strided_slice %3 {offsets = [0, 7], sizes = [4, 1], strides = [1, 1]} : vector<4x16xf32> to vector<4x1xf32>
    %54 = vector.extract_strided_slice %1 {offsets = [7, 0], sizes = [1, 256], strides = [1, 1]} : vector<16x256xf32> to vector<1x256xf32>
    %55 = vector.broadcast %53 : vector<4x1xf32> to vector<4x256xf32>
    %56 = vector.broadcast %54 : vector<1x256xf32> to vector<4x256xf32>
    %57 = arith.mulf %55, %56 : vector<4x256xf32>
    %58 = arith.addf %52, %57 : vector<4x256xf32>
    %59 = vector.extract_strided_slice %3 {offsets = [0, 8], sizes = [4, 1], strides = [1, 1]} : vector<4x16xf32> to vector<4x1xf32>
    %60 = vector.extract_strided_slice %1 {offsets = [8, 0], sizes = [1, 256], strides = [1, 1]} : vector<16x256xf32> to vector<1x256xf32>
    %61 = vector.broadcast %59 : vector<4x1xf32> to vector<4x256xf32>
    %62 = vector.broadcast %60 : vector<1x256xf32> to vector<4x256xf32>
    %63 = arith.mulf %61, %62 : vector<4x256xf32>
    %64 = arith.addf %58, %63 : vector<4x256xf32>
    %65 = vector.extract_strided_slice %3 {offsets = [0, 9], sizes = [4, 1], strides = [1, 1]} : vector<4x16xf32> to vector<4x1xf32>
    %66 = vector.extract_strided_slice %1 {offsets = [9, 0], sizes = [1, 256], strides = [1, 1]} : vector<16x256xf32> to vector<1x256xf32>
    %67 = vector.broadcast %65 : vector<4x1xf32> to vector<4x256xf32>
    %68 = vector.broadcast %66 : vector<1x256xf32> to vector<4x256xf32>
    %69 = arith.mulf %67, %68 : vector<4x256xf32>
    %70 = arith.addf %64, %69 : vector<4x256xf32>
    %71 = vector.extract_strided_slice %3 {offsets = [0, 10], sizes = [4, 1], strides = [1, 1]} : vector<4x16xf32> to vector<4x1xf32>
    %72 = vector.extract_strided_slice %1 {offsets = [10, 0], sizes = [1, 256], strides = [1, 1]} : vector<16x256xf32> to vector<1x256xf32>
    %73 = vector.broadcast %71 : vector<4x1xf32> to vector<4x256xf32>
    %74 = vector.broadcast %72 : vector<1x256xf32> to vector<4x256xf32>
    %75 = arith.mulf %73, %74 : vector<4x256xf32>
    %76 = arith.addf %70, %75 : vector<4x256xf32>
    %77 = vector.extract_strided_slice %3 {offsets = [0, 11], sizes = [4, 1], strides = [1, 1]} : vector<4x16xf32> to vector<4x1xf32>
    %78 = vector.extract_strided_slice %1 {offsets = [11, 0], sizes = [1, 256], strides = [1, 1]} : vector<16x256xf32> to vector<1x256xf32>
    %79 = vector.broadcast %77 : vector<4x1xf32> to vector<4x256xf32>
    %80 = vector.broadcast %78 : vector<1x256xf32> to vector<4x256xf32>
    %81 = arith.mulf %79, %80 : vector<4x256xf32>
    %82 = arith.addf %76, %81 : vector<4x256xf32>
    %83 = vector.extract_strided_slice %3 {offsets = [0, 12], sizes = [4, 1], strides = [1, 1]} : vector<4x16xf32> to vector<4x1xf32>
    %84 = vector.extract_strided_slice %1 {offsets = [12, 0], sizes = [1, 256], strides = [1, 1]} : vector<16x256xf32> to vector<1x256xf32>
    %85 = vector.broadcast %83 : vector<4x1xf32> to vector<4x256xf32>
    %86 = vector.broadcast %84 : vector<1x256xf32> to vector<4x256xf32>
    %87 = arith.mulf %85, %86 : vector<4x256xf32>
    %88 = arith.addf %82, %87 : vector<4x256xf32>
    %89 = vector.extract_strided_slice %3 {offsets = [0, 13], sizes = [4, 1], strides = [1, 1]} : vector<4x16xf32> to vector<4x1xf32>
    %90 = vector.extract_strided_slice %1 {offsets = [13, 0], sizes = [1, 256], strides = [1, 1]} : vector<16x256xf32> to vector<1x256xf32>
    %91 = vector.broadcast %89 : vector<4x1xf32> to vector<4x256xf32>
    %92 = vector.broadcast %90 : vector<1x256xf32> to vector<4x256xf32>
    %93 = arith.mulf %91, %92 : vector<4x256xf32>
    %94 = arith.addf %88, %93 : vector<4x256xf32>
    %95 = vector.extract_strided_slice %3 {offsets = [0, 14], sizes = [4, 1], strides = [1, 1]} : vector<4x16xf32> to vector<4x1xf32>
    %96 = vector.extract_strided_slice %1 {offsets = [14, 0], sizes = [1, 256], strides = [1, 1]} : vector<16x256xf32> to vector<1x256xf32>
    %97 = vector.broadcast %95 : vector<4x1xf32> to vector<4x256xf32>
    %98 = vector.broadcast %96 : vector<1x256xf32> to vector<4x256xf32>
    %99 = arith.mulf %97, %98 : vector<4x256xf32>
    %100 = arith.addf %94, %99 : vector<4x256xf32>
    %101 = vector.extract_strided_slice %3 {offsets = [0, 15], sizes = [4, 1], strides = [1, 1]} : vector<4x16xf32> to vector<4x1xf32>
    %102 = vector.extract_strided_slice %1 {offsets = [15, 0], sizes = [1, 256], strides = [1, 1]} : vector<16x256xf32> to vector<1x256xf32>
    %103 = vector.broadcast %101 : vector<4x1xf32> to vector<4x256xf32>
    %104 = vector.broadcast %102 : vector<1x256xf32> to vector<4x256xf32>
    %105 = arith.mulf %103, %104 : vector<4x256xf32>
    %106 = arith.addf %100, %105 : vector<4x256xf32>
    %107 = arith.negf %106 : vector<4x256xf32>
    %108 = math.exp %107 : vector<4x256xf32>
    %cst_14 = arith.constant 1.000000e+00 : f32
    %109 = vector.broadcast %cst_14 : f32 to vector<4x256xf32>
    %110 = arith.addf %109, %108 : vector<4x256xf32>
    %111 = arith.divf %109, %110 : vector<4x256xf32>
    %112 = arith.mulf %106, %111 : vector<4x256xf32>
    %c0_15 = arith.constant 0 : index
    %c0_16 = arith.constant 0 : index
    %113 = vector.load %arg5[%c0_15, %c0_16] : memref<4x25xf32, #tpu.memory_space<vmem>>, vector<4x25xf32>
    %cst_17 = arith.constant 0.000000e+00 : f32
    %114 = vector.broadcast %cst_17 : f32 to vector<4x256xf32>
    %c34_i32 = arith.constant 34 : i32
    %115 = tpu.dynamic_rotate %112 by %c34_i32 dim 1 : vector<4x256xf32>, i32 -> vector<4x256xf32>
    %116 = vector.extract_strided_slice %113 {offsets = [0, 0], sizes = [4, 1], strides = [1, 1]} : vector<4x25xf32> to vector<4x1xf32>
    %117 = vector.extract_strided_slice %2 {offsets = [0, 0], sizes = [1, 256], strides = [1, 1]} : vector<25x256xf32> to vector<1x256xf32>
    %118 = vector.broadcast %117 : vector<1x256xf32> to vector<4x256xf32>
    %119 = arith.mulf %115, %118 : vector<4x256xf32>
    %120 = vector.broadcast %116 : vector<4x1xf32> to vector<4x256xf32>
    %121 = arith.mulf %120, %119 : vector<4x256xf32>
    %122 = arith.addf %114, %121 : vector<4x256xf32>
    %c33_i32 = arith.constant 33 : i32
    %123 = tpu.dynamic_rotate %112 by %c33_i32 dim 1 : vector<4x256xf32>, i32 -> vector<4x256xf32>
    %124 = vector.extract_strided_slice %113 {offsets = [0, 1], sizes = [4, 1], strides = [1, 1]} : vector<4x25xf32> to vector<4x1xf32>
    %125 = vector.extract_strided_slice %2 {offsets = [1, 0], sizes = [1, 256], strides = [1, 1]} : vector<25x256xf32> to vector<1x256xf32>
    %126 = vector.broadcast %125 : vector<1x256xf32> to vector<4x256xf32>
    %127 = arith.mulf %123, %126 : vector<4x256xf32>
    %128 = vector.broadcast %124 : vector<4x1xf32> to vector<4x256xf32>
    %129 = arith.mulf %128, %127 : vector<4x256xf32>
    %130 = arith.addf %122, %129 : vector<4x256xf32>
    %c32_i32 = arith.constant 32 : i32
    %131 = tpu.dynamic_rotate %112 by %c32_i32 dim 1 : vector<4x256xf32>, i32 -> vector<4x256xf32>
    %132 = vector.extract_strided_slice %113 {offsets = [0, 2], sizes = [4, 1], strides = [1, 1]} : vector<4x25xf32> to vector<4x1xf32>
    %133 = vector.extract_strided_slice %2 {offsets = [2, 0], sizes = [1, 256], strides = [1, 1]} : vector<25x256xf32> to vector<1x256xf32>
    %134 = vector.broadcast %133 : vector<1x256xf32> to vector<4x256xf32>
    %135 = arith.mulf %131, %134 : vector<4x256xf32>
    %136 = vector.broadcast %132 : vector<4x1xf32> to vector<4x256xf32>
    %137 = arith.mulf %136, %135 : vector<4x256xf32>
    %138 = arith.addf %130, %137 : vector<4x256xf32>
    %c31_i32 = arith.constant 31 : i32
    %139 = tpu.dynamic_rotate %112 by %c31_i32 dim 1 : vector<4x256xf32>, i32 -> vector<4x256xf32>
    %140 = vector.extract_strided_slice %113 {offsets = [0, 3], sizes = [4, 1], strides = [1, 1]} : vector<4x25xf32> to vector<4x1xf32>
    %141 = vector.extract_strided_slice %2 {offsets = [3, 0], sizes = [1, 256], strides = [1, 1]} : vector<25x256xf32> to vector<1x256xf32>
    %142 = vector.broadcast %141 : vector<1x256xf32> to vector<4x256xf32>
    %143 = arith.mulf %139, %142 : vector<4x256xf32>
    %144 = vector.broadcast %140 : vector<4x1xf32> to vector<4x256xf32>
    %145 = arith.mulf %144, %143 : vector<4x256xf32>
    %146 = arith.addf %138, %145 : vector<4x256xf32>
    %c30_i32 = arith.constant 30 : i32
    %147 = tpu.dynamic_rotate %112 by %c30_i32 dim 1 : vector<4x256xf32>, i32 -> vector<4x256xf32>
    %148 = vector.extract_strided_slice %113 {offsets = [0, 4], sizes = [4, 1], strides = [1, 1]} : vector<4x25xf32> to vector<4x1xf32>
    %149 = vector.extract_strided_slice %2 {offsets = [4, 0], sizes = [1, 256], strides = [1, 1]} : vector<25x256xf32> to vector<1x256xf32>
    %150 = vector.broadcast %149 : vector<1x256xf32> to vector<4x256xf32>
    %151 = arith.mulf %147, %150 : vector<4x256xf32>
    %152 = vector.broadcast %148 : vector<4x1xf32> to vector<4x256xf32>
    %153 = arith.mulf %152, %151 : vector<4x256xf32>
    %154 = arith.addf %146, %153 : vector<4x256xf32>
    %c18_i32 = arith.constant 18 : i32
    %155 = tpu.dynamic_rotate %112 by %c18_i32 dim 1 : vector<4x256xf32>, i32 -> vector<4x256xf32>
    %156 = vector.extract_strided_slice %113 {offsets = [0, 5], sizes = [4, 1], strides = [1, 1]} : vector<4x25xf32> to vector<4x1xf32>
    %157 = vector.extract_strided_slice %2 {offsets = [5, 0], sizes = [1, 256], strides = [1, 1]} : vector<25x256xf32> to vector<1x256xf32>
    %158 = vector.broadcast %157 : vector<1x256xf32> to vector<4x256xf32>
    %159 = arith.mulf %155, %158 : vector<4x256xf32>
    %160 = vector.broadcast %156 : vector<4x1xf32> to vector<4x256xf32>
    %161 = arith.mulf %160, %159 : vector<4x256xf32>
    %162 = arith.addf %154, %161 : vector<4x256xf32>
    %c17_i32 = arith.constant 17 : i32
    %163 = tpu.dynamic_rotate %112 by %c17_i32 dim 1 : vector<4x256xf32>, i32 -> vector<4x256xf32>
    %164 = vector.extract_strided_slice %113 {offsets = [0, 6], sizes = [4, 1], strides = [1, 1]} : vector<4x25xf32> to vector<4x1xf32>
    %165 = vector.extract_strided_slice %2 {offsets = [6, 0], sizes = [1, 256], strides = [1, 1]} : vector<25x256xf32> to vector<1x256xf32>
    %166 = vector.broadcast %165 : vector<1x256xf32> to vector<4x256xf32>
    %167 = arith.mulf %163, %166 : vector<4x256xf32>
    %168 = vector.broadcast %164 : vector<4x1xf32> to vector<4x256xf32>
    %169 = arith.mulf %168, %167 : vector<4x256xf32>
    %170 = arith.addf %162, %169 : vector<4x256xf32>
    %c16_i32 = arith.constant 16 : i32
    %171 = tpu.dynamic_rotate %112 by %c16_i32 dim 1 : vector<4x256xf32>, i32 -> vector<4x256xf32>
    %172 = vector.extract_strided_slice %113 {offsets = [0, 7], sizes = [4, 1], strides = [1, 1]} : vector<4x25xf32> to vector<4x1xf32>
    %173 = vector.extract_strided_slice %2 {offsets = [7, 0], sizes = [1, 256], strides = [1, 1]} : vector<25x256xf32> to vector<1x256xf32>
    %174 = vector.broadcast %173 : vector<1x256xf32> to vector<4x256xf32>
    %175 = arith.mulf %171, %174 : vector<4x256xf32>
    %176 = vector.broadcast %172 : vector<4x1xf32> to vector<4x256xf32>
    %177 = arith.mulf %176, %175 : vector<4x256xf32>
    %178 = arith.addf %170, %177 : vector<4x256xf32>
    %c15_i32 = arith.constant 15 : i32
    %179 = tpu.dynamic_rotate %112 by %c15_i32 dim 1 : vector<4x256xf32>, i32 -> vector<4x256xf32>
    %180 = vector.extract_strided_slice %113 {offsets = [0, 8], sizes = [4, 1], strides = [1, 1]} : vector<4x25xf32> to vector<4x1xf32>
    %181 = vector.extract_strided_slice %2 {offsets = [8, 0], sizes = [1, 256], strides = [1, 1]} : vector<25x256xf32> to vector<1x256xf32>
    %182 = vector.broadcast %181 : vector<1x256xf32> to vector<4x256xf32>
    %183 = arith.mulf %179, %182 : vector<4x256xf32>
    %184 = vector.broadcast %180 : vector<4x1xf32> to vector<4x256xf32>
    %185 = arith.mulf %184, %183 : vector<4x256xf32>
    %186 = arith.addf %178, %185 : vector<4x256xf32>
    %c14_i32 = arith.constant 14 : i32
    %187 = tpu.dynamic_rotate %112 by %c14_i32 dim 1 : vector<4x256xf32>, i32 -> vector<4x256xf32>
    %188 = vector.extract_strided_slice %113 {offsets = [0, 9], sizes = [4, 1], strides = [1, 1]} : vector<4x25xf32> to vector<4x1xf32>
    %189 = vector.extract_strided_slice %2 {offsets = [9, 0], sizes = [1, 256], strides = [1, 1]} : vector<25x256xf32> to vector<1x256xf32>
    %190 = vector.broadcast %189 : vector<1x256xf32> to vector<4x256xf32>
    %191 = arith.mulf %187, %190 : vector<4x256xf32>
    %192 = vector.broadcast %188 : vector<4x1xf32> to vector<4x256xf32>
    %193 = arith.mulf %192, %191 : vector<4x256xf32>
    %194 = arith.addf %186, %193 : vector<4x256xf32>
    %c2_i32 = arith.constant 2 : i32
    %195 = tpu.dynamic_rotate %112 by %c2_i32 dim 1 : vector<4x256xf32>, i32 -> vector<4x256xf32>
    %196 = vector.extract_strided_slice %113 {offsets = [0, 10], sizes = [4, 1], strides = [1, 1]} : vector<4x25xf32> to vector<4x1xf32>
    %197 = vector.extract_strided_slice %2 {offsets = [10, 0], sizes = [1, 256], strides = [1, 1]} : vector<25x256xf32> to vector<1x256xf32>
    %198 = vector.broadcast %197 : vector<1x256xf32> to vector<4x256xf32>
    %199 = arith.mulf %195, %198 : vector<4x256xf32>
    %200 = vector.broadcast %196 : vector<4x1xf32> to vector<4x256xf32>
    %201 = arith.mulf %200, %199 : vector<4x256xf32>
    %202 = arith.addf %194, %201 : vector<4x256xf32>
    %c1_i32 = arith.constant 1 : i32
    %203 = tpu.dynamic_rotate %112 by %c1_i32 dim 1 : vector<4x256xf32>, i32 -> vector<4x256xf32>
    %204 = vector.extract_strided_slice %113 {offsets = [0, 11], sizes = [4, 1], strides = [1, 1]} : vector<4x25xf32> to vector<4x1xf32>
    %205 = vector.extract_strided_slice %2 {offsets = [11, 0], sizes = [1, 256], strides = [1, 1]} : vector<25x256xf32> to vector<1x256xf32>
    %206 = vector.broadcast %205 : vector<1x256xf32> to vector<4x256xf32>
    %207 = arith.mulf %203, %206 : vector<4x256xf32>
    %208 = vector.broadcast %204 : vector<4x1xf32> to vector<4x256xf32>
    %209 = arith.mulf %208, %207 : vector<4x256xf32>
    %210 = arith.addf %202, %209 : vector<4x256xf32>
    %211 = vector.extract_strided_slice %113 {offsets = [0, 12], sizes = [4, 1], strides = [1, 1]} : vector<4x25xf32> to vector<4x1xf32>
    %212 = vector.extract_strided_slice %2 {offsets = [12, 0], sizes = [1, 256], strides = [1, 1]} : vector<25x256xf32> to vector<1x256xf32>
    %213 = vector.broadcast %212 : vector<1x256xf32> to vector<4x256xf32>
    %214 = arith.mulf %112, %213 : vector<4x256xf32>
    %215 = vector.broadcast %211 : vector<4x1xf32> to vector<4x256xf32>
    %216 = arith.mulf %215, %214 : vector<4x256xf32>
    %217 = arith.addf %210, %216 : vector<4x256xf32>
    %c255_i32 = arith.constant 255 : i32
    %218 = tpu.dynamic_rotate %112 by %c255_i32 dim 1 : vector<4x256xf32>, i32 -> vector<4x256xf32>
    %219 = vector.extract_strided_slice %113 {offsets = [0, 13], sizes = [4, 1], strides = [1, 1]} : vector<4x25xf32> to vector<4x1xf32>
    %220 = vector.extract_strided_slice %2 {offsets = [13, 0], sizes = [1, 256], strides = [1, 1]} : vector<25x256xf32> to vector<1x256xf32>
    %221 = vector.broadcast %220 : vector<1x256xf32> to vector<4x256xf32>
    %222 = arith.mulf %218, %221 : vector<4x256xf32>
    %223 = vector.broadcast %219 : vector<4x1xf32> to vector<4x256xf32>
    %224 = arith.mulf %223, %222 : vector<4x256xf32>
    %225 = arith.addf %217, %224 : vector<4x256xf32>
    %c254_i32 = arith.constant 254 : i32
    %226 = tpu.dynamic_rotate %112 by %c254_i32 dim 1 : vector<4x256xf32>, i32 -> vector<4x256xf32>
    %227 = vector.extract_strided_slice %113 {offsets = [0, 14], sizes = [4, 1], strides = [1, 1]} : vector<4x25xf32> to vector<4x1xf32>
    %228 = vector.extract_strided_slice %2 {offsets = [14, 0], sizes = [1, 256], strides = [1, 1]} : vector<25x256xf32> to vector<1x256xf32>
    %229 = vector.broadcast %228 : vector<1x256xf32> to vector<4x256xf32>
    %230 = arith.mulf %226, %229 : vector<4x256xf32>
    %231 = vector.broadcast %227 : vector<4x1xf32> to vector<4x256xf32>
    %232 = arith.mulf %231, %230 : vector<4x256xf32>
    %233 = arith.addf %225, %232 : vector<4x256xf32>
    %c242_i32 = arith.constant 242 : i32
    %234 = tpu.dynamic_rotate %112 by %c242_i32 dim 1 : vector<4x256xf32>, i32 -> vector<4x256xf32>
    %235 = vector.extract_strided_slice %113 {offsets = [0, 15], sizes = [4, 1], strides = [1, 1]} : vector<4x25xf32> to vector<4x1xf32>
    %236 = vector.extract_strided_slice %2 {offsets = [15, 0], sizes = [1, 256], strides = [1, 1]} : vector<25x256xf32> to vector<1x256xf32>
    %237 = vector.broadcast %236 : vector<1x256xf32> to vector<4x256xf32>
    %238 = arith.mulf %234, %237 : vector<4x256xf32>
    %239 = vector.broadcast %235 : vector<4x1xf32> to vector<4x256xf32>
    %240 = arith.mulf %239, %238 : vector<4x256xf32>
    %241 = arith.addf %233, %240 : vector<4x256xf32>
    %c241_i32 = arith.constant 241 : i32
    %242 = tpu.dynamic_rotate %112 by %c241_i32 dim 1 : vector<4x256xf32>, i32 -> vector<4x256xf32>
    %243 = vector.extract_strided_slice %113 {offsets = [0, 16], sizes = [4, 1], strides = [1, 1]} : vector<4x25xf32> to vector<4x1xf32>
    %244 = vector.extract_strided_slice %2 {offsets = [16, 0], sizes = [1, 256], strides = [1, 1]} : vector<25x256xf32> to vector<1x256xf32>
    %245 = vector.broadcast %244 : vector<1x256xf32> to vector<4x256xf32>
    %246 = arith.mulf %242, %245 : vector<4x256xf32>
    %247 = vector.broadcast %243 : vector<4x1xf32> to vector<4x256xf32>
    %248 = arith.mulf %247, %246 : vector<4x256xf32>
    %249 = arith.addf %241, %248 : vector<4x256xf32>
    %c240_i32 = arith.constant 240 : i32
    %250 = tpu.dynamic_rotate %112 by %c240_i32 dim 1 : vector<4x256xf32>, i32 -> vector<4x256xf32>
    %251 = vector.extract_strided_slice %113 {offsets = [0, 17], sizes = [4, 1], strides = [1, 1]} : vector<4x25xf32> to vector<4x1xf32>
    %252 = vector.extract_strided_slice %2 {offsets = [17, 0], sizes = [1, 256], strides = [1, 1]} : vector<25x256xf32> to vector<1x256xf32>
    %253 = vector.broadcast %252 : vector<1x256xf32> to vector<4x256xf32>
    %254 = arith.mulf %250, %253 : vector<4x256xf32>
    %255 = vector.broadcast %251 : vector<4x1xf32> to vector<4x256xf32>
    %256 = arith.mulf %255, %254 : vector<4x256xf32>
    %257 = arith.addf %249, %256 : vector<4x256xf32>
    %c239_i32 = arith.constant 239 : i32
    %258 = tpu.dynamic_rotate %112 by %c239_i32 dim 1 : vector<4x256xf32>, i32 -> vector<4x256xf32>
    %259 = vector.extract_strided_slice %113 {offsets = [0, 18], sizes = [4, 1], strides = [1, 1]} : vector<4x25xf32> to vector<4x1xf32>
    %260 = vector.extract_strided_slice %2 {offsets = [18, 0], sizes = [1, 256], strides = [1, 1]} : vector<25x256xf32> to vector<1x256xf32>
    %261 = vector.broadcast %260 : vector<1x256xf32> to vector<4x256xf32>
    %262 = arith.mulf %258, %261 : vector<4x256xf32>
    %263 = vector.broadcast %259 : vector<4x1xf32> to vector<4x256xf32>
    %264 = arith.mulf %263, %262 : vector<4x256xf32>
    %265 = arith.addf %257, %264 : vector<4x256xf32>
    %c238_i32 = arith.constant 238 : i32
    %266 = tpu.dynamic_rotate %112 by %c238_i32 dim 1 : vector<4x256xf32>, i32 -> vector<4x256xf32>
    %267 = vector.extract_strided_slice %113 {offsets = [0, 19], sizes = [4, 1], strides = [1, 1]} : vector<4x25xf32> to vector<4x1xf32>
    %268 = vector.extract_strided_slice %2 {offsets = [19, 0], sizes = [1, 256], strides = [1, 1]} : vector<25x256xf32> to vector<1x256xf32>
    %269 = vector.broadcast %268 : vector<1x256xf32> to vector<4x256xf32>
    %270 = arith.mulf %266, %269 : vector<4x256xf32>
    %271 = vector.broadcast %267 : vector<4x1xf32> to vector<4x256xf32>
    %272 = arith.mulf %271, %270 : vector<4x256xf32>
    %273 = arith.addf %265, %272 : vector<4x256xf32>
    %c226_i32 = arith.constant 226 : i32
    %274 = tpu.dynamic_rotate %112 by %c226_i32 dim 1 : vector<4x256xf32>, i32 -> vector<4x256xf32>
    %275 = vector.extract_strided_slice %113 {offsets = [0, 20], sizes = [4, 1], strides = [1, 1]} : vector<4x25xf32> to vector<4x1xf32>
    %276 = vector.extract_strided_slice %2 {offsets = [20, 0], sizes = [1, 256], strides = [1, 1]} : vector<25x256xf32> to vector<1x256xf32>
    %277 = vector.broadcast %276 : vector<1x256xf32> to vector<4x256xf32>
    %278 = arith.mulf %274, %277 : vector<4x256xf32>
    %279 = vector.broadcast %275 : vector<4x1xf32> to vector<4x256xf32>
    %280 = arith.mulf %279, %278 : vector<4x256xf32>
    %281 = arith.addf %273, %280 : vector<4x256xf32>
    %c225_i32 = arith.constant 225 : i32
    %282 = tpu.dynamic_rotate %112 by %c225_i32 dim 1 : vector<4x256xf32>, i32 -> vector<4x256xf32>
    %283 = vector.extract_strided_slice %113 {offsets = [0, 21], sizes = [4, 1], strides = [1, 1]} : vector<4x25xf32> to vector<4x1xf32>
    %284 = vector.extract_strided_slice %2 {offsets = [21, 0], sizes = [1, 256], strides = [1, 1]} : vector<25x256xf32> to vector<1x256xf32>
    %285 = vector.broadcast %284 : vector<1x256xf32> to vector<4x256xf32>
    %286 = arith.mulf %282, %285 : vector<4x256xf32>
    %287 = vector.broadcast %283 : vector<4x1xf32> to vector<4x256xf32>
    %288 = arith.mulf %287, %286 : vector<4x256xf32>
    %289 = arith.addf %281, %288 : vector<4x256xf32>
    %c224_i32 = arith.constant 224 : i32
    %290 = tpu.dynamic_rotate %112 by %c224_i32 dim 1 : vector<4x256xf32>, i32 -> vector<4x256xf32>
    %291 = vector.extract_strided_slice %113 {offsets = [0, 22], sizes = [4, 1], strides = [1, 1]} : vector<4x25xf32> to vector<4x1xf32>
    %292 = vector.extract_strided_slice %2 {offsets = [22, 0], sizes = [1, 256], strides = [1, 1]} : vector<25x256xf32> to vector<1x256xf32>
    %293 = vector.broadcast %292 : vector<1x256xf32> to vector<4x256xf32>
    %294 = arith.mulf %290, %293 : vector<4x256xf32>
    %295 = vector.broadcast %291 : vector<4x1xf32> to vector<4x256xf32>
    %296 = arith.mulf %295, %294 : vector<4x256xf32>
    %297 = arith.addf %289, %296 : vector<4x256xf32>
    %c223_i32 = arith.constant 223 : i32
    %298 = tpu.dynamic_rotate %112 by %c223_i32 dim 1 : vector<4x256xf32>, i32 -> vector<4x256xf32>
    %299 = vector.extract_strided_slice %113 {offsets = [0, 23], sizes = [4, 1], strides = [1, 1]} : vector<4x25xf32> to vector<4x1xf32>
    %300 = vector.extract_strided_slice %2 {offsets = [23, 0], sizes = [1, 256], strides = [1, 1]} : vector<25x256xf32> to vector<1x256xf32>
    %301 = vector.broadcast %300 : vector<1x256xf32> to vector<4x256xf32>
    %302 = arith.mulf %298, %301 : vector<4x256xf32>
    %303 = vector.broadcast %299 : vector<4x1xf32> to vector<4x256xf32>
    %304 = arith.mulf %303, %302 : vector<4x256xf32>
    %305 = arith.addf %297, %304 : vector<4x256xf32>
    %c222_i32 = arith.constant 222 : i32
    %306 = tpu.dynamic_rotate %112 by %c222_i32 dim 1 : vector<4x256xf32>, i32 -> vector<4x256xf32>
    %307 = vector.extract_strided_slice %113 {offsets = [0, 24], sizes = [4, 1], strides = [1, 1]} : vector<4x25xf32> to vector<4x1xf32>
    %308 = vector.extract_strided_slice %2 {offsets = [24, 0], sizes = [1, 256], strides = [1, 1]} : vector<25x256xf32> to vector<1x256xf32>
    %309 = vector.broadcast %308 : vector<1x256xf32> to vector<4x256xf32>
    %310 = arith.mulf %306, %309 : vector<4x256xf32>
    %311 = vector.broadcast %307 : vector<4x1xf32> to vector<4x256xf32>
    %312 = arith.mulf %311, %310 : vector<4x256xf32>
    %313 = arith.addf %305, %312 : vector<4x256xf32>
    %c0_18 = arith.constant 0 : index
    %c0_19 = arith.constant 0 : index
    %314 = vector.load %arg7[%c0_18, %c0_19] : memref<4x1xf32, #tpu.memory_space<vmem>>, vector<4x1xf32>
    %cst_20 = arith.constant 0.000000e+00 : f32
    %315 = vector.broadcast %cst_20 : f32 to vector<4x256xf32>
    %316 = vector.broadcast %314 : vector<4x1xf32> to vector<4x256xf32>
    %317 = arith.addf %315, %316 : vector<4x256xf32>
    %318 = vector.extract_strided_slice %4 {offsets = [0, 0], sizes = [4, 1], strides = [1, 1]} : vector<4x4xf32> to vector<4x1xf32>
    %319 = vector.extract_strided_slice %112 {offsets = [0, 0], sizes = [1, 256], strides = [1, 1]} : vector<4x256xf32> to vector<1x256xf32>
    %320 = vector.broadcast %318 : vector<4x1xf32> to vector<4x256xf32>
    %321 = vector.broadcast %319 : vector<1x256xf32> to vector<4x256xf32>
    %322 = arith.mulf %320, %321 : vector<4x256xf32>
    %323 = arith.addf %317, %322 : vector<4x256xf32>
    %324 = vector.extract_strided_slice %4 {offsets = [0, 1], sizes = [4, 1], strides = [1, 1]} : vector<4x4xf32> to vector<4x1xf32>
    %325 = vector.extract_strided_slice %112 {offsets = [1, 0], sizes = [1, 256], strides = [1, 1]} : vector<4x256xf32> to vector<1x256xf32>
    %326 = vector.broadcast %324 : vector<4x1xf32> to vector<4x256xf32>
    %327 = vector.broadcast %325 : vector<1x256xf32> to vector<4x256xf32>
    %328 = arith.mulf %326, %327 : vector<4x256xf32>
    %329 = arith.addf %323, %328 : vector<4x256xf32>
    %330 = vector.extract_strided_slice %4 {offsets = [0, 2], sizes = [4, 1], strides = [1, 1]} : vector<4x4xf32> to vector<4x1xf32>
    %331 = vector.extract_strided_slice %112 {offsets = [2, 0], sizes = [1, 256], strides = [1, 1]} : vector<4x256xf32> to vector<1x256xf32>
    %332 = vector.broadcast %330 : vector<4x1xf32> to vector<4x256xf32>
    %333 = vector.broadcast %331 : vector<1x256xf32> to vector<4x256xf32>
    %334 = arith.mulf %332, %333 : vector<4x256xf32>
    %335 = arith.addf %329, %334 : vector<4x256xf32>
    %336 = vector.extract_strided_slice %4 {offsets = [0, 3], sizes = [4, 1], strides = [1, 1]} : vector<4x4xf32> to vector<4x1xf32>
    %337 = vector.extract_strided_slice %112 {offsets = [3, 0], sizes = [1, 256], strides = [1, 1]} : vector<4x256xf32> to vector<1x256xf32>
    %338 = vector.broadcast %336 : vector<4x1xf32> to vector<4x256xf32>
    %339 = vector.broadcast %337 : vector<1x256xf32> to vector<4x256xf32>
    %340 = arith.mulf %338, %339 : vector<4x256xf32>
    %341 = arith.addf %335, %340 : vector<4x256xf32>
    %342 = arith.addf %313, %341 : vector<4x256xf32>
    %343 = arith.negf %342 : vector<4x256xf32>
    %344 = math.exp %343 : vector<4x256xf32>
    %cst_21 = arith.constant 1.000000e+00 : f32
    %345 = vector.broadcast %cst_21 : f32 to vector<4x256xf32>
    %346 = arith.addf %345, %344 : vector<4x256xf32>
    %347 = arith.divf %345, %346 : vector<4x256xf32>
    %348 = arith.mulf %342, %347 : vector<4x256xf32>
    %349 = vector.extract_strided_slice %5 {offsets = [0, 0], sizes = [8, 4], strides = [1, 1]} : vector<8x8xf32> to vector<8x4xf32>
    %350 = vector.extract_strided_slice %5 {offsets = [0, 4], sizes = [8, 4], strides = [1, 1]} : vector<8x8xf32> to vector<8x4xf32>
    %c0_22 = arith.constant 0 : index
    %c0_23 = arith.constant 0 : index
    %351 = vector.load %arg9[%c0_22, %c0_23] : memref<8x1xf32, #tpu.memory_space<vmem>>, vector<8x1xf32>
    %cst_24 = arith.constant 0.000000e+00 : f32
    %352 = vector.broadcast %cst_24 : f32 to vector<8x256xf32>
    %353 = vector.broadcast %351 : vector<8x1xf32> to vector<8x256xf32>
    %354 = arith.addf %352, %353 : vector<8x256xf32>
    %355 = vector.extract_strided_slice %349 {offsets = [0, 0], sizes = [8, 1], strides = [1, 1]} : vector<8x4xf32> to vector<8x1xf32>
    %356 = vector.extract_strided_slice %112 {offsets = [0, 0], sizes = [1, 256], strides = [1, 1]} : vector<4x256xf32> to vector<1x256xf32>
    %357 = vector.broadcast %355 : vector<8x1xf32> to vector<8x256xf32>
    %358 = vector.broadcast %356 : vector<1x256xf32> to vector<8x256xf32>
    %359 = arith.mulf %357, %358 : vector<8x256xf32>
    %360 = arith.addf %354, %359 : vector<8x256xf32>
    %361 = vector.extract_strided_slice %349 {offsets = [0, 1], sizes = [8, 1], strides = [1, 1]} : vector<8x4xf32> to vector<8x1xf32>
    %362 = vector.extract_strided_slice %112 {offsets = [1, 0], sizes = [1, 256], strides = [1, 1]} : vector<4x256xf32> to vector<1x256xf32>
    %363 = vector.broadcast %361 : vector<8x1xf32> to vector<8x256xf32>
    %364 = vector.broadcast %362 : vector<1x256xf32> to vector<8x256xf32>
    %365 = arith.mulf %363, %364 : vector<8x256xf32>
    %366 = arith.addf %360, %365 : vector<8x256xf32>
    %367 = vector.extract_strided_slice %349 {offsets = [0, 2], sizes = [8, 1], strides = [1, 1]} : vector<8x4xf32> to vector<8x1xf32>
    %368 = vector.extract_strided_slice %112 {offsets = [2, 0], sizes = [1, 256], strides = [1, 1]} : vector<4x256xf32> to vector<1x256xf32>
    %369 = vector.broadcast %367 : vector<8x1xf32> to vector<8x256xf32>
    %370 = vector.broadcast %368 : vector<1x256xf32> to vector<8x256xf32>
    %371 = arith.mulf %369, %370 : vector<8x256xf32>
    %372 = arith.addf %366, %371 : vector<8x256xf32>
    %373 = vector.extract_strided_slice %349 {offsets = [0, 3], sizes = [8, 1], strides = [1, 1]} : vector<8x4xf32> to vector<8x1xf32>
    %374 = vector.extract_strided_slice %112 {offsets = [3, 0], sizes = [1, 256], strides = [1, 1]} : vector<4x256xf32> to vector<1x256xf32>
    %375 = vector.broadcast %373 : vector<8x1xf32> to vector<8x256xf32>
    %376 = vector.broadcast %374 : vector<1x256xf32> to vector<8x256xf32>
    %377 = arith.mulf %375, %376 : vector<8x256xf32>
    %378 = arith.addf %372, %377 : vector<8x256xf32>
    %379 = vector.extract_strided_slice %350 {offsets = [0, 0], sizes = [8, 1], strides = [1, 1]} : vector<8x4xf32> to vector<8x1xf32>
    %380 = vector.extract_strided_slice %348 {offsets = [0, 0], sizes = [1, 256], strides = [1, 1]} : vector<4x256xf32> to vector<1x256xf32>
    %381 = vector.broadcast %379 : vector<8x1xf32> to vector<8x256xf32>
    %382 = vector.broadcast %380 : vector<1x256xf32> to vector<8x256xf32>
    %383 = arith.mulf %381, %382 : vector<8x256xf32>
    %384 = arith.addf %378, %383 : vector<8x256xf32>
    %385 = vector.extract_strided_slice %350 {offsets = [0, 1], sizes = [8, 1], strides = [1, 1]} : vector<8x4xf32> to vector<8x1xf32>
    %386 = vector.extract_strided_slice %348 {offsets = [1, 0], sizes = [1, 256], strides = [1, 1]} : vector<4x256xf32> to vector<1x256xf32>
    %387 = vector.broadcast %385 : vector<8x1xf32> to vector<8x256xf32>
    %388 = vector.broadcast %386 : vector<1x256xf32> to vector<8x256xf32>
    %389 = arith.mulf %387, %388 : vector<8x256xf32>
    %390 = arith.addf %384, %389 : vector<8x256xf32>
    %391 = vector.extract_strided_slice %350 {offsets = [0, 2], sizes = [8, 1], strides = [1, 1]} : vector<8x4xf32> to vector<8x1xf32>
    %392 = vector.extract_strided_slice %348 {offsets = [2, 0], sizes = [1, 256], strides = [1, 1]} : vector<4x256xf32> to vector<1x256xf32>
    %393 = vector.broadcast %391 : vector<8x1xf32> to vector<8x256xf32>
    %394 = vector.broadcast %392 : vector<1x256xf32> to vector<8x256xf32>
    %395 = arith.mulf %393, %394 : vector<8x256xf32>
    %396 = arith.addf %390, %395 : vector<8x256xf32>
    %397 = vector.extract_strided_slice %350 {offsets = [0, 3], sizes = [8, 1], strides = [1, 1]} : vector<8x4xf32> to vector<8x1xf32>
    %398 = vector.extract_strided_slice %348 {offsets = [3, 0], sizes = [1, 256], strides = [1, 1]} : vector<4x256xf32> to vector<1x256xf32>
    %399 = vector.broadcast %397 : vector<8x1xf32> to vector<8x256xf32>
    %400 = vector.broadcast %398 : vector<1x256xf32> to vector<8x256xf32>
    %401 = arith.mulf %399, %400 : vector<8x256xf32>
    %402 = arith.addf %396, %401 : vector<8x256xf32>
    %c0_25 = arith.constant 0 : index
    %c0_26 = arith.constant 0 : index
    %403 = vector.load %arg10[%c0_25, %c0_26] : memref<8x25xf32, #tpu.memory_space<vmem>>, vector<8x25xf32>
    %cst_27 = arith.constant 0.000000e+00 : f32
    %404 = vector.broadcast %cst_27 : f32 to vector<8x256xf32>
    %c34_i32_28 = arith.constant 34 : i32
    %405 = tpu.dynamic_rotate %402 by %c34_i32_28 dim 1 : vector<8x256xf32>, i32 -> vector<8x256xf32>
    %406 = vector.extract_strided_slice %403 {offsets = [0, 0], sizes = [8, 1], strides = [1, 1]} : vector<8x25xf32> to vector<8x1xf32>
    %407 = vector.extract_strided_slice %2 {offsets = [0, 0], sizes = [1, 256], strides = [1, 1]} : vector<25x256xf32> to vector<1x256xf32>
    %408 = vector.broadcast %407 : vector<1x256xf32> to vector<8x256xf32>
    %409 = arith.mulf %405, %408 : vector<8x256xf32>
    %410 = vector.broadcast %406 : vector<8x1xf32> to vector<8x256xf32>
    %411 = arith.mulf %410, %409 : vector<8x256xf32>
    %412 = arith.addf %404, %411 : vector<8x256xf32>
    %c33_i32_29 = arith.constant 33 : i32
    %413 = tpu.dynamic_rotate %402 by %c33_i32_29 dim 1 : vector<8x256xf32>, i32 -> vector<8x256xf32>
    %414 = vector.extract_strided_slice %403 {offsets = [0, 1], sizes = [8, 1], strides = [1, 1]} : vector<8x25xf32> to vector<8x1xf32>
    %415 = vector.extract_strided_slice %2 {offsets = [1, 0], sizes = [1, 256], strides = [1, 1]} : vector<25x256xf32> to vector<1x256xf32>
    %416 = vector.broadcast %415 : vector<1x256xf32> to vector<8x256xf32>
    %417 = arith.mulf %413, %416 : vector<8x256xf32>
    %418 = vector.broadcast %414 : vector<8x1xf32> to vector<8x256xf32>
    %419 = arith.mulf %418, %417 : vector<8x256xf32>
    %420 = arith.addf %412, %419 : vector<8x256xf32>
    %c32_i32_30 = arith.constant 32 : i32
    %421 = tpu.dynamic_rotate %402 by %c32_i32_30 dim 1 : vector<8x256xf32>, i32 -> vector<8x256xf32>
    %422 = vector.extract_strided_slice %403 {offsets = [0, 2], sizes = [8, 1], strides = [1, 1]} : vector<8x25xf32> to vector<8x1xf32>
    %423 = vector.extract_strided_slice %2 {offsets = [2, 0], sizes = [1, 256], strides = [1, 1]} : vector<25x256xf32> to vector<1x256xf32>
    %424 = vector.broadcast %423 : vector<1x256xf32> to vector<8x256xf32>
    %425 = arith.mulf %421, %424 : vector<8x256xf32>
    %426 = vector.broadcast %422 : vector<8x1xf32> to vector<8x256xf32>
    %427 = arith.mulf %426, %425 : vector<8x256xf32>
    %428 = arith.addf %420, %427 : vector<8x256xf32>
    %c31_i32_31 = arith.constant 31 : i32
    %429 = tpu.dynamic_rotate %402 by %c31_i32_31 dim 1 : vector<8x256xf32>, i32 -> vector<8x256xf32>
    %430 = vector.extract_strided_slice %403 {offsets = [0, 3], sizes = [8, 1], strides = [1, 1]} : vector<8x25xf32> to vector<8x1xf32>
    %431 = vector.extract_strided_slice %2 {offsets = [3, 0], sizes = [1, 256], strides = [1, 1]} : vector<25x256xf32> to vector<1x256xf32>
    %432 = vector.broadcast %431 : vector<1x256xf32> to vector<8x256xf32>
    %433 = arith.mulf %429, %432 : vector<8x256xf32>
    %434 = vector.broadcast %430 : vector<8x1xf32> to vector<8x256xf32>
    %435 = arith.mulf %434, %433 : vector<8x256xf32>
    %436 = arith.addf %428, %435 : vector<8x256xf32>
    %c30_i32_32 = arith.constant 30 : i32
    %437 = tpu.dynamic_rotate %402 by %c30_i32_32 dim 1 : vector<8x256xf32>, i32 -> vector<8x256xf32>
    %438 = vector.extract_strided_slice %403 {offsets = [0, 4], sizes = [8, 1], strides = [1, 1]} : vector<8x25xf32> to vector<8x1xf32>
    %439 = vector.extract_strided_slice %2 {offsets = [4, 0], sizes = [1, 256], strides = [1, 1]} : vector<25x256xf32> to vector<1x256xf32>
    %440 = vector.broadcast %439 : vector<1x256xf32> to vector<8x256xf32>
    %441 = arith.mulf %437, %440 : vector<8x256xf32>
    %442 = vector.broadcast %438 : vector<8x1xf32> to vector<8x256xf32>
    %443 = arith.mulf %442, %441 : vector<8x256xf32>
    %444 = arith.addf %436, %443 : vector<8x256xf32>
    %c18_i32_33 = arith.constant 18 : i32
    %445 = tpu.dynamic_rotate %402 by %c18_i32_33 dim 1 : vector<8x256xf32>, i32 -> vector<8x256xf32>
    %446 = vector.extract_strided_slice %403 {offsets = [0, 5], sizes = [8, 1], strides = [1, 1]} : vector<8x25xf32> to vector<8x1xf32>
    %447 = vector.extract_strided_slice %2 {offsets = [5, 0], sizes = [1, 256], strides = [1, 1]} : vector<25x256xf32> to vector<1x256xf32>
    %448 = vector.broadcast %447 : vector<1x256xf32> to vector<8x256xf32>
    %449 = arith.mulf %445, %448 : vector<8x256xf32>
    %450 = vector.broadcast %446 : vector<8x1xf32> to vector<8x256xf32>
    %451 = arith.mulf %450, %449 : vector<8x256xf32>
    %452 = arith.addf %444, %451 : vector<8x256xf32>
    %c17_i32_34 = arith.constant 17 : i32
    %453 = tpu.dynamic_rotate %402 by %c17_i32_34 dim 1 : vector<8x256xf32>, i32 -> vector<8x256xf32>
    %454 = vector.extract_strided_slice %403 {offsets = [0, 6], sizes = [8, 1], strides = [1, 1]} : vector<8x25xf32> to vector<8x1xf32>
    %455 = vector.extract_strided_slice %2 {offsets = [6, 0], sizes = [1, 256], strides = [1, 1]} : vector<25x256xf32> to vector<1x256xf32>
    %456 = vector.broadcast %455 : vector<1x256xf32> to vector<8x256xf32>
    %457 = arith.mulf %453, %456 : vector<8x256xf32>
    %458 = vector.broadcast %454 : vector<8x1xf32> to vector<8x256xf32>
    %459 = arith.mulf %458, %457 : vector<8x256xf32>
    %460 = arith.addf %452, %459 : vector<8x256xf32>
    %c16_i32_35 = arith.constant 16 : i32
    %461 = tpu.dynamic_rotate %402 by %c16_i32_35 dim 1 : vector<8x256xf32>, i32 -> vector<8x256xf32>
    %462 = vector.extract_strided_slice %403 {offsets = [0, 7], sizes = [8, 1], strides = [1, 1]} : vector<8x25xf32> to vector<8x1xf32>
    %463 = vector.extract_strided_slice %2 {offsets = [7, 0], sizes = [1, 256], strides = [1, 1]} : vector<25x256xf32> to vector<1x256xf32>
    %464 = vector.broadcast %463 : vector<1x256xf32> to vector<8x256xf32>
    %465 = arith.mulf %461, %464 : vector<8x256xf32>
    %466 = vector.broadcast %462 : vector<8x1xf32> to vector<8x256xf32>
    %467 = arith.mulf %466, %465 : vector<8x256xf32>
    %468 = arith.addf %460, %467 : vector<8x256xf32>
    %c15_i32_36 = arith.constant 15 : i32
    %469 = tpu.dynamic_rotate %402 by %c15_i32_36 dim 1 : vector<8x256xf32>, i32 -> vector<8x256xf32>
    %470 = vector.extract_strided_slice %403 {offsets = [0, 8], sizes = [8, 1], strides = [1, 1]} : vector<8x25xf32> to vector<8x1xf32>
    %471 = vector.extract_strided_slice %2 {offsets = [8, 0], sizes = [1, 256], strides = [1, 1]} : vector<25x256xf32> to vector<1x256xf32>
    %472 = vector.broadcast %471 : vector<1x256xf32> to vector<8x256xf32>
    %473 = arith.mulf %469, %472 : vector<8x256xf32>
    %474 = vector.broadcast %470 : vector<8x1xf32> to vector<8x256xf32>
    %475 = arith.mulf %474, %473 : vector<8x256xf32>
    %476 = arith.addf %468, %475 : vector<8x256xf32>
    %c14_i32_37 = arith.constant 14 : i32
    %477 = tpu.dynamic_rotate %402 by %c14_i32_37 dim 1 : vector<8x256xf32>, i32 -> vector<8x256xf32>
    %478 = vector.extract_strided_slice %403 {offsets = [0, 9], sizes = [8, 1], strides = [1, 1]} : vector<8x25xf32> to vector<8x1xf32>
    %479 = vector.extract_strided_slice %2 {offsets = [9, 0], sizes = [1, 256], strides = [1, 1]} : vector<25x256xf32> to vector<1x256xf32>
    %480 = vector.broadcast %479 : vector<1x256xf32> to vector<8x256xf32>
    %481 = arith.mulf %477, %480 : vector<8x256xf32>
    %482 = vector.broadcast %478 : vector<8x1xf32> to vector<8x256xf32>
    %483 = arith.mulf %482, %481 : vector<8x256xf32>
    %484 = arith.addf %476, %483 : vector<8x256xf32>
    %c2_i32_38 = arith.constant 2 : i32
    %485 = tpu.dynamic_rotate %402 by %c2_i32_38 dim 1 : vector<8x256xf32>, i32 -> vector<8x256xf32>
    %486 = vector.extract_strided_slice %403 {offsets = [0, 10], sizes = [8, 1], strides = [1, 1]} : vector<8x25xf32> to vector<8x1xf32>
    %487 = vector.extract_strided_slice %2 {offsets = [10, 0], sizes = [1, 256], strides = [1, 1]} : vector<25x256xf32> to vector<1x256xf32>
    %488 = vector.broadcast %487 : vector<1x256xf32> to vector<8x256xf32>
    %489 = arith.mulf %485, %488 : vector<8x256xf32>
    %490 = vector.broadcast %486 : vector<8x1xf32> to vector<8x256xf32>
    %491 = arith.mulf %490, %489 : vector<8x256xf32>
    %492 = arith.addf %484, %491 : vector<8x256xf32>
    %c1_i32_39 = arith.constant 1 : i32
    %493 = tpu.dynamic_rotate %402 by %c1_i32_39 dim 1 : vector<8x256xf32>, i32 -> vector<8x256xf32>
    %494 = vector.extract_strided_slice %403 {offsets = [0, 11], sizes = [8, 1], strides = [1, 1]} : vector<8x25xf32> to vector<8x1xf32>
    %495 = vector.extract_strided_slice %2 {offsets = [11, 0], sizes = [1, 256], strides = [1, 1]} : vector<25x256xf32> to vector<1x256xf32>
    %496 = vector.broadcast %495 : vector<1x256xf32> to vector<8x256xf32>
    %497 = arith.mulf %493, %496 : vector<8x256xf32>
    %498 = vector.broadcast %494 : vector<8x1xf32> to vector<8x256xf32>
    %499 = arith.mulf %498, %497 : vector<8x256xf32>
    %500 = arith.addf %492, %499 : vector<8x256xf32>
    %501 = vector.extract_strided_slice %403 {offsets = [0, 12], sizes = [8, 1], strides = [1, 1]} : vector<8x25xf32> to vector<8x1xf32>
    %502 = vector.extract_strided_slice %2 {offsets = [12, 0], sizes = [1, 256], strides = [1, 1]} : vector<25x256xf32> to vector<1x256xf32>
    %503 = vector.broadcast %502 : vector<1x256xf32> to vector<8x256xf32>
    %504 = arith.mulf %402, %503 : vector<8x256xf32>
    %505 = vector.broadcast %501 : vector<8x1xf32> to vector<8x256xf32>
    %506 = arith.mulf %505, %504 : vector<8x256xf32>
    %507 = arith.addf %500, %506 : vector<8x256xf32>
    %c255_i32_40 = arith.constant 255 : i32
    %508 = tpu.dynamic_rotate %402 by %c255_i32_40 dim 1 : vector<8x256xf32>, i32 -> vector<8x256xf32>
    %509 = vector.extract_strided_slice %403 {offsets = [0, 13], sizes = [8, 1], strides = [1, 1]} : vector<8x25xf32> to vector<8x1xf32>
    %510 = vector.extract_strided_slice %2 {offsets = [13, 0], sizes = [1, 256], strides = [1, 1]} : vector<25x256xf32> to vector<1x256xf32>
    %511 = vector.broadcast %510 : vector<1x256xf32> to vector<8x256xf32>
    %512 = arith.mulf %508, %511 : vector<8x256xf32>
    %513 = vector.broadcast %509 : vector<8x1xf32> to vector<8x256xf32>
    %514 = arith.mulf %513, %512 : vector<8x256xf32>
    %515 = arith.addf %507, %514 : vector<8x256xf32>
    %c254_i32_41 = arith.constant 254 : i32
    %516 = tpu.dynamic_rotate %402 by %c254_i32_41 dim 1 : vector<8x256xf32>, i32 -> vector<8x256xf32>
    %517 = vector.extract_strided_slice %403 {offsets = [0, 14], sizes = [8, 1], strides = [1, 1]} : vector<8x25xf32> to vector<8x1xf32>
    %518 = vector.extract_strided_slice %2 {offsets = [14, 0], sizes = [1, 256], strides = [1, 1]} : vector<25x256xf32> to vector<1x256xf32>
    %519 = vector.broadcast %518 : vector<1x256xf32> to vector<8x256xf32>
    %520 = arith.mulf %516, %519 : vector<8x256xf32>
    %521 = vector.broadcast %517 : vector<8x1xf32> to vector<8x256xf32>
    %522 = arith.mulf %521, %520 : vector<8x256xf32>
    %523 = arith.addf %515, %522 : vector<8x256xf32>
    %c242_i32_42 = arith.constant 242 : i32
    %524 = tpu.dynamic_rotate %402 by %c242_i32_42 dim 1 : vector<8x256xf32>, i32 -> vector<8x256xf32>
    %525 = vector.extract_strided_slice %403 {offsets = [0, 15], sizes = [8, 1], strides = [1, 1]} : vector<8x25xf32> to vector<8x1xf32>
    %526 = vector.extract_strided_slice %2 {offsets = [15, 0], sizes = [1, 256], strides = [1, 1]} : vector<25x256xf32> to vector<1x256xf32>
    %527 = vector.broadcast %526 : vector<1x256xf32> to vector<8x256xf32>
    %528 = arith.mulf %524, %527 : vector<8x256xf32>
    %529 = vector.broadcast %525 : vector<8x1xf32> to vector<8x256xf32>
    %530 = arith.mulf %529, %528 : vector<8x256xf32>
    %531 = arith.addf %523, %530 : vector<8x256xf32>
    %c241_i32_43 = arith.constant 241 : i32
    %532 = tpu.dynamic_rotate %402 by %c241_i32_43 dim 1 : vector<8x256xf32>, i32 -> vector<8x256xf32>
    %533 = vector.extract_strided_slice %403 {offsets = [0, 16], sizes = [8, 1], strides = [1, 1]} : vector<8x25xf32> to vector<8x1xf32>
    %534 = vector.extract_strided_slice %2 {offsets = [16, 0], sizes = [1, 256], strides = [1, 1]} : vector<25x256xf32> to vector<1x256xf32>
    %535 = vector.broadcast %534 : vector<1x256xf32> to vector<8x256xf32>
    %536 = arith.mulf %532, %535 : vector<8x256xf32>
    %537 = vector.broadcast %533 : vector<8x1xf32> to vector<8x256xf32>
    %538 = arith.mulf %537, %536 : vector<8x256xf32>
    %539 = arith.addf %531, %538 : vector<8x256xf32>
    %c240_i32_44 = arith.constant 240 : i32
    %540 = tpu.dynamic_rotate %402 by %c240_i32_44 dim 1 : vector<8x256xf32>, i32 -> vector<8x256xf32>
    %541 = vector.extract_strided_slice %403 {offsets = [0, 17], sizes = [8, 1], strides = [1, 1]} : vector<8x25xf32> to vector<8x1xf32>
    %542 = vector.extract_strided_slice %2 {offsets = [17, 0], sizes = [1, 256], strides = [1, 1]} : vector<25x256xf32> to vector<1x256xf32>
    %543 = vector.broadcast %542 : vector<1x256xf32> to vector<8x256xf32>
    %544 = arith.mulf %540, %543 : vector<8x256xf32>
    %545 = vector.broadcast %541 : vector<8x1xf32> to vector<8x256xf32>
    %546 = arith.mulf %545, %544 : vector<8x256xf32>
    %547 = arith.addf %539, %546 : vector<8x256xf32>
    %c239_i32_45 = arith.constant 239 : i32
    %548 = tpu.dynamic_rotate %402 by %c239_i32_45 dim 1 : vector<8x256xf32>, i32 -> vector<8x256xf32>
    %549 = vector.extract_strided_slice %403 {offsets = [0, 18], sizes = [8, 1], strides = [1, 1]} : vector<8x25xf32> to vector<8x1xf32>
    %550 = vector.extract_strided_slice %2 {offsets = [18, 0], sizes = [1, 256], strides = [1, 1]} : vector<25x256xf32> to vector<1x256xf32>
    %551 = vector.broadcast %550 : vector<1x256xf32> to vector<8x256xf32>
    %552 = arith.mulf %548, %551 : vector<8x256xf32>
    %553 = vector.broadcast %549 : vector<8x1xf32> to vector<8x256xf32>
    %554 = arith.mulf %553, %552 : vector<8x256xf32>
    %555 = arith.addf %547, %554 : vector<8x256xf32>
    %c238_i32_46 = arith.constant 238 : i32
    %556 = tpu.dynamic_rotate %402 by %c238_i32_46 dim 1 : vector<8x256xf32>, i32 -> vector<8x256xf32>
    %557 = vector.extract_strided_slice %403 {offsets = [0, 19], sizes = [8, 1], strides = [1, 1]} : vector<8x25xf32> to vector<8x1xf32>
    %558 = vector.extract_strided_slice %2 {offsets = [19, 0], sizes = [1, 256], strides = [1, 1]} : vector<25x256xf32> to vector<1x256xf32>
    %559 = vector.broadcast %558 : vector<1x256xf32> to vector<8x256xf32>
    %560 = arith.mulf %556, %559 : vector<8x256xf32>
    %561 = vector.broadcast %557 : vector<8x1xf32> to vector<8x256xf32>
    %562 = arith.mulf %561, %560 : vector<8x256xf32>
    %563 = arith.addf %555, %562 : vector<8x256xf32>
    %c226_i32_47 = arith.constant 226 : i32
    %564 = tpu.dynamic_rotate %402 by %c226_i32_47 dim 1 : vector<8x256xf32>, i32 -> vector<8x256xf32>
    %565 = vector.extract_strided_slice %403 {offsets = [0, 20], sizes = [8, 1], strides = [1, 1]} : vector<8x25xf32> to vector<8x1xf32>
    %566 = vector.extract_strided_slice %2 {offsets = [20, 0], sizes = [1, 256], strides = [1, 1]} : vector<25x256xf32> to vector<1x256xf32>
    %567 = vector.broadcast %566 : vector<1x256xf32> to vector<8x256xf32>
    %568 = arith.mulf %564, %567 : vector<8x256xf32>
    %569 = vector.broadcast %565 : vector<8x1xf32> to vector<8x256xf32>
    %570 = arith.mulf %569, %568 : vector<8x256xf32>
    %571 = arith.addf %563, %570 : vector<8x256xf32>
    %c225_i32_48 = arith.constant 225 : i32
    %572 = tpu.dynamic_rotate %402 by %c225_i32_48 dim 1 : vector<8x256xf32>, i32 -> vector<8x256xf32>
    %573 = vector.extract_strided_slice %403 {offsets = [0, 21], sizes = [8, 1], strides = [1, 1]} : vector<8x25xf32> to vector<8x1xf32>
    %574 = vector.extract_strided_slice %2 {offsets = [21, 0], sizes = [1, 256], strides = [1, 1]} : vector<25x256xf32> to vector<1x256xf32>
    %575 = vector.broadcast %574 : vector<1x256xf32> to vector<8x256xf32>
    %576 = arith.mulf %572, %575 : vector<8x256xf32>
    %577 = vector.broadcast %573 : vector<8x1xf32> to vector<8x256xf32>
    %578 = arith.mulf %577, %576 : vector<8x256xf32>
    %579 = arith.addf %571, %578 : vector<8x256xf32>
    %c224_i32_49 = arith.constant 224 : i32
    %580 = tpu.dynamic_rotate %402 by %c224_i32_49 dim 1 : vector<8x256xf32>, i32 -> vector<8x256xf32>
    %581 = vector.extract_strided_slice %403 {offsets = [0, 22], sizes = [8, 1], strides = [1, 1]} : vector<8x25xf32> to vector<8x1xf32>
    %582 = vector.extract_strided_slice %2 {offsets = [22, 0], sizes = [1, 256], strides = [1, 1]} : vector<25x256xf32> to vector<1x256xf32>
    %583 = vector.broadcast %582 : vector<1x256xf32> to vector<8x256xf32>
    %584 = arith.mulf %580, %583 : vector<8x256xf32>
    %585 = vector.broadcast %581 : vector<8x1xf32> to vector<8x256xf32>
    %586 = arith.mulf %585, %584 : vector<8x256xf32>
    %587 = arith.addf %579, %586 : vector<8x256xf32>
    %c223_i32_50 = arith.constant 223 : i32
    %588 = tpu.dynamic_rotate %402 by %c223_i32_50 dim 1 : vector<8x256xf32>, i32 -> vector<8x256xf32>
    %589 = vector.extract_strided_slice %403 {offsets = [0, 23], sizes = [8, 1], strides = [1, 1]} : vector<8x25xf32> to vector<8x1xf32>
    %590 = vector.extract_strided_slice %2 {offsets = [23, 0], sizes = [1, 256], strides = [1, 1]} : vector<25x256xf32> to vector<1x256xf32>
    %591 = vector.broadcast %590 : vector<1x256xf32> to vector<8x256xf32>
    %592 = arith.mulf %588, %591 : vector<8x256xf32>
    %593 = vector.broadcast %589 : vector<8x1xf32> to vector<8x256xf32>
    %594 = arith.mulf %593, %592 : vector<8x256xf32>
    %595 = arith.addf %587, %594 : vector<8x256xf32>
    %c222_i32_51 = arith.constant 222 : i32
    %596 = tpu.dynamic_rotate %402 by %c222_i32_51 dim 1 : vector<8x256xf32>, i32 -> vector<8x256xf32>
    %597 = vector.extract_strided_slice %403 {offsets = [0, 24], sizes = [8, 1], strides = [1, 1]} : vector<8x25xf32> to vector<8x1xf32>
    %598 = vector.extract_strided_slice %2 {offsets = [24, 0], sizes = [1, 256], strides = [1, 1]} : vector<25x256xf32> to vector<1x256xf32>
    %599 = vector.broadcast %598 : vector<1x256xf32> to vector<8x256xf32>
    %600 = arith.mulf %596, %599 : vector<8x256xf32>
    %601 = vector.broadcast %597 : vector<8x1xf32> to vector<8x256xf32>
    %602 = arith.mulf %601, %600 : vector<8x256xf32>
    %603 = arith.addf %595, %602 : vector<8x256xf32>
    %c0_52 = arith.constant 0 : index
    %c0_53 = arith.constant 0 : index
    %604 = vector.load %arg12[%c0_52, %c0_53] : memref<8x1xf32, #tpu.memory_space<vmem>>, vector<8x1xf32>
    %cst_54 = arith.constant 0.000000e+00 : f32
    %605 = vector.broadcast %cst_54 : f32 to vector<8x256xf32>
    %606 = vector.broadcast %604 : vector<8x1xf32> to vector<8x256xf32>
    %607 = arith.addf %605, %606 : vector<8x256xf32>
    %608 = vector.extract_strided_slice %6 {offsets = [0, 0], sizes = [8, 1], strides = [1, 1]} : vector<8x8xf32> to vector<8x1xf32>
    %609 = vector.extract_strided_slice %402 {offsets = [0, 0], sizes = [1, 256], strides = [1, 1]} : vector<8x256xf32> to vector<1x256xf32>
    %610 = vector.broadcast %608 : vector<8x1xf32> to vector<8x256xf32>
    %611 = vector.broadcast %609 : vector<1x256xf32> to vector<8x256xf32>
    %612 = arith.mulf %610, %611 : vector<8x256xf32>
    %613 = arith.addf %607, %612 : vector<8x256xf32>
    %614 = vector.extract_strided_slice %6 {offsets = [0, 1], sizes = [8, 1], strides = [1, 1]} : vector<8x8xf32> to vector<8x1xf32>
    %615 = vector.extract_strided_slice %402 {offsets = [1, 0], sizes = [1, 256], strides = [1, 1]} : vector<8x256xf32> to vector<1x256xf32>
    %616 = vector.broadcast %614 : vector<8x1xf32> to vector<8x256xf32>
    %617 = vector.broadcast %615 : vector<1x256xf32> to vector<8x256xf32>
    %618 = arith.mulf %616, %617 : vector<8x256xf32>
    %619 = arith.addf %613, %618 : vector<8x256xf32>
    %620 = vector.extract_strided_slice %6 {offsets = [0, 2], sizes = [8, 1], strides = [1, 1]} : vector<8x8xf32> to vector<8x1xf32>
    %621 = vector.extract_strided_slice %402 {offsets = [2, 0], sizes = [1, 256], strides = [1, 1]} : vector<8x256xf32> to vector<1x256xf32>
    %622 = vector.broadcast %620 : vector<8x1xf32> to vector<8x256xf32>
    %623 = vector.broadcast %621 : vector<1x256xf32> to vector<8x256xf32>
    %624 = arith.mulf %622, %623 : vector<8x256xf32>
    %625 = arith.addf %619, %624 : vector<8x256xf32>
    %626 = vector.extract_strided_slice %6 {offsets = [0, 3], sizes = [8, 1], strides = [1, 1]} : vector<8x8xf32> to vector<8x1xf32>
    %627 = vector.extract_strided_slice %402 {offsets = [3, 0], sizes = [1, 256], strides = [1, 1]} : vector<8x256xf32> to vector<1x256xf32>
    %628 = vector.broadcast %626 : vector<8x1xf32> to vector<8x256xf32>
    %629 = vector.broadcast %627 : vector<1x256xf32> to vector<8x256xf32>
    %630 = arith.mulf %628, %629 : vector<8x256xf32>
    %631 = arith.addf %625, %630 : vector<8x256xf32>
    %632 = vector.extract_strided_slice %6 {offsets = [0, 4], sizes = [8, 1], strides = [1, 1]} : vector<8x8xf32> to vector<8x1xf32>
    %633 = vector.extract_strided_slice %402 {offsets = [4, 0], sizes = [1, 256], strides = [1, 1]} : vector<8x256xf32> to vector<1x256xf32>
    %634 = vector.broadcast %632 : vector<8x1xf32> to vector<8x256xf32>
    %635 = vector.broadcast %633 : vector<1x256xf32> to vector<8x256xf32>
    %636 = arith.mulf %634, %635 : vector<8x256xf32>
    %637 = arith.addf %631, %636 : vector<8x256xf32>
    %638 = vector.extract_strided_slice %6 {offsets = [0, 5], sizes = [8, 1], strides = [1, 1]} : vector<8x8xf32> to vector<8x1xf32>
    %639 = vector.extract_strided_slice %402 {offsets = [5, 0], sizes = [1, 256], strides = [1, 1]} : vector<8x256xf32> to vector<1x256xf32>
    %640 = vector.broadcast %638 : vector<8x1xf32> to vector<8x256xf32>
    %641 = vector.broadcast %639 : vector<1x256xf32> to vector<8x256xf32>
    %642 = arith.mulf %640, %641 : vector<8x256xf32>
    %643 = arith.addf %637, %642 : vector<8x256xf32>
    %644 = vector.extract_strided_slice %6 {offsets = [0, 6], sizes = [8, 1], strides = [1, 1]} : vector<8x8xf32> to vector<8x1xf32>
    %645 = vector.extract_strided_slice %402 {offsets = [6, 0], sizes = [1, 256], strides = [1, 1]} : vector<8x256xf32> to vector<1x256xf32>
    %646 = vector.broadcast %644 : vector<8x1xf32> to vector<8x256xf32>
    %647 = vector.broadcast %645 : vector<1x256xf32> to vector<8x256xf32>
    %648 = arith.mulf %646, %647 : vector<8x256xf32>
    %649 = arith.addf %643, %648 : vector<8x256xf32>
    %650 = vector.extract_strided_slice %6 {offsets = [0, 7], sizes = [8, 1], strides = [1, 1]} : vector<8x8xf32> to vector<8x1xf32>
    %651 = vector.extract_strided_slice %402 {offsets = [7, 0], sizes = [1, 256], strides = [1, 1]} : vector<8x256xf32> to vector<1x256xf32>
    %652 = vector.broadcast %650 : vector<8x1xf32> to vector<8x256xf32>
    %653 = vector.broadcast %651 : vector<1x256xf32> to vector<8x256xf32>
    %654 = arith.mulf %652, %653 : vector<8x256xf32>
    %655 = arith.addf %649, %654 : vector<8x256xf32>
    %656 = arith.addf %603, %655 : vector<8x256xf32>
    %657 = vector.extract_strided_slice %1 {offsets = [0, 0], sizes = [8, 256], strides = [1, 1]} : vector<16x256xf32> to vector<8x256xf32>
    %658 = arith.addf %402, %657 : vector<8x256xf32>
    %c0_55 = arith.constant 0 : index
    %c0_56 = arith.constant 0 : index
    %c0_57 = arith.constant 0 : index
    %659 = vector.load %arg13[%c0_55, %c0_56, %c0_57] : memref<1x16x256xf32, #tpu.memory_space<vmem>>, vector<1x8x256xf32>
    %660 = vector.shape_cast %659 : vector<1x8x256xf32> to vector<8x256xf32>
    %661 = vector.shape_cast %658 : vector<8x256xf32> to vector<1x8x256xf32>
    tpu.vector_store %arg13[%c0_55, %c0_56, %c0_57], %661 {strides = array<i32>} : memref<1x16x256xf32, #tpu.memory_space<vmem>>, vector<1x8x256xf32>,
    %662 = vector.extract_strided_slice %1 {offsets = [8, 0], sizes = [8, 256], strides = [1, 1]} : vector<16x256xf32> to vector<8x256xf32>
    %663 = arith.addf %656, %662 : vector<8x256xf32>
    %c0_58 = arith.constant 0 : index
    %c8 = arith.constant 8 : index
    %c0_59 = arith.constant 0 : index
    %664 = vector.load %arg13[%c0_58, %c8, %c0_59] : memref<1x16x256xf32, #tpu.memory_space<vmem>>, vector<1x8x256xf32>
    %665 = vector.shape_cast %664 : vector<1x8x256xf32> to vector<8x256xf32>
    %666 = vector.shape_cast %663 : vector<8x256xf32> to vector<1x8x256xf32>
    tpu.vector_store %arg13[%c0_58, %c8, %c0_59], %666 {strides = array<i32>} : memref<1x16x256xf32, #tpu.memory_space<vmem>>, vector<1x8x256xf32>,
    return
  }
  func.func @transform_0(%arg0: i32) -> (i32, i32, i32) {
    %c0_i32 = arith.constant 0 : i32
    %c0_i32_0 = arith.constant 0 : i32
    %c0_i32_1 = arith.constant 0 : i32
    return %arg0, %c0_i32, %c0_i32_0 : i32, i32, i32
  }
  func.func @transform_1(%arg0: i32) -> (i32, i32) {
    %c0_i32 = arith.constant 0 : i32
    %c0_i32_0 = arith.constant 0 : i32
    %c0_i32_1 = arith.constant 0 : i32
    return %c0_i32, %c0_i32_0 : i32, i32
  }
  func.func @transform_2(%arg0: i32) -> (i32, i32) {
    %c0_i32 = arith.constant 0 : i32
    %c0_i32_0 = arith.constant 0 : i32
    %c0_i32_1 = arith.constant 0 : i32
    return %c0_i32, %c0_i32_0 : i32, i32
  }
  func.func @transform_3(%arg0: i32) -> (i32, i32) {
    %c0_i32 = arith.constant 0 : i32
    %c0_i32_0 = arith.constant 0 : i32
    %c0_i32_1 = arith.constant 0 : i32
    return %c0_i32, %c0_i32_0 : i32, i32
  }
  func.func @transform_4(%arg0: i32) -> (i32, i32) {
    %c0_i32 = arith.constant 0 : i32
    %c0_i32_0 = arith.constant 0 : i32
    %c0_i32_1 = arith.constant 0 : i32
    return %c0_i32, %c0_i32_0 : i32, i32
  }
  func.func @transform_5(%arg0: i32) -> (i32, i32) {
    %c0_i32 = arith.constant 0 : i32
    %c0_i32_0 = arith.constant 0 : i32
    %c0_i32_1 = arith.constant 0 : i32
    return %c0_i32, %c0_i32_0 : i32, i32
  }
  func.func @transform_6(%arg0: i32) -> (i32, i32) {
    %c0_i32 = arith.constant 0 : i32
    %c0_i32_0 = arith.constant 0 : i32
    %c0_i32_1 = arith.constant 0 : i32
    return %c0_i32, %c0_i32_0 : i32, i32
  }
  func.func @transform_7(%arg0: i32) -> (i32, i32) {
    %c0_i32 = arith.constant 0 : i32
    %c0_i32_0 = arith.constant 0 : i32
    %c0_i32_1 = arith.constant 0 : i32
    return %c0_i32, %c0_i32_0 : i32, i32
  }
  func.func @transform_8(%arg0: i32) -> (i32, i32) {
    %c0_i32 = arith.constant 0 : i32
    %c0_i32_0 = arith.constant 0 : i32
    %c0_i32_1 = arith.constant 0 : i32
    return %c0_i32, %c0_i32_0 : i32, i32
  }
  func.func @transform_9(%arg0: i32) -> (i32, i32) {
    %c0_i32 = arith.constant 0 : i32
    %c0_i32_0 = arith.constant 0 : i32
    %c0_i32_1 = arith.constant 0 : i32
    return %c0_i32, %c0_i32_0 : i32, i32
  }
  func.func @transform_10(%arg0: i32) -> (i32, i32) {
    %c0_i32 = arith.constant 0 : i32
    %c0_i32_0 = arith.constant 0 : i32
    %c0_i32_1 = arith.constant 0 : i32
    return %c0_i32, %c0_i32_0 : i32, i32
  }
  func.func @transform_11(%arg0: i32) -> (i32, i32) {
    %c0_i32 = arith.constant 0 : i32
    %c0_i32_0 = arith.constant 0 : i32
    %c0_i32_1 = arith.constant 0 : i32
    return %c0_i32, %c0_i32_0 : i32, i32
  }
  func.func @transform_12(%arg0: i32) -> (i32, i32, i32) {
    %c0_i32 = arith.constant 0 : i32
    %c0_i32_0 = arith.constant 0 : i32
    %c0_i32_1 = arith.constant 0 : i32
    return %arg0, %c0_i32, %c0_i32_0 : i32, i32, i32
  }
}

</mosaic_0001>

<bundles_post_ra>
// kernel: tpu_custom_call.1
= control target key start
LH: loop header
LB: loop body
LE: loop exit
PB: predicated region body
PF: predicated region fallthrough
CT: control target
= control target key end

     0   :  { %s3818_s0 = inlined_call_operand.hbm [shape: f32[2,16,256], index: 0, kind: input, shape index: {}]   ;;  %s3819_s1 = inlined_call_operand.hbm [shape: f32[25,256], index: 1, kind: input, shape index: {}]   ;;  %s3820_s2 = inlined_call_operand.vmem [shape: f32[4,16], index: 2, kind: input, shape index: {}]   ;;  %s3821_s3 = inlined_call_operand.vmem [shape: f32[4,1], index: 3, kind: input, shape index: {}]   ;;  %s3822_s4 = inlined_call_operand.vmem [shape: f32[4,25], index: 4, kind: input, shape index: {}]   ;;  %s3823_s5 = inlined_call_operand.hbm [shape: f32[4,4], index: 5, kind: input, shape index: {}]   ;;  %s3824_s6 = inlined_call_operand.vmem [shape: f32[4,1], index: 6, kind: input, shape index: {}]   ;;  %s3825_s7 = inlined_call_operand.vmem [shape: f32[8,8], index: 7, kind: input, shape index: {}]   ;;  %s3826_s8 = inlined_call_operand.vmem [shape: f32[8,1], index: 8, kind: input, shape index: {}]   ;;  %s3827_s9 = inlined_call_operand.vmem [shape: f32[8,25], index: 9, kind: input, shape index: {}]   ;;  %s3828_s10 = inlined_call_operand.vmem [shape: f32[8,8], index: 10, kind: input, shape index: {}]   ;;  %s3829_s11 = inlined_call_operand.vmem [shape: f32[8,1], index: 11, kind: input, shape index: {}]   ;;  %s3830_s12 = inlined_call_operand.hbm [shape: f32[2,16,256], index: 12, kind: output, shape index: {}]  }
   0x1   :  { %3947 = sst [smem:[#allocation16_spill]] %s3819_s1 }
   0x2   :  { %3948 = sst [smem:[#allocation17_spill]] %s3823_s5 }
   0x3   :  { %17 = vsyncpa [#allocation3], 0 }
   0x4   :  { %19 = vsyncpa [#allocation3 + $0x1], 0 }
   0x5   :  { %20 = vsyncpa [#allocation6], 0 }
   0x6   :  { %21 = vsyncpa [#allocation4], 0 }
   0x7   :  { %23 = vsyncpa [#allocation4 + $0x1], 0  ;;  %s2470_s21 = smov 0   ;;  %s2472_s22 = smov 0  }
   0x8   :  { %s2474_s23 = smov 0   ;;  %s2476_s24 = smov 0  }
   0x9 LB: > { %3949 = sst [smem:[#allocation12_spill]] %s2345_s23  ;;  %s2491_s25 = sadd.s32 4294967295, %s2349_s24   ;;  %s2349_s24 = sphi %s2476_s24, %s4073_s24   ;;  %s2345_s23 = sphi %s2474_s23, %s4075_s23   ;;  %s2341_s22 = sphi %s2472_s22, %s4077_s22   ;;  %s2337_s21 = sphi %s2470_s21, %s4076_s21  }
   0xa   : > { %s1933_s26 = sadd.s32 4294967294, %s2349_s24   ;;  %p49_p0 = scmp.ne.s32.totalorder %s2341_s22, %s2337_s21 }
   0xb   : > { %p50_p1 = scmp.eq.s32.totalorder %s2491_s25, 0  ;;  %p304_p2 = scmp.eq.s32.totalorder %s2491_s25, 1 }
   0xc   : > { %p310_p3 = scmp.eq.s32.totalorder %s1933_s26, 1  ;;  %p1934_p5 = scmp.ge.s32.totalorder %s2349_s24, 1 }
   0xd   : > { %p2500_p4 = por %p50_p1, %p49_p0  ;;  %p317_p7 = scmp.lt.s32.totalorder %s2349_s24, 3 }
   0xe   : > { %p2505_p6 = por %p310_p3, %p49_p0  ;;  %s3953_s1 = sld [smem:[#allocation16_spill]] }
   0xf   : > { %p2513_p8 = pnand %p1934_p5, %p317_p7  ;;  %s2351_s15 = smov [#allocation5]  }
  0x10   : > { %s3951_s28 = scalar_select %p2505_p6, 1, 0 }
  0x11   : > { %p1969_p9 = pneg %p2513_p8  ;;  %s330_s16 = sshll.u32 %s2351_s15, 4  ;;  %s331_s16 = int_to_ptr.vmem [resolvable:$true] %s330_s16 }
  0x12   : > { %3952 = sst [smem:[#allocation13_spill]] %s3951_s28  ;;  %s3831_s20 = smov 256  }
  0x13   : > { %p1970_p10 = pnand %p1969_p9, %p50_p1  ;;  %s3955_s5 = sld [smem:[#allocation17_spill]] }
  0x14   : > { %s328_s13 = sshll.u32 %s3953_s1, 4  ;;  %s3832_s26 = smov 16   ;;  %s329_s13 = int_to_ptr.hbm [resolvable:$true] %s328_s13 }
  0x15   : > { %1972 = dma.hbm_to_vmem [thread:$0]  (!%p1970_p10), %s329_s13, 1024, %s331_s16, [#allocation6], %s3831_s20, %s3831_s20, %s3832_s26  }
  0x16   : > { %s2354_s29 = smov [#allocation7]   ;;  %s2529_s15 = sadd.s32 1, %s2349_s24  }
  0x17   : > { %s354_s30 = sshll.u32 %s2354_s29, 4  ;;  %3956 = sst [smem:[#allocation14_spill]] %s2529_s15  ;;  %s355_s30 = int_to_ptr.vmem [resolvable:$true] %s354_s30 }
  0x18   : > { %s36_s17 = sadd.s32 1, %s2345_s23  ;;  %s33_s18 = ssub.s32 %s2349_s24, %s2529_s15 }
  0x19   : > { %s352_s19 = sshll.u32 %s3955_s5, 4  ;;  %p43_p12 = scmp.ne.s32.totalorder %s2345_s23, %s2341_s22  ;;  %s353_s19 = int_to_ptr.hbm [resolvable:$true] %s352_s19 }
  0x1a   : > { %1975 = dma.hbm_to_vmem [thread:$0]  (!%p1970_p10), %s353_s19, 64, %s355_s30, [#allocation6]  }
  0x1b   : > { %p34_p13 = scmp.eq.s32.totalorder %s33_s18, 0  ;;  %p44_p0 = scmp.eq.s32.totalorder %s2349_s24, 0 }
  0x1c   : > { %p2539_p3 = por %p304_p2, %p43_p12  ;;  %p1986_p5 = scmp.lt.s32.totalorder %s2349_s24, 2 }
  0x1d   : > { %s2545_s13 = scalar_select %p34_p13, %s2345_s23, %s36_s17  }
  0x1e   : > { %p45_p7 = por %p44_p0, %p43_p12  ;;  %s383_s16 = sand.u32 1, %s2345_s23  }
  0x1f   : > { %3958 = sst [smem:[#allocation15_spill]] %s2545_s13  ;;  %s1938_s29 = sshll.u32 %s383_s16, 5 }
  0x20   : > { %s1955_s19 = sshll.u32 %s2349_s24, 5  ;;  %s387_s5 = scalar_lea.vmem [#allocation2], %s1938_s29 }
  0x21   : > { %s392_s26 = scalar_lea.hbm %s3818_s0, %s1955_s19  ;;  %s395_s15 = sshll.u32 %s387_s5, 4  ;;  %s396_s15 = int_to_ptr.vmem [resolvable:$true] %s395_s15 }
  0x22   : > { %s393_s18 = sshll.u32 %s392_s26, 4  ;;  %p2552_p2 = pnand %p1986_p5, %p45_p7  ;;  %s394_s18 = int_to_ptr.hbm [resolvable:$true] %s393_s18 }
  0x23   : > { %s384_s17 = scalar_lea.sflag [#allocation3], %s383_s16  ;;  %s2249_s13 = sshra.s32 %s394_s18, 4  ;;  %s2250_s13 = int_to_ptr.hbm [resolvable:$true] %s2249_s13 }
  0x24   : > { %s2251_s23 = scalar_lea.hbm %s2250_s13, 32  ;;  %p2253_p10 = pneg %p2552_p2 }
  0x25   : > { %p2252_p9 = scmp.ne.s32.totalorder %s2250_s13, %s2251_s23  ;;  %s2256_s5 = scalar_lea.hbm %s3818_s0, 64 }
  0x26   : > { %p2257_p0 = scmp.lt.s32.totalorder %s2250_s13, %s3818_s0  ;;  %p2258_p5 = scmp.lt.s32.totalorder %s2256_s5, %s2251_s23 }
  0x27   : > { %p2254_p12 = pnand %p2253_p10, %p2252_p9 }
  0x28   : > { %p2259_p7 = por %p2258_p5, %p2257_p0 }
  0x29   : > { %p2255_p13 = pneg %p2254_p12 }
  0x2b   : > { %p2260_p11 = pnand %p2259_p7, %p2255_p13 }
  0x2d   : > { %2263 = shalt.err (!%p2260_p11)
}
  0x2e   : > { %s3960_s16 = smov 16   ;;  %s3961_s30 = smov 256  }
  0x2f   : > { %1979 = dma.hbm_to_vmem [thread:$0]  (!%p2552_p2), %s394_s18, 512, %s396_s15, %s384_s17, %s3961_s30, %s3961_s30, %s3960_s16  }
  0x30   : > { %407 = sbr.rel (%p2513_p8) target bundleno = 953 (0x3b9), region = 68  ;;  %s2572_s20 = sand.u32 (!%p2513_p8), 1, %s2341_s22  }
  0x31   : > { %s3847_s23 = sshll.u32 (!%p2513_p8), %s2572_s20, 5  ;;  %s410_s13 = scalar_lea.sflag (!%p2513_p8), [#allocation3], %s2572_s20 }
  0x32   : > { %s2578_s29 = scalar_lea.vmem (!%p2513_p8), [#allocation2], %s3847_s23 }
  0x35   : > { %2324 = dma.done.wait (%p2500_p4), %s410_s13, 512  }
  0x36   : > { %2326 = vsyncadd (%p2500_p4), %s410_s13, 4294966784 }
  0x37   : > { %2328 = dma.done.wait (%p50_p1), [#allocation6], 1088  }
  0x38   : > { %2330 = vsyncadd (%p50_p1), [#allocation6], 4294966208  ;;  %v2355_v0 = vmov 1   ;;  %v3885_v1 = vmov 0   ;;  %v2357_v2 = vmov 3   ;;  %v3900_v5 = vmov 2  }
  0x39   : > { %2077 = vset.pattern.permute.xlu1 %v2355_v0  ;;  %2076 = vset.pattern.permute.xlu0 %v3885_v1  ;;  %v481_v3 = vld [vmem:[%s3821_s3] sm:$0xf]  ;;  %v3898_v6 = vmov 4   ;;  %v3901_v7 = vmov 5   ;;  %v2361_v8 = vmov 6   ;;  %v2362_v9 = vmov 7  }
  0x3a   : > { %2079 = vset.pattern.permute.xlu2 %v2357_v2  ;;  %v477_v4 = vld [vmem:[%s3820_s2] sm:$0xf]  ;;  %484 = vperm.xlu0 %2076, %v481_v3   ;;  %v2363_v10 = vmov 10   ;;  %v2364_v11 = vmov 8   ;;  %v2365_v12 = vmov 9   ;;  %v2366_v13 = vmov 15  }
  0x3b   : > { %500 = vperm.xlu1 %2077, %v477_v4   ;;  %520 = vperm.xlu2 %2079, %v477_v4   ;;  %v2367_v14 = vmov 11   ;;  %v2368_v15 = vmov 12   ;;  %v2369_v16 = vmov 13   ;;  %v2370_v17 = vmov 14   ;;  %v2614_v18 = vld [vmem:[%s3822_s4] sm:$0xf] }
  0x3c   : > { %v465_v23 = vld [vmem:[%s2578_s29] sm:$0xff]  ;;  %v466_v24 = vld [vmem:[%s2578_s29 + $0x8] sm:$0xff]  ;;  %s3852_s5 = smov 34   ;;  %s3850_s26 = smov 33  }
  0x3d   : > { %v493_v25 = vperm.slane %v465_v23, 0  ;;  %v494_v26 = vperm.slane %v466_v24, 0  ;;  %v503_v27 = vperm.slane %v465_v23, 1  ;;  %v504_v28 = vperm.slane %v466_v24, 1  ;;  %s2375_s19 = smov 127   ;;  %s3841_s16 = smov 32  }
  0x3e   : > { %v513_v33 = vperm.slane %v465_v23, 2  ;;  %v514_v34 = vperm.slane %v466_v24, 2  ;;  %v523_v35 = vperm.slane %v465_v23, 3  ;;  %v524_v36 = vperm.slane %v466_v24, 3  ;;  %s2377_s30 = smov 126   ;;  %s3837_s13 = smov 31  }
  0x3f   : > { %v533_v41 = vperm.slane %v465_v23, 4  ;;  %v534_v42 = vperm.slane %v466_v24, 4  ;;  %v543_v48 = vperm.slane %v465_v23, 5  ;;  %v544_v49 = vperm.slane %v466_v24, 5  ;;  %s2379_s28 = smov 114   ;;  %s3839_s14 = smov 30  }
  0x40   : > { %v553_v3 = vperm.slane %v465_v23, 6  ;;  %s3946_s27 = smov 113   ;;  %s3843_s15 = smov 18  }
  0x41   : > { %s3945_s18 = smov 112   ;;  %s3845_s17 = smov 17  }
  0x42   : > { %490 = vperm.xlu0 %2076, %v477_v4   ;;  %s3858_s23 = smov 14  }
  0x43   : > { %2078 = vset.pattern.permute.xlu1 %v3900_v5  ;;  %2080 = vset.pattern.permute.xlu2 %v3898_v6 }
  0x44   : > { %510 = vperm.xlu1 %2078, %v477_v4   ;;  %530 = vperm.xlu2 %2080, %v477_v4  }
  0x4a   : > { %2081 = vset.pattern.permute.xlu0 %v3901_v7 }
  0x4b   : > { %540 = vperm.xlu0 %2081, %v477_v4  }
  0x4c   : > { %2082 = vset.pattern.permute.xlu1 %v2361_v8  ;;  %2083 = vset.pattern.permute.xlu2 %v2362_v9 }
  0x4d   : > { %550 = vperm.xlu1 %2082, %v477_v4   ;;  %560 = vperm.xlu2 %2083, %v477_v4  }
  0x53   : > { %2086 = vset.pattern.permute.xlu0 %v2363_v10 }
  0x54   : > { %590 = vperm.xlu0 %2086, %v477_v4  }
  0x55   : > { %2084 = vset.pattern.permute.xlu1 %v2364_v11  ;;  %2085 = vset.pattern.permute.xlu2 %v2365_v12 }
  0x56   : > { %570 = vperm.xlu1 %2084, %v477_v4   ;;  %580 = vperm.xlu2 %2085, %v477_v4  }
  0x5c   : > { %2091 = vset.pattern.permute.xlu0 %v2366_v13 }
  0x5d   : > { %640 = vperm.xlu0 %2091, %v477_v4  }
  0x5e   : > { %2087 = vset.pattern.permute.xlu1 %v2367_v14  ;;  %2088 = vset.pattern.permute.xlu2 %v2368_v15 }
  0x5f   : > { %600 = vperm.xlu1 %2087, %v477_v4   ;;  %610 = vperm.xlu2 %2088, %v477_v4  }
  0x65   : > { %2123 = vset.pattern.permute.xlu0 %v3900_v5 }
  0x67   : > { %2089 = vset.pattern.permute.xlu1 %v2369_v16  ;;  %2090 = vset.pattern.permute.xlu2 %v2370_v17 }
  0x68   : > { %620 = vperm.xlu1 %2089, %v477_v4   ;;  %630 = vperm.xlu2 %2090, %v477_v4   ;;  %v554_v4 = vperm.slane %v466_v24, 6 }
  0x70   : > { %2092 = vset.pattern.permute.xlu1 %v3885_v1  ;;  %2104 = vset.pattern.permute.xlu2 %v2368_v15 }
  0x71   : > { %705 = vperm.xlu1 %2092, %v2614_v18   ;;  %926 = vperm.xlu2 %2104, %v2614_v18  }
  0x79   : > { %2093 = vset.pattern.permute.xlu1 %v2355_v0  ;;  %2105 = vset.pattern.permute.xlu2 %v2369_v16 }
  0x7a   : > { %724 = vperm.xlu1 %2093, %v2614_v18   ;;  %945 = vperm.xlu2 %2105, %v2614_v18  }
  0x82   : > { %2094 = vset.pattern.permute.xlu1 %v3900_v5  ;;  %2106 = vset.pattern.permute.xlu2 %v2370_v17 }
  0x83   : > { %743 = vperm.xlu1 %2094, %v2614_v18   ;;  %964 = vperm.xlu2 %2106, %v2614_v18  }
  0x8b   : > { %2095 = vset.pattern.permute.xlu1 %v2357_v2  ;;  %2107 = vset.pattern.permute.xlu2 %v2366_v13 }
  0x8c   : > { %762 = vperm.xlu1 %2095, %v2614_v18   ;;  %983 = vperm.xlu2 %2107, %v2614_v18  }
  0x94   : > { %2096 = vset.pattern.permute.xlu1 %v3898_v6 }
  0x95   : > { %781 = vperm.xlu1 %2096, %v2614_v18   ;;  %v521_v19 = vpop.permute.xlu2 %520 }
  0x96   : > { %v525_v50 = vmul.f32 %v523_v35, %v521_v19  ;;  %v526_v51 = vmul.f32 %v524_v36, %v521_v19  ;;  %v2649_v19 = vld [vmem:[%s2578_s29 + $0x18] sm:$0xff] }
  0x9d   : > { %2097 = vset.pattern.permute.xlu1 %v3901_v7 }
  0x9e   : > { %800 = vperm.xlu1 %2097, %v2614_v18   ;;  %v531_v22 = vpop.permute.xlu2 %530 }
  0x9f   : > { %v535_v56 = vmul.f32 %v533_v41, %v531_v22  ;;  %v536_v57 = vmul.f32 %v534_v42, %v531_v22  ;;  %v563_v22 = vperm.slane %v465_v23, 7  ;;  %v594_v42 = vperm.slane %v2649_v19, 2 }
  0xa6   : > { %2098 = vset.pattern.permute.xlu1 %v2361_v8 }
  0xa7   : > { %819 = vperm.xlu1 %2098, %v2614_v18   ;;  %v561_v43 = vpop.permute.xlu2 %560 }
  0xac   : > { %v485_v20 = vpop.permute.xlu0 %484 }
  0xad   : > { %v501_v21 = vpop.permute.xlu1 %500 }
  0xae   : > { %v505_v37 = vmul.f32 %v503_v27, %v501_v21  ;;  %v506_v38 = vmul.f32 %v504_v28, %v501_v21  ;;  %v564_v27 = vperm.slane %v466_v24, 7 }
  0xaf   : > { %2099 = vset.pattern.permute.xlu1 %v2362_v9 }
  0xb0   : > { %838 = vperm.xlu1 %2099, %v2614_v18   ;;  %v566_v35 = vmul.f32 %v564_v27, %v561_v43 }
  0xb4   : > { %v491_v29 = vpop.permute.xlu0 %490 }
  0xb5   : > { %v495_v30 = vmul.f32 %v493_v25, %v491_v29  ;;  %v496_v31 = vmul.f32 %v494_v26, %v491_v29  ;;  %v581_v26 = vpop.permute.xlu2 %580 }
  0xb6   : > { %v511_v32 = vpop.permute.xlu1 %510 }
  0xb7   : > { %v497_v39 = vadd.f32 %v495_v30, %v485_v20  ;;  %v498_v40 = vadd.f32 %v496_v31, %v485_v20  ;;  %v515_v46 = vmul.f32 %v513_v33, %v511_v32  ;;  %v516_v47 = vmul.f32 %v514_v34, %v511_v32  ;;  %v2646_v20 = vld [vmem:[%s2578_s29 + $0x10] sm:$0xff] }
  0xb8   : > { %2100 = vset.pattern.permute.xlu1 %v2364_v11  ;;  %v573_v30 = vperm.slane %v2646_v20, 0  ;;  %v574_v31 = vperm.slane %v2649_v19, 0  ;;  %v565_v34 = vmul.f32 %v563_v22, %v561_v43  ;;  %v593_v41 = vperm.slane %v2646_v20, 2 }
  0xb9   : > { %857 = vperm.xlu1 %2100, %v2614_v18   ;;  %v507_v44 = vadd.f32 %v505_v37, %v497_v39  ;;  %v508_v45 = vadd.f32 %v506_v38, %v498_v40  ;;  %v583_v39 = vperm.slane %v2646_v20, 1  ;;  %v584_v40 = vperm.slane %v2649_v19, 1 }
  0xbb   : > { %v517_v52 = vadd.f32 %v515_v46, %v507_v44  ;;  %v518_v53 = vadd.f32 %v516_v47, %v508_v45  ;;  %v585_v43 = vmul.f32 %v583_v39, %v581_v26  ;;  %v586_v46 = vmul.f32 %v584_v40, %v581_v26 }
  0xbd   : > { %v527_v54 = vadd.f32 %v525_v50, %v517_v52  ;;  %v528_v55 = vadd.f32 %v526_v51, %v518_v53  ;;  %v541_v58 = vpop.permute.xlu0 %540  ;;  %v611_v47 = vpop.permute.xlu2 %610  ;;  %v604_v50 = vperm.slane %v2649_v19, 3  ;;  %v2371_v51 = vmov 16  }
  0xbe   : > { %v545_v60 = vmul.f32 %v543_v48, %v541_v58  ;;  %v546_v61 = vmul.f32 %v544_v49, %v541_v58  ;;  %v603_v49 = vperm.slane %v2646_v20, 3  ;;  %2108 = vset.pattern.permute.xlu2 %v2371_v51 }
  0xbf   : > { %v551_v59 = vpop.permute.xlu1 %550  ;;  %v537_v62 = vadd.f32 %v535_v56, %v527_v54  ;;  %v538_v63 = vadd.f32 %v536_v57, %v528_v55  ;;  %1002 = vperm.xlu2 %2108, %v2614_v18  }
  0xc0   : > { %v555_v28 = vmul.f32 %v553_v3, %v551_v59  ;;  %v556_v29 = vmul.f32 %v554_v4, %v551_v59  ;;  %v613_v59 = vperm.slane %v2646_v20, 4  ;;  %v624_v3 = vperm.slane %v2649_v19, 5 }
  0xc1   : > { %2101 = vset.pattern.permute.xlu1 %v2365_v12  ;;  %v547_v21 = vadd.f32 %v545_v60, %v537_v62  ;;  %v548_v25 = vadd.f32 %v546_v61, %v538_v63  ;;  %v614_v60 = vperm.slane %v2649_v19, 4  ;;  %v623_v63 = vperm.slane %v2646_v20, 5 }
  0xc2   : > { %876 = vperm.xlu1 %2101, %v2614_v18   ;;  %v633_v4 = vperm.slane %v2646_v20, 6  ;;  %v615_v22 = vmul.f32 %v613_v59, %v611_v47 }
  0xc3   : > { %v557_v32 = vadd.f32 %v555_v28, %v547_v21  ;;  %v558_v33 = vadd.f32 %v556_v29, %v548_v25  ;;  %v634_v21 = vperm.slane %v2649_v19, 6  ;;  %v616_v27 = vmul.f32 %v614_v60, %v611_v47 }
  0xc4   : > { %v643_v29 = vperm.slane %v2646_v20, 7 }
  0xc5   : > { %v567_v23 = vadd.f32 %v565_v34, %v557_v32  ;;  %v568_v24 = vadd.f32 %v566_v35, %v558_v33  ;;  %v631_v28 = vpop.permute.xlu2 %630 }
  0xc6   : > { %v591_v48 = vpop.permute.xlu0 %590  ;;  %v635_v33 = vmul.f32 %v633_v4, %v631_v28  ;;  %v636_v34 = vmul.f32 %v634_v21, %v631_v28 }
  0xc7   : > { %v595_v54 = vmul.f32 %v593_v41, %v591_v48  ;;  %v596_v55 = vmul.f32 %v594_v42, %v591_v48 }
  0xc8   : > { %v571_v36 = vpop.permute.xlu1 %570 }
  0xc9   : > { %v575_v37 = vmul.f32 %v573_v30, %v571_v36  ;;  %v576_v38 = vmul.f32 %v574_v31, %v571_v36  ;;  %v644_v30 = vperm.slane %v2649_v19, 7  ;;  %v3868_v31 = vmov 17  }
  0xca   : > { %2102 = vset.pattern.permute.xlu1 %v2363_v10  ;;  %2109 = vset.pattern.permute.xlu2 %v3868_v31 }
  0xcb   : > { %895 = vperm.xlu1 %2102, %v2614_v18   ;;  %v577_v44 = vadd.f32 %v575_v37, %v567_v23  ;;  %v578_v45 = vadd.f32 %v576_v38, %v568_v24  ;;  %1021 = vperm.xlu2 %2109, %v2614_v18  }
  0xcd   : > { %v587_v52 = vadd.f32 %v585_v43, %v577_v44  ;;  %v588_v53 = vadd.f32 %v586_v46, %v578_v45 }
  0xcf   : > { %v597_v61 = vadd.f32 %v595_v54, %v587_v52  ;;  %v598_v62 = vadd.f32 %v596_v55, %v588_v53  ;;  %v641_v35 = vpop.permute.xlu0 %640 }
  0xd0   : > { %v645_v20 = vmul.f32 %v643_v29, %v641_v35  ;;  %v646_v24 = vmul.f32 %v644_v30, %v641_v35  ;;  %v2715_v35 = vpop.permute.xlu2 %926 }
  0xd1   : > { %v601_v56 = vpop.permute.xlu1 %600 }
  0xd2   : > { %v605_v57 = vmul.f32 %v603_v49, %v601_v56  ;;  %v606_v58 = vmul.f32 %v604_v50, %v601_v56 }
  0xd3   : > { %2103 = vset.pattern.permute.xlu1 %v2367_v14 }
  0xd4   : > { %914 = vperm.xlu1 %2103, %v2614_v18   ;;  %v607_v25 = vadd.f32 %v605_v57, %v597_v61  ;;  %v608_v26 = vadd.f32 %v606_v58, %v598_v62 }
  0xd6   : > { %v617_v36 = vadd.f32 %v615_v22, %v607_v25  ;;  %v618_v37 = vadd.f32 %v616_v27, %v608_v26 }
  0xda   : > { %v621_v32 = vpop.permute.xlu1 %620 }
  0xdb   : > { %v625_v38 = vmul.f32 %v623_v63, %v621_v32  ;;  %v626_v39 = vmul.f32 %v624_v3, %v621_v32 }
  0xdc   : > { %2117 = vset.pattern.permute.xlu1 %v3885_v1 }
  0xdd   : > { %v627_v40 = vadd.f32 %v625_v38, %v617_v36  ;;  %v628_v23 = vadd.f32 %v626_v39, %v618_v37  ;;  %v2729_v37 = vpop.permute.xlu2 %945 }
  0xdf   : > { %v637_v19 = vadd.f32 %v635_v33, %v627_v40  ;;  %v638_v41 = vadd.f32 %v636_v34, %v628_v23  ;;  %v3867_v23 = vmov 18  }
  0xe0   : > { %2110 = vset.pattern.permute.xlu2 %v3867_v23 }
  0xe1   : > { %v647_v42 = vadd.f32 %v645_v20, %v637_v19  ;;  %v648_v44 = vadd.f32 %v646_v24, %v638_v41 }
  0xe3   : > { %v1946_v45 = vmul.f32 -1.442695, %v647_v42  ;;  %v1947_v43 = vmul.f32 -1.442695, %v648_v44  ;;  %v2681_v30 = vpop.permute.xlu1 %705 }
  0xe5   : > { %2166 = vpow2.f32 %v1946_v45  ;;  %v2739_v39 = vpop.permute.xlu2 %964 }
  0xe6   : > { %2168 = vpow2.f32 %v1947_v43 }
  0xeb   : > { %v2167_v46 = vpop.eup %2166 }
  0xec   : > { %v2169_v47 = vpop.eup %2168  ;;  %v655_v48 = vadd.f32 1.0, %v2167_v46  ;;  %v2695_v32 = vpop.permute.xlu1 %724 }
  0xed   : > { %v656_v49 = vadd.f32 1.0, %v2169_v47  ;;  %v2750_v20 = vpop.permute.xlu2 %983  ;;  %v2793_v47 = vld [vmem:[#allocation7] sm:$0xf] }
  0xee   : > { %2170 = vrcp.f32 %v655_v48  ;;  %v668_v56 = vand.u32 2147483648, %v655_v48  ;;  %v666_v59 = vand.u32 2147483647, %v655_v48  ;;  %vm662_vm2 = vweird.f32 %v655_v48 }
  0xef   : > { %2172 = vrcp.f32 %v656_v49  ;;  %v683_v60 = vand.u32 2147483648, %v656_v49  ;;  %v681_v62 = vand.u32 2147483647, %v656_v49  ;;  %vm677_vm4 = vweird.f32 %v656_v49 }
  0xf0   : > { %v669_v3 = vor.u32 1.1754944e-38, %v668_v56  ;;  %vm667_vm5 = vcmp.eq.f32.partialorder %v666_v59, 8.507059e+37 }
  0xf1   : > { %v684_v25 = vor.u32 1.1754944e-38, %v683_v60  ;;  %vm682_vm7 = vcmp.eq.f32.partialorder %v681_v62, 8.507059e+37  ;;  %v2819_v60 = vld [vmem:[%s3825_s7] sm:$0xff] }
  0xf4   : > { %v2171_v50 = vpop.eup %2170 }
  0xf5   : > { %v2173_v52 = vpop.eup %2172  ;;  %v658_v53 = vmul.f32 %v2171_v50, %v655_v48  ;;  %vm663_vm0 = vweird.f32 %v2171_v50  ;;  %v2703_v33 = vpop.permute.xlu1 %743  ;;  %v3865_v48 = vmov 19  }
  0xf6   : > { %v673_v54 = vmul.f32 %v2173_v52, %v656_v49  ;;  %vm678_vm1 = vweird.f32 %v2173_v52  ;;  %vm664_vm3 = vmor %vm662_vm2, %vm663_vm0 }
  0xf7   : > { %v659_v55 = vsub.f32 1.0, %v658_v53  ;;  %vm679_vm6 = vmor %vm677_vm4, %vm678_vm1  ;;  %v3864_v53 = vmov 20  }
  0xf8   : > { %v674_v57 = vsub.f32 1.0, %v673_v54 }
  0xf9   : > { %v660_v58 = vmul.f32 %v2171_v50, %v659_v55 }
  0xfa   : > { %v675_v61 = vmul.f32 %v2173_v52, %v674_v57  ;;  %v2810_v57 = vld [vmem:[#allocation5] sm:$0xff] }
  0xfb   : > { %v661_v63 = vadd.f32 %v2171_v50, %v660_v58  ;;  %v2812_v58 = vld [vmem:[#allocation5 + $0x8] sm:$0xff] }
  0xfc   : > { %v676_v4 = vadd.f32 %v2173_v52, %v675_v61  ;;  %v3872_v61 = vperm.slane %v2810_v57, 1  ;;  %v3869_v62 = vperm.slane %v2812_v58, 1 }
  0xfd   : > { %v665_v21 = vsel %vm664_vm3, %v2171_v50, %v661_v63  ;;  %v699_v63 = vperm.slane %v2810_v57, 0 }
  0xfe   : > { %v670_v26 = vsel %vm667_vm5, %v669_v3, %v665_v21  ;;  %v680_v22 = vsel %vm679_vm6, %v2173_v52, %v676_v4  ;;  %v2711_v34 = vpop.permute.xlu1 %762  ;;  %v694_v52 = vlaneseq  ;;  %v700_v3 = vperm.slane %v2812_v58, 0 }
  0xff   : > { %v685_v27 = vsel %vm682_vm7, %v684_v25, %v680_v22  ;;  %v2677_v28 = vmul.f32 %v670_v26, %v647_v42  ;;  %v3871_v22 = vperm.slane %v2810_v57, 2 }
 0x100   : > { %v2679_v29 = vmul.f32 %v685_v27, %v648_v44  ;;  %v2807_v54 = vand.u32 127, %v694_v52  ;;  %v3870_v27 = vperm.slane %v2812_v58, 2 }
 0x101   : > { %690 = vrot.lane.b32.xlu1 %v2677_v28, %s3852_s5 }
 0x102   : > { %714 = vrot.lane.b32.xlu0 %v2679_v29, %s3850_s26  ;;  %692 = vrot.lane.b32.xlu2 %v2679_v29, %s3852_s5  ;;  %s3939_s5 = smov 96   ;;  %vm716_vm8 = vcmp.lt.s32.totalorder %v2807_v54, 33  ;;  %vm696_vm9 = vcmp.lt.s32.totalorder %v2807_v54, 34  ;;  %vm735_vm10 = vcmp.lt.s32.totalorder %v2807_v54, 32  ;;  %vm754_vm11 = vcmp.lt.s32.totalorder %v2807_v54, 31 }
 0x103   : > { %vm773_vm12 = vcmp.lt.s32.totalorder %v2807_v54, 30  ;;  %vm792_vm13 = vcmp.lt.s32.totalorder %v2807_v54, 18  ;;  %vm811_vm14 = vcmp.lt.s32.totalorder %v2807_v54, 17  ;;  %vm830_vm15 = vcmp.lt.s32.totalorder %v2807_v54, 16 }
 0x104   : > { %vm3936_vm0 = vcmp.lt.s32.totalorder %v2807_v54, 15  ;;  %vm3935_vm1 = vcmp.lt.s32.totalorder %v2807_v54, 14  ;;  %vm3934_vm2 = vcmp.lt.s32.totalorder %v2807_v54, 2  ;;  %vm3933_vm3 = vcmp.lt.s32.totalorder %v2807_v54, 1 }
 0x105   : > { %vm3932_vm4 = vcmp.lt.s32.totalorder %v2807_v54, 127  ;;  %vm3904_vm5 = vcmp.lt.s32.totalorder %v2807_v54, 126  ;;  %vm3886_vm6 = vcmp.lt.s32.totalorder %v2807_v54, 114  ;;  %vm3899_vm7 = vcmp.lt.s32.totalorder %v2807_v54, 113 }
 0x107   : > { %v2721_v36 = vpop.permute.xlu1 %781 }
 0x109   : > { %935 = vrot.lane.b32.xlu1 %v2679_v29, %s2375_s19 }
 0x10a   : > { %733 = vrot.lane.b32.xlu0 %v2679_v29, %s3841_s16  ;;  %712 = vrot.lane.b32.xlu2 %v2677_v28, %s3850_s26  ;;  %s3862_s26 = smov 2  }
 0x110   : > { %v2737_v38 = vpop.permute.xlu1 %800 }
 0x111   : > { %954 = vrot.lane.b32.xlu1 %v2679_v29, %s2377_s30 }
 0x112   : > { %752 = vrot.lane.b32.xlu0 %v2679_v29, %s3837_s13  ;;  %731 = vrot.lane.b32.xlu2 %v2677_v28, %s3841_s16  ;;  %s3944_s16 = smov 110  }
 0x119   : > { %973 = vrot.lane.b32.xlu1 %v2679_v29, %s2379_s28  ;;  %v2747_v40 = vpop.permute.xlu1 %819  ;;  %v2760_v19 = vpop.permute.xlu2 %1002 }
 0x11a   : > { %771 = vrot.lane.b32.xlu0 %v2679_v29, %s3839_s14  ;;  %750 = vrot.lane.b32.xlu2 %v2677_v28, %s3837_s13  ;;  %s3943_s13 = smov 111  }
 0x121   : > { %992 = vrot.lane.b32.xlu1 %v2679_v29, %s3946_s27 }
 0x122   : > { %790 = vrot.lane.b32.xlu0 %v2679_v29, %s3843_s15  ;;  %769 = vrot.lane.b32.xlu2 %v2677_v28, %s3839_s14  ;;  %s3848_s14 = smov 16   ;;  %v2758_v24 = vpop.permute.xlu1 %838 }
 0x125   : > { %v2776_v42 = vpop.permute.xlu2 %1021 }
 0x129   : > { %1011 = vrot.lane.b32.xlu1 %v2679_v29, %s3945_s18 }
 0x12a   : > { %809 = vrot.lane.b32.xlu0 %v2679_v29, %s3845_s17  ;;  %788 = vrot.lane.b32.xlu2 %v2677_v28, %s3843_s15  ;;  %s3854_s15 = smov 15  }
 0x12b   : > { %v2768_v41 = vpop.permute.xlu1 %857 }
 0x131   : > { %1030 = vrot.lane.b32.xlu1 %v2679_v29, %s3943_s13 }
 0x132   : > { %828 = vrot.lane.b32.xlu0 %v2679_v29, %s3848_s14  ;;  %807 = vrot.lane.b32.xlu2 %v2677_v28, %s3845_s17  ;;  %s3941_s17 = smov 98  }
 0x134   : > { %v2784_v44 = vpop.permute.xlu1 %876 }
 0x139   : > { %1049 = vrot.lane.b32.xlu1 %v2679_v29, %s3944_s16 }
 0x13a   : > { %847 = vrot.lane.b32.xlu0 %v2679_v29, %s3854_s15  ;;  %826 = vrot.lane.b32.xlu2 %v2677_v28, %s3848_s14  ;;  %s3856_s14 = smov 97  }
 0x13d   : > { %v2791_v43 = vpop.permute.xlu1 %895 }
 0x141   : > { %1068 = vrot.lane.b32.xlu1 %v2679_v29, %s3941_s17 }
 0x142   : > { %866 = vrot.lane.b32.xlu0 %v2679_v29, %s3858_s23  ;;  %845 = vrot.lane.b32.xlu2 %v2677_v28, %s3854_s15  ;;  %s3860_s15 = smov 1  }
 0x146   : > { %v2800_v50 = vpop.permute.xlu1 %914 }
 0x149   : > { %1087 = vrot.lane.b32.xlu1 %v2679_v29, %s3856_s14  ;;  %s3937_s14 = smov 95  }
 0x14a   : > { %885 = vrot.lane.b32.xlu0 %v2679_v29, %s3862_s26  ;;  %864 = vrot.lane.b32.xlu2 %v2677_v28, %s3858_s23  ;;  %s3879_s23 = smov 94  }
 0x151   : > { %1106 = vrot.lane.b32.xlu1 %v2679_v29, %s3939_s5 }
 0x152   : > { %904 = vrot.lane.b32.xlu0 %v2679_v29, %s3860_s15  ;;  %883 = vrot.lane.b32.xlu2 %v2677_v28, %s3862_s26  ;;  %s3962_s26 = smov 97  }
 0x159   : > { %1125 = vrot.lane.b32.xlu1 %v2679_v29, %s3937_s14 }
 0x15a   : > { %933 = vrot.lane.b32.xlu0 %v2677_v28, %s2375_s19  ;;  %902 = vrot.lane.b32.xlu2 %v2677_v28, %s3860_s15  ;;  %s3964_s15 = smov 33  }
 0x15c   : > { %v693_v45 = vpop.permute.xlu2 %692 }
 0x161   : > { %1144 = vrot.lane.b32.xlu1 %v2679_v29, %s3879_s23 }
 0x162   : > { %952 = vrot.lane.b32.xlu0 %v2677_v28, %s2377_s30  ;;  %1040 = vperm.xlu2 %2110, %v2614_v18  }
 0x164   : > { %v713_v46 = vpop.permute.xlu2 %712 }
 0x169   : > { %1170 = vperm.xlu1 %2117, %v2793_v47  }
 0x16a   : > { %971 = vrot.lane.b32.xlu0 %v2677_v28, %s2379_s28  ;;  %2111 = vset.pattern.permute.xlu2 %v3865_v48 }
 0x16b   : > { %1059 = vperm.xlu2 %2111, %v2614_v18  }
 0x16c   : > { %v732_v49 = vpop.permute.xlu2 %731 }
 0x171   : > { %2119 = vset.pattern.permute.xlu1 %v3900_v5 }
 0x172   : > { %990 = vrot.lane.b32.xlu0 %v2677_v28, %s3946_s27  ;;  %1190 = vperm.xlu1 %2119, %v2793_v47  }
 0x173   : > { %2112 = vset.pattern.permute.xlu2 %v3864_v53  ;;  %v691_v59 = vpop.permute.xlu1 %690  ;;  %v3866_v53 = vmov 21  }
 0x174   : > { %v715_v55 = vpop.permute.xlu0 %714  ;;  %1078 = vperm.xlu2 %2112, %v2614_v18   ;;  %v751_v56 = vpop.permute.xlu2 %750  ;;  %v697_v25 = vsel %vm696_vm9, %v691_v59, %v693_v45  ;;  %v698_v26 = vsel %vm696_vm9, %v693_v45, %v691_v59 }
 0x175   : > { %v717_v4 = vsel %vm716_vm8, %v713_v46, %v715_v55  ;;  %v718_v21 = vsel %vm716_vm8, %v715_v55, %v713_v46  ;;  %v701_v59 = vmul.f32 %v699_v63, %v698_v26 }
 0x176   : > { %v721_v45 = vmul.f32 %v3872_v61, %v718_v21  ;;  %v722_v55 = vmul.f32 %v3869_v62, %v717_v4  ;;  %v757_v21 = vperm.slane %v2810_v57, 3 }
 0x177   : > { %v708_v62 = vmul.f32 %v2681_v30, %v701_v59 }
 0x178   : > { %v727_v4 = vmul.f32 %v2695_v32, %v721_v45  ;;  %v728_v26 = vmul.f32 %v2695_v32, %v722_v55  ;;  %v3905_v55 = vmov 22  }
 0x17a   : > { %1009 = vrot.lane.b32.xlu0 %v2677_v28, %s3945_s18  ;;  %2121 = vset.pattern.permute.xlu1 %v3885_v1 }
 0x17b   : > { %1260 = vperm.xlu1 %2121, %v2819_v60  }
 0x17c   : > { %v734_v52 = vpop.permute.xlu0 %733  ;;  %2113 = vset.pattern.permute.xlu2 %v3866_v53  ;;  %v702_v53 = vmul.f32 %v700_v3, %v697_v25  ;;  %v770_v23 = vpop.permute.xlu2 %769 }
 0x17d   : > { %v736_v48 = vsel %vm735_vm10, %v732_v49, %v734_v52  ;;  %v737_v46 = vsel %vm735_vm10, %v734_v52, %v732_v49  ;;  %1097 = vperm.xlu2 %2113, %v2614_v18   ;;  %v758_v52 = vperm.slane %v2812_v58, 3 }
 0x17e   : > { %v740_v31 = vmul.f32 %v3871_v22, %v737_v46  ;;  %v741_v49 = vmul.f32 %v3870_v27, %v736_v48  ;;  %v709_v25 = vmul.f32 %v2681_v30, %v702_v53  ;;  %v729_v30 = vadd.f32 %v727_v4, %v708_v62 }
 0x17f   : > { %v3922_v4 = vperm.slane %v2810_v57, 4 }
 0x180   : > { %v746_v48 = vmul.f32 %v2703_v33, %v740_v31  ;;  %v747_v46 = vmul.f32 %v2703_v33, %v741_v49  ;;  %v730_v53 = vadd.f32 %v728_v26, %v709_v25  ;;  %v3919_v26 = vperm.slane %v2812_v58, 4 }
 0x182   : > { %1028 = vrot.lane.b32.xlu0 %v2677_v28, %s3943_s13  ;;  %v748_v33 = vadd.f32 %v746_v48, %v729_v30  ;;  %v749_v49 = vadd.f32 %v747_v46, %v730_v53  ;;  %v3874_v46 = vmov 23  }
 0x183   : > { %2124 = vset.pattern.permute.xlu1 %v2357_v2 }
 0x184   : > { %v753_v27 = vpop.permute.xlu0 %752  ;;  %1284 = vperm.xlu1 %2124, %v2819_v60  }
 0x185   : > { %v755_v45 = vsel %vm754_vm11, %v751_v56, %v753_v27  ;;  %v756_v32 = vsel %vm754_vm11, %v753_v27, %v751_v56  ;;  %2114 = vset.pattern.permute.xlu2 %v3905_v55  ;;  %v789_v56 = vpop.permute.xlu2 %788 }
 0x186   : > { %v759_v59 = vmul.f32 %v757_v21, %v756_v32  ;;  %v760_v31 = vmul.f32 %v758_v52, %v755_v45  ;;  %1116 = vperm.xlu2 %2114, %v2614_v18  }
 0x188   : > { %v765_v22 = vmul.f32 %v2711_v34, %v759_v59  ;;  %v766_v61 = vmul.f32 %v2711_v34, %v760_v31  ;;  %v3915_v59 = vperm.slane %v2810_v57, 5  ;;  %v3913_v31 = vperm.slane %v2812_v58, 5 }
 0x18a   : > { %v767_v27 = vadd.f32 %v765_v22, %v748_v33  ;;  %v768_v62 = vadd.f32 %v766_v61, %v749_v49  ;;  %1047 = vrot.lane.b32.xlu0 %v2677_v28, %s3944_s16 }
 0x18c   : > { %v772_v25 = vpop.permute.xlu0 %771  ;;  %2126 = vset.pattern.permute.xlu1 %v3901_v7 }
 0x18d   : > { %v774_v48 = vsel %vm773_vm12, %v770_v23, %v772_v25  ;;  %v775_v34 = vsel %vm773_vm12, %v772_v25, %v770_v23  ;;  %1302 = vperm.xlu1 %2126, %v2819_v60   ;;  %v808_v53 = vpop.permute.xlu2 %807 }
 0x18e   : > { %v778_v61 = vmul.f32 %v3922_v4, %v775_v34  ;;  %v779_v22 = vmul.f32 %v3919_v26, %v774_v48  ;;  %2115 = vset.pattern.permute.xlu2 %v3874_v46 }
 0x18f   : > { %1135 = vperm.xlu2 %2115, %v2614_v18  }
 0x190   : > { %v784_v45 = vmul.f32 %v2721_v36, %v778_v61  ;;  %v785_v32 = vmul.f32 %v2721_v36, %v779_v22  ;;  %v3910_v22 = vperm.slane %v2810_v57, 6 }
 0x192   : > { %v786_v23 = vadd.f32 %v784_v45, %v767_v27  ;;  %v787_v30 = vadd.f32 %v785_v32, %v768_v62  ;;  %1066 = vrot.lane.b32.xlu0 %v2677_v28, %s3941_s17  ;;  %v3873_v62 = vmov 24   ;;  %v3909_v45 = vperm.slane %v2812_v58, 6  ;;  %s3966_s17 = smov 32  }
 0x194   : > { %v791_v33 = vpop.permute.xlu0 %790 }
 0x195   : > { %v793_v49 = vsel %vm792_vm13, %v789_v56, %v791_v33  ;;  %v794_v25 = vsel %vm792_vm13, %v791_v33, %v789_v56  ;;  %2130 = vset.pattern.permute.xlu1 %v3885_v1  ;;  %v827_v32 = vpop.permute.xlu2 %826 }
 0x196   : > { %v797_v36 = vmul.f32 %v3915_v59, %v794_v25  ;;  %v798_v27 = vmul.f32 %v3913_v31, %v793_v49 }
 0x197   : > { %2116 = vset.pattern.permute.xlu2 %v3873_v62 }
 0x198   : > { %v803_v48 = vmul.f32 %v2737_v38, %v797_v36  ;;  %v804_v34 = vmul.f32 %v2737_v38, %v798_v27  ;;  %1154 = vperm.xlu2 %2116, %v2614_v18  }
 0x19a   : > { %v805_v56 = vadd.f32 %v803_v48, %v786_v23  ;;  %v806_v61 = vadd.f32 %v804_v34, %v787_v30  ;;  %1085 = vrot.lane.b32.xlu0 %v2677_v28, %s3962_s26  ;;  %v3906_v48 = vperm.slane %v2812_v58, 7 }
 0x19c   : > { %v810_v33 = vpop.permute.xlu0 %809 }
 0x19d   : > { %v812_v49 = vsel %vm811_vm14, %v808_v53, %v810_v33  ;;  %v813_v38 = vsel %vm811_vm14, %v810_v33, %v808_v53  ;;  %v3908_v53 = vperm.slane %v2810_v57, 7 }
 0x19e   : > { %v816_v18 = vmul.f32 %v3910_v22, %v813_v38  ;;  %v817_v23 = vmul.f32 %v3909_v45, %v812_v49  ;;  %v846_v49 = vpop.permute.xlu2 %845 }
 0x1a0   : > { %v822_v30 = vmul.f32 %v2747_v40, %v816_v18  ;;  %v823_v25 = vmul.f32 %v2747_v40, %v817_v23  ;;  %2118 = vset.pattern.permute.xlu2 %v2355_v0  ;;  %v2952_v23 = vld [vmem:[#allocation5 + $0x10] sm:$0xff] }
 0x1a1   : > { %1180 = vperm.xlu2 %2118, %v2793_v47  }
 0x1a2   : > { %v824_v36 = vadd.f32 %v822_v30, %v805_v56  ;;  %v825_v27 = vadd.f32 %v823_v25, %v806_v61  ;;  %1104 = vrot.lane.b32.xlu0 %v2677_v28, %s3939_s5  ;;  %v2954_v30 = vld [vmem:[#allocation5 + $0x18] sm:$0xff] }
 0x1a4   : > { %v829_v34 = vpop.permute.xlu0 %828 }
 0x1a5   : > { %v831_v33 = vsel %vm830_vm15, %v827_v32, %v829_v34  ;;  %v832_v40 = vsel %vm830_vm15, %v829_v34, %v827_v32  ;;  %v3903_v34 = vperm.slane %v2952_v23, 0 }
 0x1a6   : > { %v835_v38 = vmul.f32 %v3908_v53, %v832_v40  ;;  %v836_v56 = vmul.f32 %v3906_v48, %v831_v33  ;;  %v3875_v33 = vperm.slane %v2954_v30, 0 }
 0x1a8   : > { %v841_v61 = vmul.f32 %v2758_v24, %v835_v38  ;;  %v842_v18 = vmul.f32 %v2758_v24, %v836_v56  ;;  %v865_v56 = vpop.permute.xlu2 %864 }
 0x1a9   : > { %2120 = vset.pattern.permute.xlu2 %v2357_v2 }
 0x1aa   : > { %v843_v32 = vadd.f32 %v841_v61, %v824_v36  ;;  %v844_v25 = vadd.f32 %v842_v18, %v825_v27  ;;  %1123 = vrot.lane.b32.xlu0 %v2677_v28, %s3937_s14  ;;  %1200 = vperm.xlu2 %2120, %v2793_v47   ;;  %s3965_s14 = sshll.u32 %s2572_s20, 5 }
 0x1ab   : > { %s3332_s5 = scalar_lea.vmem [#allocation8], %s3965_s14  ;;  %s3967_s14 = smov 31  }
 0x1ac   : > { %v848_v24 = vpop.permute.xlu0 %847 }
 0x1ad   : > { %v850_v40 = vsel %vm3936_vm0, %v846_v49, %v848_v24  ;;  %v851_v38 = vsel %vm3936_vm0, %v848_v24, %v846_v49  ;;  %v3902_v49 = vperm.slane %v2952_v23, 1  ;;  %v3876_v24 = vperm.slane %v2954_v30, 1 }
 0x1ae   : > { %v854_v36 = vmul.f32 %v3903_v34, %v851_v38  ;;  %v855_v27 = vmul.f32 %v3875_v33, %v850_v40  ;;  %v3878_v33 = vperm.slane %v2952_v23, 2 }
 0x1b0   : > { %v860_v47 = vmul.f32 %v2768_v41, %v854_v36  ;;  %v861_v61 = vmul.f32 %v2768_v41, %v855_v27 }
 0x1b2   : > { %v862_v18 = vadd.f32 %v860_v47, %v843_v32  ;;  %v863_v62 = vadd.f32 %v861_v61, %v844_v25  ;;  %1142 = vrot.lane.b32.xlu0 %v2677_v28, %s3879_s23  ;;  %2122 = vset.pattern.permute.xlu2 %v2355_v0  ;;  %v884_v47 = vpop.permute.xlu2 %883  ;;  %s3963_s23 = smov 34  }
 0x1b3   : > { %1268 = vperm.xlu2 %2122, %v2819_v60  }
 0x1b4   : > { %v867_v40 = vpop.permute.xlu0 %866 }
 0x1b5   : > { %v869_v38 = vsel %vm3935_vm1, %v865_v56, %v867_v40  ;;  %v870_v41 = vsel %vm3935_vm1, %v867_v40, %v865_v56  ;;  %v3877_v56 = vperm.slane %v2954_v30, 2  ;;  %v936_v40 = vpop.permute.xlu1 %935 }
 0x1b6   : > { %v873_v32 = vmul.f32 %v3902_v49, %v870_v41  ;;  %v874_v25 = vmul.f32 %v3876_v24, %v869_v38  ;;  %v3882_v24 = vperm.slane %v2952_v23, 3 }
 0x1b8   : > { %v879_v36 = vmul.f32 %v2784_v44, %v873_v32  ;;  %v880_v27 = vmul.f32 %v2784_v44, %v874_v25 }
 0x1ba   : > { %v881_v61 = vadd.f32 %v879_v36, %v862_v18  ;;  %v882_v46 = vadd.f32 %v880_v27, %v863_v62  ;;  %1276 = vperm.xlu0 %2123, %v2819_v60  }
 0x1bb   : > { %2125 = vset.pattern.permute.xlu2 %v3898_v6 }
 0x1bc   : > { %v886_v41 = vpop.permute.xlu0 %885  ;;  %1292 = vperm.xlu2 %2125, %v2819_v60  }
 0x1bd   : > { %v888_v44 = vsel %vm3934_vm2, %v884_v47, %v886_v41  ;;  %v889_v38 = vsel %vm3934_vm2, %v886_v41, %v884_v47  ;;  %v3881_v47 = vperm.slane %v2954_v30, 3  ;;  %v903_v41 = vpop.permute.xlu2 %902 }
 0x1be   : > { %v892_v62 = vmul.f32 %v3878_v33, %v889_v38  ;;  %v893_v18 = vmul.f32 %v3877_v56, %v888_v44  ;;  %v3884_v44 = vperm.slane %v2952_v23, 4 }
 0x1c0   : > { %v898_v32 = vmul.f32 %v2791_v43, %v892_v62  ;;  %v899_v25 = vmul.f32 %v2791_v43, %v893_v18  ;;  %v3883_v43 = vperm.slane %v2954_v30, 4  ;;  %v955_v62 = vpop.permute.xlu1 %954  ;;  %v923_v33 = vmul.f32 %v3884_v44, %v2677_v28 }
 0x1c2   : > { %v900_v36 = vadd.f32 %v898_v32, %v881_v61  ;;  %v901_v27 = vadd.f32 %v899_v25, %v882_v46  ;;  %2128 = vset.pattern.permute.xlu0 %v2362_v9 }
 0x1c3   : > { %1322 = vperm.xlu0 %2128, %v2819_v60  }
 0x1c4   : > { %v905_v38 = vpop.permute.xlu0 %904  ;;  %2127 = vset.pattern.permute.xlu2 %v2361_v8 }
 0x1c5   : > { %v907_v46 = vsel %vm3933_vm3, %v903_v41, %v905_v38  ;;  %v908_v61 = vsel %vm3933_vm3, %v905_v38, %v903_v41  ;;  %1312 = vperm.xlu2 %2127, %v2819_v60   ;;  %v924_v41 = vmul.f32 %v3883_v43, %v2679_v29  ;;  %v1161_v60 = vld [vmem:[%s3824_s6] sm:$0xf] }
 0x1c6   : > { %v911_v18 = vmul.f32 %v3882_v24, %v908_v61  ;;  %v912_v32 = vmul.f32 %v3881_v47, %v907_v46  ;;  %v3897_v61 = vperm.slane %v2952_v23, 5  ;;  %v929_v24 = vmul.f32 %v2715_v35, %v923_v33 }
 0x1c8   : > { %v917_v25 = vmul.f32 %v2800_v50, %v911_v18  ;;  %v918_v56 = vmul.f32 %v2800_v50, %v912_v32  ;;  %v3896_v50 = vperm.slane %v2954_v30, 5 }
 0x1ca   : > { %v919_v38 = vadd.f32 %v917_v25, %v900_v36  ;;  %v920_v46 = vadd.f32 %v918_v56, %v901_v27  ;;  %v930_v56 = vmul.f32 %v2715_v35, %v924_v41  ;;  %v974_v25 = vpop.permute.xlu1 %973  ;;  %v3894_v41 = vperm.slane %v2954_v30, 6 }
 0x1cb   : > { %2129 = vset.pattern.permute.xlu0 %v3885_v1 }
 0x1cc   : > { %1164 = vperm.xlu0 %2129, %v1161_v60   ;;  %v934_v18 = vpop.permute.xlu0 %933  ;;  %v931_v60 = vadd.f32 %v929_v24, %v919_v38  ;;  %v932_v43 = vadd.f32 %v930_v56, %v920_v46  ;;  %v3893_v56 = vperm.slane %v2952_v23, 7 }
 0x1cd   : > { %v938_v32 = vsel %vm3932_vm4, %v934_v18, %v936_v40  ;;  %v939_v47 = vsel %vm3932_vm4, %v936_v40, %v934_v18  ;;  %2142 = vset.pattern.permute.xlu2 %v2368_v15  ;;  %v1251_v15 = vld [vmem:[%s3826_s8] sm:$0xff]  ;;  %v3895_v40 = vperm.slane %v2952_v23, 6 }
 0x1ce   : > { %v942_v36 = vmul.f32 %v3897_v61, %v938_v32  ;;  %v943_v27 = vmul.f32 %v3896_v50, %v939_v47 }
 0x1d0   : > { %v948_v44 = vmul.f32 %v2729_v37, %v942_v36  ;;  %v949_v1 = vmul.f32 %v2729_v37, %v943_v27  ;;  %v3891_v36 = vperm.slane %v2954_v30, 7 }
 0x1d2   : > { %v950_v35 = vadd.f32 %v948_v44, %v931_v60  ;;  %v951_v33 = vadd.f32 %v949_v1, %v932_v43  ;;  %v993_v43 = vpop.permute.xlu1 %992 }
 0x1d4   : > { %1254 = vperm.xlu0 %2129, %v1251_v15   ;;  %v953_v47 = vpop.permute.xlu0 %952 }
 0x1d5   : > { %v957_v24 = vsel %vm3904_vm5, %v953_v47, %v955_v62  ;;  %v958_v37 = vsel %vm3904_vm5, %v955_v62, %v953_v47  ;;  %v3078_v47 = vld [vmem:[#allocation5 + $0x20] sm:$0xff]  ;;  %vm3914_vm5 = vcmp.lt.s32.totalorder %v2807_v54, 98 }
 0x1d6   : > { %v961_v38 = vmul.f32 %v3895_v40, %v957_v24  ;;  %v962_v46 = vmul.f32 %v3894_v41, %v958_v37  ;;  %v3917_v49 = vperm.slane %v3078_v47, 3 }
 0x1d8   : > { %v967_v1 = vmul.f32 %v2739_v39, %v961_v38  ;;  %v968_v44 = vmul.f32 %v2739_v39, %v962_v46 }
 0x1da   : > { %v969_v18 = vadd.f32 %v967_v1, %v950_v35  ;;  %v970_v32 = vadd.f32 %v968_v44, %v951_v33  ;;  %v3080_v35 = vld [vmem:[#allocation5 + $0x28] sm:$0xff]  ;;  %v1012_v1 = vpop.permute.xlu1 %1011 }
 0x1db   : > { %v3887_v46 = vperm.slane %v3080_v35, 0  ;;  %v3912_v50 = vperm.slane %v3080_v35, 2  ;;  %v3916_v34 = vperm.slane %v3080_v35, 3  ;;  %v3921_v53 = vperm.slane %v3080_v35, 4 }
 0x1dc   : > { %v972_v62 = vpop.permute.xlu0 %971  ;;  %v3928_v4 = vperm.slane %v3080_v35, 7 }
 0x1dd   : > { %v976_v27 = vsel %vm3886_vm6, %v972_v62, %v974_v25  ;;  %v977_v60 = vsel %vm3886_vm6, %v974_v25, %v972_v62  ;;  %v3890_v25 = vperm.slane %v3078_v47, 0  ;;  %vm3892_vm6 = vcmp.lt.s32.totalorder %v2807_v54, 112 }
 0x1de   : > { %v980_v15 = vmul.f32 %v3893_v56, %v976_v27  ;;  %v981_v39 = vmul.f32 %v3891_v36, %v977_v60  ;;  %v3907_v56 = vperm.slane %v3078_v47, 2 }
 0x1e0   : > { %v986_v33 = vmul.f32 %v2750_v20, %v980_v15  ;;  %v987_v24 = vmul.f32 %v2750_v20, %v981_v39  ;;  %v3100_v15 = vld [vmem:[%s3827_s9] sm:$0xff] }
 0x1e1   : > { %1342 = vperm.xlu1 %2130, %v3100_v15   ;;  %1528 = vperm.xlu2 %2142, %v3100_v15  }
 0x1e2   : > { %v988_v37 = vadd.f32 %v986_v33, %v969_v18  ;;  %v989_v38 = vadd.f32 %v987_v24, %v970_v32  ;;  %v3889_v33 = vperm.slane %v3078_v47, 1  ;;  %v3888_v24 = vperm.slane %v3080_v35, 1 }
 0x1e4   : > { %v991_v44 = vpop.permute.xlu0 %990 }
 0x1e5   : > { %v995_v62 = vsel %vm3899_vm7, %v991_v44, %v993_v43  ;;  %v996_v27 = vsel %vm3899_vm7, %v993_v43, %v991_v44  ;;  %vm3918_vm7 = vcmp.lt.s32.totalorder %v2807_v54, 110 }
 0x1e6   : > { %v999_v60 = vmul.f32 %v3890_v25, %v995_v62  ;;  %v1000_v20 = vmul.f32 %v3887_v46, %v996_v27  ;;  %v1031_v62 = vpop.permute.xlu1 %1030 }
 0x1e8   : > { %v1005_v18 = vmul.f32 %v2760_v19, %v999_v60  ;;  %v1006_v32 = vmul.f32 %v2760_v19, %v1000_v20 }
 0x1e9   : > { %2131 = vset.pattern.permute.xlu1 %v2355_v0  ;;  %2143 = vset.pattern.permute.xlu2 %v2369_v16 }
 0x1ea   : > { %v1007_v43 = vadd.f32 %v1005_v18, %v988_v37  ;;  %v1008_v39 = vadd.f32 %v1006_v32, %v989_v38  ;;  %v3115_v37 = vpop.permute.xlu2 %1040  ;;  %1358 = vperm.xlu1 %2131, %v3100_v15   ;;  %1544 = vperm.xlu2 %2143, %v3100_v15  }
 0x1ec   : > { %v1010_v44 = vpop.permute.xlu0 %1009 }
 0x1ed   : > { %v1014_v19 = vsel %vm3892_vm6, %v1010_v44, %v1012_v1  ;;  %v1015_v27 = vsel %vm3892_vm6, %v1012_v1, %v1010_v44  ;;  %vm3911_vm6 = vcmp.lt.s32.totalorder %v2807_v54, 111 }
 0x1ee   : > { %v1018_v60 = vmul.f32 %v3889_v33, %v1014_v19  ;;  %v1019_v20 = vmul.f32 %v3888_v24, %v1015_v27  ;;  %v1050_v44 = vpop.permute.xlu1 %1049 }
 0x1f0   : > { %v1024_v38 = vmul.f32 %v2776_v42, %v1018_v60  ;;  %v1025_v18 = vmul.f32 %v2776_v42, %v1019_v20 }
 0x1f2   : > { %v3121_v32 = vadd.f32 %v1024_v38, %v1007_v43  ;;  %v3123_v46 = vadd.f32 %v1025_v18, %v1008_v39  ;;  %v3127_v19 = vpop.permute.xlu2 %1059  ;;  %2132 = vset.pattern.permute.xlu1 %v3900_v5  ;;  %2144 = vset.pattern.permute.xlu2 %v2370_v17 }
 0x1f3   : > { %1374 = vperm.xlu1 %2132, %v3100_v15  }
 0x1f4   : > { %v1029_v1 = vpop.permute.xlu0 %1028 }
 0x1f5   : > { %v1033_v40 = vsel %vm3911_vm6, %v1029_v1, %v1031_v62 }
 0x1f6   : > { %v1069_v16 = vpop.permute.xlu1 %1068  ;;  %v1037_v5 = vmul.f32 %v3907_v56, %v1033_v40  ;;  %v1193_v40 = vperm.slane %v2677_v28, 2  ;;  %v3920_v56 = vperm.slane %v3078_v47, 4 }
 0x1f8   : > { %v1043_v45 = vmul.f32 %v3115_v37, %v1037_v5 }
 0x1fa   : > { %v3132_v43 = vpop.permute.xlu2 %1078 }
 0x1fb   : > { %2133 = vset.pattern.permute.xlu1 %v2357_v2 }
 0x1fc   : > { %v1048_v42 = vpop.permute.xlu0 %1047  ;;  %1390 = vperm.xlu1 %2133, %v3100_v15  }
 0x1fd   : > { %v1052_v48 = vsel %vm3918_vm7, %v1048_v42, %v1050_v44 }
 0x1fe   : > { %v1088_v27 = vpop.permute.xlu1 %1087 }
 0x202   : > { %v3137_v20 = vpop.permute.xlu2 %1097 }
 0x204   : > { %v1067_v39 = vpop.permute.xlu0 %1066  ;;  %2134 = vset.pattern.permute.xlu1 %v3898_v6  ;;  %v1034_v6 = vsel %vm3911_vm6, %v1031_v62, %v1029_v1  ;;  %v1053_v62 = vsel %vm3918_vm7, %v1050_v44, %v1048_v42  ;;  %v1173_v1 = vperm.slane %v2677_v28, 0  ;;  %vm3931_vm6 = vcmp.lt.s32.totalorder %v2807_v54, 97 }
 0x205   : > { %1406 = vperm.xlu1 %2134, %v3100_v15   ;;  %v1038_v55 = vmul.f32 %v3912_v50, %v1034_v6  ;;  %v1071_v22 = vsel %vm3914_vm5, %v1067_v39, %v1069_v16  ;;  %v1072_v6 = vsel %vm3914_vm5, %v1069_v16, %v1067_v39  ;;  %v1174_v44 = vperm.slane %v2679_v29, 0 }
 0x206   : > { %v1107_v38 = vpop.permute.xlu1 %1106  ;;  %v1203_v42 = vperm.slane %v2677_v28, 3  ;;  %v1056_v50 = vmul.f32 %v3917_v49, %v1052_v48  ;;  %v1057_v5 = vmul.f32 %v3916_v34, %v1053_v62  ;;  %v3927_v16 = vperm.slane %v3078_v47, 5 }
 0x207   : > { %v1044_v31 = vmul.f32 %v3115_v37, %v1038_v55  ;;  %v3926_v39 = vperm.slane %v3080_v35, 5  ;;  %vm3923_vm5 = vcmp.lt.s32.totalorder %v2807_v54, 96  ;;  %v1075_v59 = vmul.f32 %v3920_v56, %v1071_v22 }
 0x208   : > { %v1076_v48 = vmul.f32 %v3921_v53, %v1072_v6  ;;  %v1045_v55 = vadd.f32 %v1043_v45, %v3121_v32  ;;  %v3925_v37 = vperm.slane %v3078_v47, 6  ;;  %v3924_v49 = vperm.slane %v3080_v35, 6 }
 0x209   : > { %vm3930_vm7 = vcmp.lt.s32.totalorder %v2807_v54, 95  ;;  %v1062_v22 = vmul.f32 %v3127_v19, %v1056_v50  ;;  %v1063_v56 = vmul.f32 %v3127_v19, %v1057_v5  ;;  %v1046_v45 = vadd.f32 %v1044_v31, %v3123_v46 }
 0x20a   : > { %v3142_v18 = vpop.permute.xlu2 %1116  ;;  %v1130_v50 = vperm.slane %v3078_v47, 7  ;;  %v1081_v19 = vmul.f32 %v3132_v43, %v1075_v59  ;;  %v1082_v5 = vmul.f32 %v3132_v43, %v1076_v48  ;;  %v1194_v46 = vperm.slane %v2679_v29, 2 }
 0x20b   : > { %v1204_v43 = vperm.slane %v2679_v29, 3  ;;  %v1065_v48 = vadd.f32 %v1063_v56, %v1046_v45  ;;  %v1184_v56 = vperm.slane %v2679_v29, 1 }
 0x20c   : > { %v1086_v60 = vpop.permute.xlu0 %1085 }
 0x20d   : > { %2135 = vset.pattern.permute.xlu1 %v3901_v7  ;;  %v1090_v62 = vsel %vm3931_vm6, %v1086_v60, %v1088_v27  ;;  %v1091_v34 = vsel %vm3931_vm6, %v1088_v27, %v1086_v60 }
 0x20e   : > { %1422 = vperm.xlu1 %2135, %v3100_v15   ;;  %v3147_v33 = vpop.permute.xlu1 %1125  ;;  %v1094_v32 = vmul.f32 %v3927_v16, %v1090_v62  ;;  %v1095_v60 = vmul.f32 %v3926_v39, %v1091_v34  ;;  %v2164_v62 = vld [vmem:[#allocation5 + $0x30] ss:$0 sm:$0xff] }
 0x212   : > { %v3150_v25 = vpop.permute.xlu2 %1135 }
 0x214   : > { %v1105_v17 = vpop.permute.xlu0 %1104 }
 0x215   : > { %v1109_v6 = vsel %vm3923_vm5, %v1105_v17, %v1107_v38  ;;  %v1110_v53 = vsel %vm3923_vm5, %v1107_v38, %v1105_v17  ;;  %vm3929_vm5 = vcmp.lt.s32.totalorder %v2807_v54, 94  ;;  %v1064_v38 = vadd.f32 %v1062_v22, %v1045_v55 }
 0x216   : > { %2136 = vset.pattern.permute.xlu1 %v2361_v8  ;;  %v3158_v41 = vpop.permute.xlu1 %1144  ;;  %v1113_v17 = vmul.f32 %v3925_v37, %v1109_v6  ;;  %v1114_v31 = vmul.f32 %v3924_v49, %v1110_v53  ;;  %v2165_v6 = vld [vmem:[#allocation5 + $0x38] ss:$0 sm:$0xff]  ;;  %v1100_v53 = vmul.f32 %v3137_v20, %v1094_v32  ;;  %v1101_v49 = vmul.f32 %v3137_v20, %v1095_v60 }
 0x217   : > { %1438 = vperm.xlu1 %2136, %v3100_v15   ;;  %v1083_v55 = vadd.f32 %v1081_v19, %v1064_v38  ;;  %v1084_v22 = vadd.f32 %v1082_v5, %v1065_v48 }
 0x218   : > { %v1119_v45 = vmul.f32 %v3142_v18, %v1113_v17  ;;  %v1120_v32 = vmul.f32 %v3142_v18, %v1114_v31 }
 0x219   : > { %v1102_v5 = vadd.f32 %v1100_v53, %v1083_v55 }
 0x21a   : > { %v3163_v61 = vpop.permute.xlu2 %1154 }
 0x21c   : > { %v3144_v24 = vpop.permute.xlu0 %1123 }
 0x21d   : > { %v1128_v34 = vsel %vm3930_vm7, %v3144_v24, %v3147_v33  ;;  %v1129_v59 = vsel %vm3930_vm7, %v3147_v33, %v3144_v24 }
 0x21e   : > { %v1132_v24 = vmul.f32 %v1130_v50, %v1128_v34  ;;  %v1133_v20 = vmul.f32 %v3928_v4, %v1129_v59  ;;  %v1103_v59 = vadd.f32 %v1101_v49, %v1084_v22 }
 0x21f   : > { %2137 = vset.pattern.permute.xlu1 %v2362_v9 }
 0x220   : > { %1454 = vperm.xlu1 %2137, %v3100_v15   ;;  %v1138_v18 = vmul.f32 %v3150_v25, %v1132_v24  ;;  %v1139_v31 = vmul.f32 %v3150_v25, %v1133_v20 }
 0x222   : > { %v1181_v26 = vpop.permute.xlu2 %1180 }
 0x223   : > { %v1186_v19 = vmul.f32 %v1184_v56, %v1181_v26 }
 0x224   : > { %v3152_v36 = vpop.permute.xlu0 %1142 }
 0x225   : > { %v1147_v37 = vsel %vm3929_vm5, %v3152_v36, %v3158_v41  ;;  %v1148_v33 = vsel %vm3929_vm5, %v3158_v41, %v3152_v36 }
 0x226   : > { %v1151_v39 = vmul.f32 %v2164_v62, %v1147_v37  ;;  %v1152_v16 = vmul.f32 %v2165_v6, %v1148_v33  ;;  %v1121_v62 = vadd.f32 %v1119_v45, %v1102_v5  ;;  %v1122_v6 = vadd.f32 %v1120_v32, %v1103_v59 }
 0x228   : > { %2138 = vset.pattern.permute.xlu1 %v2364_v11  ;;  %v1171_v11 = vpop.permute.xlu1 %1170  ;;  %v1158_v49 = vmul.f32 %v3163_v61, %v1152_v16  ;;  %v1140_v20 = vadd.f32 %v1138_v18, %v1121_v62  ;;  %v1141_v55 = vadd.f32 %v1139_v31, %v1122_v6 }
 0x229   : > { %1470 = vperm.xlu1 %2138, %v3100_v15   ;;  %v1175_v41 = vmul.f32 %v1173_v1, %v1171_v11  ;;  %v1176_v36 = vmul.f32 %v1174_v44, %v1171_v11 }
 0x22a   : > { %v1201_v38 = vpop.permute.xlu2 %1200 }
 0x22b   : > { %v1205_v24 = vmul.f32 %v1203_v42, %v1201_v38  ;;  %v1206_v25 = vmul.f32 %v1204_v43, %v1201_v38 }
 0x22c   : > { %v3170_v7 = vpop.permute.xlu0 %1276 }
 0x230   : > { %v1191_v60 = vpop.permute.xlu1 %1190 }
 0x231   : > { %2139 = vset.pattern.permute.xlu1 %v2365_v12  ;;  %v1183_v12 = vperm.slane %v2677_v28, 1  ;;  %v1195_v11 = vmul.f32 %v1193_v40, %v1191_v60  ;;  %v1196_v37 = vmul.f32 %v1194_v46, %v1191_v60 }
 0x232   : > { %1486 = vperm.xlu1 %2139, %v3100_v15  }
 0x233   : > { %v1185_v34 = vmul.f32 %v1183_v12, %v1181_v26  ;;  %v1157_v26 = vmul.f32 %v3163_v61, %v1151_v39  ;;  %v1160_v39 = vadd.f32 %v1158_v49, %v1141_v55 }
 0x235   : > { %v3221_v27 = vpop.permute.xlu0 %1322  ;;  %v1159_v45 = vadd.f32 %v1157_v26, %v1140_v20 }
 0x238   : > { %v1261_v5 = vpop.permute.xlu1 %1260 }
 0x23a   : > { %2140 = vset.pattern.permute.xlu1 %v2363_v10 }
 0x23b   : > { %1502 = vperm.xlu1 %2140, %v3100_v15  }
 0x23e   : > { %v1165_v17 = vpop.permute.xlu0 %1164 }
 0x23f   : > { %v1177_v48 = vadd.f32 %v1175_v41, %v1165_v17  ;;  %v1178_v4 = vadd.f32 %v1176_v36, %v1165_v17  ;;  %v1269_v17 = vpop.permute.xlu2 %1268 }
 0x240   : > { %v1285_v62 = vpop.permute.xlu1 %1284  ;;  %v1271_v49 = vmul.f32 %v1269_v17, %v1183_v12 }
 0x241   : > { %v1187_v53 = vadd.f32 %v1185_v34, %v1177_v48  ;;  %v1188_v33 = vadd.f32 %v1186_v19, %v1178_v4  ;;  %v1263_v48 = vmul.f32 %v1261_v5, %v1173_v1  ;;  %v1272_v1 = vmul.f32 %v1269_v17, %v1184_v56 }
 0x243   : > { %v1197_v22 = vadd.f32 %v1195_v11, %v1187_v53  ;;  %v1198_v41 = vadd.f32 %v1196_v37, %v1188_v33  ;;  %2141 = vset.pattern.permute.xlu1 %v2367_v14  ;;  %v1264_v11 = vmul.f32 %v1261_v5, %v1174_v44 }
 0x244   : > { %1518 = vperm.xlu1 %2141, %v3100_v15  }
 0x245   : > { %v1207_v32 = vadd.f32 %v1205_v24, %v1197_v22  ;;  %v1208_v61 = vadd.f32 %v1206_v25, %v1198_v41 }
 0x246   : > { %v1255_v18 = vpop.permute.xlu0 %1254 }
 0x247   : > { %v1209_v16 = vadd.f32 %v1207_v32, %v1159_v45  ;;  %v1210_v4 = vadd.f32 %v1208_v61, %v1160_v39  ;;  %v1265_v6 = vadd.f32 %v1263_v48, %v1255_v18  ;;  %v1293_v55 = vpop.permute.xlu2 %1292  ;;  %v1279_v61 = vmul.f32 %v3170_v7, %v1193_v40 }
 0x248   : > { %v1287_v40 = vmul.f32 %v1285_v62, %v1203_v42 }
 0x249   : > { %v1948_v36 = vmul.f32 -1.442695, %v1209_v16  ;;  %v1949_v60 = vmul.f32 -1.442695, %v1210_v4  ;;  %v1273_v41 = vadd.f32 %v1271_v49, %v1265_v6 }
 0x24b   : > { %2174 = vpow2.f32 %v1948_v36 }
 0x24c   : > { %2176 = vpow2.f32 %v1949_v60  ;;  %2155 = vset.pattern.permute.xlu1 %v2355_v0  ;;  %v1266_v0 = vadd.f32 %v1264_v11, %v1255_v18  ;;  %v1280_v60 = vmul.f32 %v3170_v7, %v1194_v46  ;;  %v1303_v18 = vpop.permute.xlu1 %1302  ;;  %v1288_v11 = vmul.f32 %v1285_v62, %v1204_v43 }
 0x24e   : > { %v1274_v39 = vadd.f32 %v1272_v1, %v1266_v0 }
 0x24f   : > { %v1313_v0 = vpop.permute.xlu2 %1312 }
 0x251   : > { %v2175_v10 = vpop.eup %2174 }
 0x252   : > { %v2177_v34 = vpop.eup %2176  ;;  %v1217_v19 = vadd.f32 1.0, %v2175_v10 }
 0x253   : > { %v1218_v59 = vadd.f32 1.0, %v2177_v34 }
 0x254   : > { %2178 = vrcp.f32 %v1217_v19  ;;  %v1230_v53 = vand.u32 2147483648, %v1217_v19  ;;  %v1228_v25 = vand.u32 2147483647, %v1217_v19  ;;  %vm1224_vm6 = vweird.f32 %v1217_v19  ;;  %v3310_v29 = vpop.permute.xlu1 %1342 }
 0x255   : > { %2180 = vrcp.f32 %v1218_v59  ;;  %v1245_v20 = vand.u32 2147483648, %v1218_v59  ;;  %v1243_v44 = vand.u32 2147483647, %v1218_v59  ;;  %vm1239_vm3 = vweird.f32 %v1218_v59 }
 0x256   : > { %v1231_v12 = vor.u32 1.1754944e-38, %v1230_v53  ;;  %vm1229_vm2 = vcmp.eq.f32.partialorder %v1228_v25, 8.507059e+37 }
 0x257   : > { %v1246_v56 = vor.u32 1.1754944e-38, %v1245_v20  ;;  %vm1244_vm0 = vcmp.eq.f32.partialorder %v1243_v44, 8.507059e+37 }
 0x25a   : > { %v2179_v38 = vpop.eup %2178 }
 0x25b   : > { %v2181_v31 = vpop.eup %2180  ;;  %v1220_v14 = vmul.f32 %v2179_v38, %v1217_v19  ;;  %vm1225_vm5 = vweird.f32 %v2179_v38  ;;  %v1281_v19 = vadd.f32 %v1279_v61, %v1273_v41 }
 0x25c   : > { %v1235_v37 = vmul.f32 %v2181_v31, %v1218_v59  ;;  %vm1240_vm7 = vweird.f32 %v2181_v31  ;;  %vm1226_vm4 = vmor %vm1224_vm6, %vm1225_vm5  ;;  %v1282_v59 = vadd.f32 %v1280_v60, %v1274_v39  ;;  %v3324_v39 = vpop.permute.xlu1 %1358  ;;  %vm4038_vm6 = vcmp.lt.s32.totalorder %v2807_v54, 113 }
 0x25d   : > { %v1221_v26 = vsub.f32 1.0, %v1220_v14  ;;  %vm1241_vm1 = vmor %vm1239_vm3, %vm1240_vm7  ;;  %v1289_v7 = vadd.f32 %v1287_v40, %v1281_v19 }
 0x25e   : > { %v1236_v33 = vsub.f32 1.0, %v1235_v37  ;;  %vm4039_vm7 = vmmov %vm4038_vm6 }
 0x25f   : > { %v1222_v24 = vmul.f32 %v2179_v38, %v1221_v26  ;;  %v1290_v26 = vadd.f32 %v1288_v11, %v1282_v59 }
 0x260   : > { %v1237_v22 = vmul.f32 %v2181_v31, %v1236_v33 }
 0x261   : > { %v1223_v45 = vadd.f32 %v2179_v38, %v1222_v24 }
 0x262   : > { %v1238_v32 = vadd.f32 %v2181_v31, %v1237_v22 }
 0x263   : > { %v1227_v36 = vsel %vm1226_vm4, %v2179_v38, %v1223_v45  ;;  %vm4034_vm4 = vcmp.lt.s32.totalorder %v2807_v54, 114 }
 0x264   : > { %v1232_v10 = vsel %vm1229_vm2, %v1231_v12, %v1227_v36  ;;  %v1242_v34 = vsel %vm1241_vm1, %v2181_v31, %v1238_v32  ;;  %v2182_v12 = vld [vmem:[%s2578_s29] sm:$0xff]  ;;  %vm4029_vm2 = vcmp.lt.s32.totalorder %v2807_v54, 126  ;;  %vm4035_vm5 = vmmov %vm4034_vm4 }
 0x265   : > { %v1247_v5 = vsel %vm1244_vm0, %v1246_v56, %v1242_v34  ;;  %v1249_v17 = vmul.f32 %v1232_v10, %v1209_v16  ;;  %v3342_v36 = vpop.permute.xlu1 %1374  ;;  %vm4024_vm0 = vcmp.lt.s32.totalorder %v2807_v54, 127  ;;  %vm4030_vm3 = vmmov %vm4029_vm2 }
 0x266   : > { %v1250_v48 = vmul.f32 %v1247_v5, %v1210_v4  ;;  %v3398_v5 = vpop.permute.xlu2 %1528  ;;  %vm4025_vm1 = vmmov %vm4024_vm0 }
 0x267   : > { %v1295_v38 = vperm.slane %v1249_v17, 0  ;;  %v1305_v14 = vperm.slane %v1249_v17, 1  ;;  %v1315_v31 = vperm.slane %v1249_v17, 2  ;;  %v1325_v33 = vperm.slane %v1249_v17, 3 }
 0x268   : > { %v1296_v37 = vperm.slane %v1250_v48, 0  ;;  %v1306_v6 = vperm.slane %v1250_v48, 1  ;;  %v1316_v16 = vperm.slane %v1250_v48, 2  ;;  %v1326_v28 = vperm.slane %v1250_v48, 3 }
 0x269   : > { %v1297_v46 = vmul.f32 %v1295_v38, %v1293_v55  ;;  %v1307_v4 = vmul.f32 %v1305_v14, %v1303_v18  ;;  %v1317_v25 = vmul.f32 %v1315_v31, %v1313_v0  ;;  %v1327_v1 = vmul.f32 %v1325_v33, %v3221_v27  ;;  %v3432_v14 = vld [vmem:[%s3828_s10] sm:$0xff] }
 0x26a   : > { %v1298_v49 = vmul.f32 %v1296_v37, %v1293_v55  ;;  %v1308_v42 = vmul.f32 %v1306_v6, %v1303_v18  ;;  %v1318_v43 = vmul.f32 %v1316_v16, %v1313_v0  ;;  %v1328_v22 = vmul.f32 %v1326_v28, %v3221_v27  ;;  %v2183_v27 = vld [vmem:[%s2578_s29 + $0x8] sm:$0xff] }
 0x26b   : > { %v1299_v53 = vadd.f32 %v1297_v46, %v1289_v7  ;;  %v3981_v0 = vperm.slane %v2810_v57, 1 }
 0x26c   : > { %v1300_v24 = vadd.f32 %v1298_v49, %v1290_v26 }
 0x26d   : > { %v1309_v20 = vadd.f32 %v1307_v4, %v1299_v53  ;;  %v3982_v53 = vperm.slane %v2812_v58, 1 }
 0x26e   : > { %v1310_v62 = vadd.f32 %v1308_v42, %v1300_v24  ;;  %v3352_v56 = vpop.permute.xlu1 %1390  ;;  %v3412_v18 = vpop.permute.xlu2 %1544 }
 0x26f   : > { %v1319_v55 = vadd.f32 %v1317_v25, %v1309_v20 }
 0x270   : > { %v1320_v44 = vadd.f32 %v1318_v43, %v1310_v62 }
 0x271   : > { %v3314_v41 = vadd.f32 %v1327_v1, %v1319_v55  ;;  %v3985_v1 = vperm.slane %v2810_v57, 2 }
 0x272   : > { %v3316_v45 = vadd.f32 %v1328_v22, %v1320_v44  ;;  %v3986_v22 = vperm.slane %v2812_v58, 2 }
 0x273   : > { %1332 = vrot.lane.b32.xlu1 %v3314_v41, %s3963_s23  ;;  %v1817_v32 = vadd.f32 %v2182_v12, %v3314_v41 }
 0x274   : > { %1351 = vrot.lane.b32.xlu0 %v3316_v45, %s3964_s15  ;;  %1334 = vrot.lane.b32.xlu2 %v3316_v45, %s3963_s23  ;;  %v1818_v61 = vadd.f32 %v2183_v27, %v3316_v45  ;;  %s3968_s23 = smov 30  }
 0x275   : > { %1819 = vst [vmem:[%s3332_s5] sm:$0xff] %v1817_v32 }
 0x276   : > { %1820 = vst [vmem:[%s3332_s5 + $0x8] sm:$0xff] %v1818_v61 }
 0x277   : > { %v3364_v60 = vpop.permute.xlu1 %1406 }
 0x27b   : > { %1537 = vrot.lane.b32.xlu1 %v3316_v45, %s2375_s19 }
 0x27c   : > { %1367 = vrot.lane.b32.xlu0 %v3316_v45, %s3966_s17  ;;  %1349 = vrot.lane.b32.xlu2 %v3314_v41, %s3964_s15  ;;  %s3969_s15 = smov 18  }
 0x280   : > { %v3372_v10 = vpop.permute.xlu1 %1422 }
 0x283   : > { %1553 = vrot.lane.b32.xlu1 %v3316_v45, %s2377_s30 }
 0x284   : > { %1383 = vrot.lane.b32.xlu0 %v3316_v45, %s3967_s14  ;;  %1365 = vrot.lane.b32.xlu2 %v3314_v41, %s3966_s17  ;;  %s3970_s17 = smov 17  }
 0x289   : > { %v3380_v34 = vpop.permute.xlu1 %1438 }
 0x28b   : > { %1569 = vrot.lane.b32.xlu1 %v3316_v45, %s2379_s28 }
 0x28c   : > { %1399 = vrot.lane.b32.xlu0 %v3316_v45, %s3968_s23  ;;  %1381 = vrot.lane.b32.xlu2 %v3314_v41, %s3967_s14  ;;  %s3971_s14 = smov 16  }
 0x292   : > { %v3390_v19 = vpop.permute.xlu1 %1454 }
 0x293   : > { %1585 = vrot.lane.b32.xlu1 %v3316_v45, %s3946_s27  ;;  %s3989_s27 = smov 110  }
 0x294   : > { %1415 = vrot.lane.b32.xlu0 %v3316_v45, %s3969_s15  ;;  %1397 = vrot.lane.b32.xlu2 %v3314_v41, %s3968_s23  ;;  %s3972_s23 = smov 15  }
 0x29b   : > { %1601 = vrot.lane.b32.xlu1 %v3316_v45, %s3945_s18  ;;  %v3404_v17 = vpop.permute.xlu1 %1470  ;;  %s3977_s18 = smov 1  }
 0x29c   : > { %1431 = vrot.lane.b32.xlu0 %v3316_v45, %s3970_s17  ;;  %1413 = vrot.lane.b32.xlu2 %v3314_v41, %s3969_s15  ;;  %s3973_s15 = smov 98  }
 0x2a3   : > { %1617 = vrot.lane.b32.xlu1 %v3316_v45, %s3943_s13  ;;  %s3974_s13 = smov 14  }
 0x2a4   : > { %1447 = vrot.lane.b32.xlu0 %v3316_v45, %s3971_s14  ;;  %1429 = vrot.lane.b32.xlu2 %v3314_v41, %s3970_s17  ;;  %s3975_s17 = smov 2   ;;  %v3414_v59 = vpop.permute.xlu1 %1486 }
 0x2ab   : > { %1633 = vrot.lane.b32.xlu1 %v3316_v45, %s3944_s16  ;;  %s3976_s16 = smov 96  }
 0x2ac   : > { %1463 = vrot.lane.b32.xlu0 %v3316_v45, %s3972_s23  ;;  %1445 = vrot.lane.b32.xlu2 %v3314_v41, %s3971_s14 }
 0x2ad   : > { %v3422_v40 = vpop.permute.xlu1 %1502 }
 0x2b3   : > { %1649 = vrot.lane.b32.xlu1 %v3316_v45, %s3973_s15 }
 0x2b4   : > { %1479 = vrot.lane.b32.xlu0 %v3316_v45, %s3974_s13  ;;  %1461 = vrot.lane.b32.xlu2 %v3314_v41, %s3972_s23  ;;  %s3978_s23 = smov 95  }
 0x2b6   : > { %v3435_v11 = vpop.permute.xlu1 %1518 }
 0x2bb   : > { %1665 = vrot.lane.b32.xlu1 %v3316_v45, %s3962_s26 }
 0x2bc   : > { %1495 = vrot.lane.b32.xlu0 %v3316_v45, %s3975_s17  ;;  %1477 = vrot.lane.b32.xlu2 %v3314_v41, %s3974_s13  ;;  %s3979_s13 = smov 94  }
 0x2c3   : > { %1681 = vrot.lane.b32.xlu1 %v3316_v45, %s3976_s16 }
 0x2c4   : > { %1511 = vrot.lane.b32.xlu0 %v3316_v45, %s3977_s18  ;;  %1493 = vrot.lane.b32.xlu2 %v3314_v41, %s3975_s17 }
 0x2cb   : > { %1697 = vrot.lane.b32.xlu1 %v3316_v45, %s3978_s23 }
 0x2cc   : > { %1535 = vrot.lane.b32.xlu0 %v3314_v41, %s2375_s19  ;;  %1509 = vrot.lane.b32.xlu2 %v3314_v41, %s3977_s18  ;;  %s3980_s19 = smov 113  }
 0x2ce   : > { %v1335_v48 = vpop.permute.xlu2 %1334 }
 0x2d3   : > { %1713 = vrot.lane.b32.xlu1 %v3316_v45, %s3979_s13 }
 0x2d4   : > { %1551 = vrot.lane.b32.xlu0 %v3314_v41, %s2377_s30  ;;  %1560 = vperm.xlu2 %2144, %v3100_v15   ;;  %s3983_s30 = smov 112  }
 0x2d6   : > { %v1350_v38 = vpop.permute.xlu2 %1349 }
 0x2db   : > { %1746 = vperm.xlu1 %2155, %v3432_v14  }
 0x2dc   : > { %1567 = vrot.lane.b32.xlu0 %v3314_v41, %s2379_s28  ;;  %2145 = vset.pattern.permute.xlu2 %v2366_v13  ;;  %s3987_s28 = smov 111  }
 0x2dd   : > { %1576 = vperm.xlu2 %2145, %v3100_v15  }
 0x2de   : > { %v1366_v37 = vpop.permute.xlu2 %1365 }
 0x2e3   : > { %2157 = vset.pattern.permute.xlu1 %v2357_v2 }
 0x2e4   : > { %1583 = vrot.lane.b32.xlu0 %v3314_v41, %s3980_s19  ;;  %1766 = vperm.xlu1 %2157, %v3432_v14  }
 0x2e5   : > { %2146 = vset.pattern.permute.xlu2 %v2371_v51  ;;  %v1333_v6 = vpop.permute.xlu1 %1332 }
 0x2e6   : > { %v1352_v7 = vpop.permute.xlu0 %1351  ;;  %1592 = vperm.xlu2 %2146, %v3100_v15   ;;  %v1382_v46 = vpop.permute.xlu2 %1381  ;;  %v1336_v13 = vsel %vm696_vm9, %v1333_v6, %v1335_v48  ;;  %v1337_v31 = vsel %vm696_vm9, %v1335_v48, %v1333_v6 }
 0x2e7   : > { %v1353_v2 = vsel %vm716_vm8, %v1350_v38, %v1352_v7  ;;  %v1354_v26 = vsel %vm716_vm8, %v1352_v7, %v1350_v38  ;;  %v1338_v51 = vmul.f32 %v1337_v31, %v699_v63  ;;  %v1339_v49 = vmul.f32 %v1336_v13, %v700_v3 }
 0x2e8   : > { %v1355_v16 = vmul.f32 %v1354_v26, %v3981_v0  ;;  %v1356_v33 = vmul.f32 %v1353_v2, %v3982_v53  ;;  %v3984_v3 = vmov 17   ;;  %v3991_v0 = vperm.slane %v2812_v58, 4 }
 0x2e9   : > { %v1345_v4 = vmul.f32 %v3310_v29, %v1338_v51  ;;  %v1346_v24 = vmul.f32 %v3310_v29, %v1339_v49  ;;  %vm4002_vm8 = vcmp.lt.s32.totalorder %v2807_v54, 15 }
 0x2ea   : > { %v1361_v28 = vmul.f32 %v3324_v39, %v1355_v16  ;;  %v1362_v42 = vmul.f32 %v3324_v39, %v1356_v33  ;;  %vm4003_vm9 = vmmov %vm4002_vm8 }
 0x2ec   : > { %v1363_v25 = vadd.f32 %v1361_v28, %v1345_v4  ;;  %v1364_v20 = vadd.f32 %v1362_v42, %v1346_v24  ;;  %1599 = vrot.lane.b32.xlu0 %v3314_v41, %s3983_s30  ;;  %2160 = vset.pattern.permute.xlu1 %v2361_v8 }
 0x2ed   : > { %1796 = vperm.xlu1 %2160, %v3432_v14  }
 0x2ee   : > { %v1368_v63 = vpop.permute.xlu0 %1367  ;;  %2147 = vset.pattern.permute.xlu2 %v3984_v3  ;;  %v1398_v43 = vpop.permute.xlu2 %1397 }
 0x2ef   : > { %v1369_v29 = vsel %vm735_vm10, %v1366_v37, %v1368_v63  ;;  %v1370_v62 = vsel %vm735_vm10, %v1368_v63, %v1366_v37  ;;  %1608 = vperm.xlu2 %2147, %v3100_v15   ;;  %v3988_v37 = vmov 18   ;;  %v3993_v63 = vperm.slane %v2810_v57, 5 }
 0x2f0   : > { %v1371_v55 = vmul.f32 %v1370_v62, %v3985_v1  ;;  %v1372_v8 = vmul.f32 %v1369_v29, %v3986_v22  ;;  %vm4007_vm10 = vcmp.lt.s32.totalorder %v2807_v54, 14 }
 0x2f2   : > { %v1377_v44 = vmul.f32 %v3342_v36, %v1371_v55  ;;  %v1378_v39 = vmul.f32 %v3342_v36, %v1372_v8 }
 0x2f4   : > { %v1379_v12 = vadd.f32 %v1377_v44, %v1363_v25  ;;  %v1380_v32 = vadd.f32 %v1378_v39, %v1364_v20  ;;  %1615 = vrot.lane.b32.xlu0 %v3314_v41, %s3987_s28  ;;  %s1826_s28 = scalar_lea.sflag [#allocation4], %s2572_s20 }
 0x2f5   : > { %2162 = vset.pattern.permute.xlu1 %v2362_v9 }
 0x2f6   : > { %v1384_v27 = vpop.permute.xlu0 %1383  ;;  %v1414_v61 = vpop.permute.xlu2 %1413  ;;  %1806 = vperm.xlu1 %2162, %v3432_v14  }
 0x2f7   : > { %v1385_v48 = vsel %vm754_vm11, %v1382_v46, %v1384_v27  ;;  %v1386_v38 = vsel %vm754_vm11, %v1384_v27, %v1382_v46  ;;  %2148 = vset.pattern.permute.xlu2 %v3988_v37  ;;  %vm4008_vm11 = vmmov %vm4007_vm10 }
 0x2f8   : > { %v1387_v36 = vmul.f32 %v1386_v38, %v757_v21  ;;  %v1388_v6 = vmul.f32 %v1385_v48, %v758_v52  ;;  %1624 = vperm.xlu2 %2148, %v3100_v15   ;;  %v3990_v52 = vperm.slane %v2810_v57, 4  ;;  %v3537_v48 = vpop.permute.xlu1 %1537 }
 0x2fa   : > { %v1393_v7 = vmul.f32 %v3352_v56, %v1387_v36  ;;  %v1394_v13 = vmul.f32 %v3352_v56, %v1388_v6  ;;  %v3992_v56 = vmov 19   ;;  %v3998_v36 = vmov 21  }
 0x2fc   : > { %v1395_v31 = vadd.f32 %v1393_v7, %v1379_v12  ;;  %v1396_v2 = vadd.f32 %v1394_v13, %v1380_v32  ;;  %1631 = vrot.lane.b32.xlu0 %v3314_v41, %s3989_s27  ;;  %v3996_v32 = vperm.slane %v2810_v57, 6 }
 0x2fe   : > { %v1400_v46 = vpop.permute.xlu0 %1399  ;;  %v1430_v26 = vpop.permute.xlu2 %1429 }
 0x2ff   : > { %v1401_v51 = vsel %vm773_vm12, %v1398_v43, %v1400_v46  ;;  %v1402_v21 = vsel %vm773_vm12, %v1400_v46, %v1398_v43  ;;  %v3994_v43 = vperm.slane %v2812_v58, 5  ;;  %vm4012_vm12 = vcmp.lt.s32.totalorder %v2807_v54, 2 }
 0x300   : > { %v1403_v49 = vmul.f32 %v1402_v21, %v3990_v52  ;;  %v1404_v16 = vmul.f32 %v1401_v51, %v3991_v0  ;;  %2149 = vset.pattern.permute.xlu2 %v3992_v56  ;;  %v4000_v51 = vperm.slane %v2812_v58, 7  ;;  %v3555_v0 = vpop.permute.xlu1 %1553 }
 0x301   : > { %1640 = vperm.xlu2 %2149, %v3100_v15  }
 0x302   : > { %v1409_v53 = vmul.f32 %v3364_v60, %v1403_v49  ;;  %v1410_v33 = vmul.f32 %v3364_v60, %v1404_v16  ;;  %v3995_v60 = vmov 20   ;;  %v4001_v16 = vmov 22  }
 0x304   : > { %v1411_v4 = vadd.f32 %v1409_v53, %v1395_v31  ;;  %v1412_v24 = vadd.f32 %v1410_v33, %v1396_v2  ;;  %1647 = vrot.lane.b32.xlu0 %v3314_v41, %s3973_s15  ;;  %s2299_s15 = scalar_lea.hbm %s3830_s12, 64 }
 0x306   : > { %v1416_v28 = vpop.permute.xlu0 %1415  ;;  %v1446_v42 = vpop.permute.xlu2 %1445 }
 0x307   : > { %v1417_v25 = vsel %vm792_vm13, %v1414_v61, %v1416_v28  ;;  %v1418_v20 = vsel %vm792_vm13, %v1416_v28, %v1414_v61  ;;  %v4005_v28 = vperm.slane %v2954_v30, 0  ;;  %vm4013_vm13 = vmmov %vm4012_vm12 }
 0x308   : > { %v1419_v3 = vmul.f32 %v1418_v20, %v3993_v63  ;;  %v1420_v29 = vmul.f32 %v1417_v25, %v3994_v43  ;;  %v4006_v43 = vmov 23  }
 0x309   : > { %2150 = vset.pattern.permute.xlu2 %v3995_v60 }
 0x30a   : > { %v1425_v62 = vmul.f32 %v3372_v10, %v1419_v3  ;;  %v1426_v1 = vmul.f32 %v3372_v10, %v1420_v29  ;;  %1656 = vperm.xlu2 %2150, %v3100_v15   ;;  %v3997_v10 = vperm.slane %v2812_v58, 6  ;;  %v3574_v29 = vpop.permute.xlu1 %1569 }
 0x30c   : > { %v1427_v55 = vadd.f32 %v1425_v62, %v1411_v4  ;;  %v1428_v22 = vadd.f32 %v1426_v1, %v1412_v24  ;;  %1663 = vrot.lane.b32.xlu0 %v3314_v41, %s3962_s26 }
 0x30e   : > { %v1432_v8 = vpop.permute.xlu0 %1431  ;;  %v1462_v44 = vpop.permute.xlu2 %1461 }
 0x30f   : > { %v1433_v39 = vsel %vm811_vm14, %v1430_v26, %v1432_v8  ;;  %v1434_v12 = vsel %vm811_vm14, %v1432_v8, %v1430_v26  ;;  %v3999_v26 = vperm.slane %v2810_v57, 7  ;;  %v4010_v8 = vperm.slane %v2954_v30, 1 }
 0x310   : > { %v1435_v27 = vmul.f32 %v1434_v12, %v3996_v32  ;;  %v1436_v61 = vmul.f32 %v1433_v39, %v3997_v10  ;;  %v1727_v39 = vld [vmem:[%s3829_s11] sm:$0xff]  ;;  %v4011_v10 = vmov 0   ;;  %vm4018_vm14 = vcmp.lt.s32.totalorder %v2807_v54, 1 }
 0x312   : > { %v1441_v38 = vmul.f32 %v3380_v34, %v1435_v27  ;;  %v1442_v37 = vmul.f32 %v3380_v34, %v1436_v61  ;;  %2151 = vset.pattern.permute.xlu2 %v3998_v36 }
 0x313   : > { %1672 = vperm.xlu2 %2151, %v3100_v15  }
 0x314   : > { %v1443_v6 = vadd.f32 %v1441_v38, %v1427_v55  ;;  %v1444_v7 = vadd.f32 %v1442_v37, %v1428_v22  ;;  %1679 = vrot.lane.b32.xlu0 %v3314_v41, %s3976_s16  ;;  %v3592_v37 = vpop.permute.xlu1 %1585 }
 0x316   : > { %v1448_v13 = vpop.permute.xlu0 %1447  ;;  %v1478_v31 = vpop.permute.xlu2 %1477 }
 0x317   : > { %v1449_v2 = vsel %vm830_vm15, %v1446_v42, %v1448_v13  ;;  %v1450_v46 = vsel %vm830_vm15, %v1448_v13, %v1446_v42  ;;  %v4015_v13 = vperm.slane %v2954_v30, 2  ;;  %vm4019_vm15 = vmmov %vm4018_vm14 }
 0x318   : > { %v1451_v34 = vmul.f32 %v1450_v46, %v3999_v26  ;;  %v1452_v21 = vmul.f32 %v1449_v2, %v4000_v51  ;;  %v4016_v51 = vmov 5  }
 0x31a   : > { %v1457_v52 = vmul.f32 %v3390_v19, %v1451_v34  ;;  %v1458_v49 = vmul.f32 %v3390_v19, %v1452_v21  ;;  %v4004_v19 = vperm.slane %v2952_v23, 0 }
 0x31b   : > { %2152 = vset.pattern.permute.xlu2 %v4001_v16 }
 0x31c   : > { %v1459_v56 = vadd.f32 %v1457_v52, %v1443_v6  ;;  %v1460_v53 = vadd.f32 %v1458_v49, %v1444_v7  ;;  %1695 = vrot.lane.b32.xlu0 %v3314_v41, %s3978_s23  ;;  %1688 = vperm.xlu2 %2152, %v3100_v15   ;;  %v4014_v7 = vperm.slane %v2952_v23, 2  ;;  %v4017_v52 = vmov 2   ;;  %s1956_s23 = sshll.u32 %s2491_s25, 5  ;;  %s1838_s25 = sshll.u32 %s3332_s5, 4  ;;  %s1839_s25 = int_to_ptr.vmem [resolvable:$true] %s1838_s25 }
 0x31d   : > { %s1837_s19 = scalar_lea.hbm %s3830_s12, %s1956_s23 }
 0x31e   : > { %v1464_v57 = vpop.permute.xlu0 %1463  ;;  %v1494_v33 = vpop.permute.xlu2 %1493  ;;  %s1840_s30 = sshll.u32 %s1837_s19, 4  ;;  %s1841_s30 = int_to_ptr.hbm [resolvable:$true] %s1840_s30 }
 0x31f   : > { %v1465_v58 = vsel %vm4002_vm8, %v1462_v44, %v1464_v57  ;;  %v1466_v4 = vsel %vm4003_vm9, %v1464_v57, %v1462_v44  ;;  %v4021_v57 = vperm.slane %v2954_v30, 4  ;;  %vm4042_vm8 = vcmp.lt.s32.totalorder %v2807_v54, 112  ;;  %s2293_s27 = sshra.s32 %s1841_s30, 4  ;;  %s2294_s27 = int_to_ptr.hbm [resolvable:$true] %s2293_s27 }
 0x320   : > { %v1467_v24 = vmul.f32 %v1466_v4, %v4004_v19  ;;  %v1468_v42 = vmul.f32 %v1465_v58, %v4005_v28  ;;  %v4022_v58 = vperm.slane %v2952_v23, 3  ;;  %v4023_v19 = vperm.slane %v2954_v30, 3  ;;  %v1602_v28 = vpop.permute.xlu1 %1601  ;;  %vm4043_vm9 = vmmov %vm4042_vm8  ;;  %s2295_s16 = scalar_lea.hbm %s2294_s27, 32  ;;  %p2300_p11 = scmp.lt.s32.totalorder %s2294_s27, %s3830_s12 }
 0x321   : > { %p2296_p1 = scmp.ne.s32.totalorder %s2294_s27, %s2295_s16  ;;  %p2301_p2 = scmp.lt.s32.totalorder %s2299_s15, %s2295_s16 }
 0x322   : > { %v1473_v25 = vmul.f32 %v3404_v17, %v1467_v24  ;;  %v1474_v20 = vmul.f32 %v3404_v17, %v1468_v42  ;;  %v4009_v17 = vperm.slane %v2952_v23, 1 }
 0x323   : > { %p2297_p4 = pnand %p2296_p1, %p2539_p3  ;;  %p2302_p9 = por %p2301_p2, %p2300_p11 }
 0x324   : > { %v1475_v63 = vadd.f32 %v1473_v25, %v1459_v56  ;;  %v1476_v3 = vadd.f32 %v1474_v20, %v1460_v53  ;;  %1711 = vrot.lane.b32.xlu0 %v3314_v41, %s3979_s13  ;;  %2153 = vset.pattern.permute.xlu2 %v4006_v43 }
 0x325   : > { %1704 = vperm.xlu2 %2153, %v3100_v15   ;;  %p2298_p8 = pneg %p2297_p4 }
 0x326   : > { %v1480_v60 = vpop.permute.xlu0 %1479  ;;  %v1510_v62 = vpop.permute.xlu2 %1509 }
 0x327   : > { %v1481_v1 = vsel %vm4007_vm10, %v1478_v31, %v1480_v60  ;;  %v1482_v55 = vsel %vm4008_vm11, %v1480_v60, %v1478_v31  ;;  %vm4046_vm10 = vcmp.lt.s32.totalorder %v2807_v54, 111  ;;  %p2303_p10 = pnand %p2302_p9, %p2298_p8 }
 0x328   : > { %v1483_v22 = vmul.f32 %v1482_v55, %v4009_v17  ;;  %v1484_v44 = vmul.f32 %v1481_v1, %v4010_v8  ;;  %v4028_v8 = vperm.slane %v2954_v30, 5  ;;  %vm4047_vm11 = vmmov %vm4046_vm10 }
 0x32a   : > { %v1489_v15 = vmul.f32 %v3414_v59, %v1483_v22  ;;  %v1490_v12 = vmul.f32 %v3414_v59, %v1484_v44  ;;  %v4027_v22 = vperm.slane %v2952_v23, 5 }
 0x32c   : > { %v1491_v32 = vadd.f32 %v1489_v15, %v1475_v63  ;;  %v1492_v27 = vadd.f32 %v1490_v12, %v1476_v3  ;;  %1730 = vperm.xlu0 %2129, %v1727_v39   ;;  %v1618_v12 = vpop.permute.xlu1 %1617 }
 0x32d   : > { %2154 = vset.pattern.permute.xlu2 %v4011_v10 }
 0x32e   : > { %v1496_v61 = vpop.permute.xlu0 %1495  ;;  %1736 = vperm.xlu2 %2154, %v3432_v14   ;;  %v1561_v38 = vpop.permute.xlu2 %1560 }
 0x32f   : > { %v1497_v36 = vsel %vm4012_vm12, %v1494_v33, %v1496_v61  ;;  %v1498_v6 = vsel %vm4013_vm13, %v1496_v61, %v1494_v33  ;;  %v1526_v33 = vmul.f32 %v3316_v45, %v4021_v57  ;;  %vm4050_vm12 = vcmp.lt.s32.totalorder %v2807_v54, 110 }
 0x330   : > { %v1499_v59 = vmul.f32 %v1498_v6, %v4014_v7  ;;  %v1500_v31 = vmul.f32 %v1497_v36, %v4015_v13  ;;  %v4031_v36 = vperm.slane %v2952_v23, 6  ;;  %v4032_v6 = vperm.slane %v2954_v30, 6  ;;  %vm4051_vm13 = vmmov %vm4050_vm12 }
 0x331   : > { %v1532_v63 = vmul.f32 %v3398_v5, %v1526_v33 }
 0x332   : > { %v1505_v2 = vmul.f32 %v3422_v40, %v1499_v59  ;;  %v1506_v46 = vmul.f32 %v3422_v40, %v1500_v31  ;;  %v4020_v40 = vperm.slane %v2952_v23, 4  ;;  %v4033_v59 = vmov 24  }
 0x334   : > { %v1507_v26 = vadd.f32 %v1505_v2, %v1491_v32  ;;  %v1508_v34 = vadd.f32 %v1506_v46, %v1492_v27  ;;  %2159 = vset.pattern.permute.xlu0 %v4016_v51  ;;  %v1525_v53 = vmul.f32 %v3314_v41, %v4020_v40 }
 0x335   : > { %1786 = vperm.xlu0 %2159, %v3432_v14  }
 0x336   : > { %v1512_v21 = vpop.permute.xlu0 %1511  ;;  %2156 = vset.pattern.permute.xlu2 %v4017_v52  ;;  %v1531_v20 = vmul.f32 %v3398_v5, %v1525_v53  ;;  %v4036_v52 = vperm.slane %v2952_v23, 7  ;;  %v4040_v23 = vperm.slane %v3078_v47, 0 }
 0x337   : > { %v1513_v49 = vsel %vm4018_vm14, %v1510_v62, %v1512_v21  ;;  %v1514_v16 = vsel %vm4019_vm15, %v1512_v21, %v1510_v62  ;;  %1756 = vperm.xlu2 %2156, %v3432_v14   ;;  %v1577_v56 = vpop.permute.xlu2 %1576  ;;  %vm4054_vm14 = vcmp.lt.s32.totalorder %v2807_v54, 98 }
 0x338   : > { %v1515_v4 = vmul.f32 %v1514_v16, %v4022_v58  ;;  %v1516_v24 = vmul.f32 %v1513_v49, %v4023_v19  ;;  %v4037_v16 = vperm.slane %v2954_v30, 7  ;;  %v4041_v30 = vperm.slane %v3080_v35, 0  ;;  %vm4055_vm15 = vmmov %vm4054_vm14 }
 0x33a   : > { %v1521_v42 = vmul.f32 %v3435_v11, %v1515_v4  ;;  %v1522_v25 = vmul.f32 %v3435_v11, %v1516_v24  ;;  %v4026_v11 = vmov 4  }
 0x33c   : > { %v1523_v3 = vadd.f32 %v1521_v42, %v1507_v26  ;;  %v1524_v43 = vadd.f32 %v1522_v25, %v1508_v34  ;;  %v1634_v34 = vpop.permute.xlu1 %1633 }
 0x33d   : > { %2163 = vset.pattern.permute.xlu0 %v2362_v9 }
 0x33e   : > { %v1536_v60 = vpop.permute.xlu0 %1535  ;;  %v1533_v62 = vadd.f32 %v1531_v20, %v1523_v3  ;;  %v1534_v1 = vadd.f32 %v1532_v63, %v1524_v43 }
 0x33f   : > { %v1539_v55 = vsel %vm4024_vm0, %v1536_v60, %v3537_v48  ;;  %v1540_v17 = vsel %vm4025_vm1, %v3537_v48, %v1536_v60  ;;  %2158 = vset.pattern.permute.xlu2 %v4026_v11  ;;  %vm4058_vm0 = vcmp.lt.s32.totalorder %v2807_v54, 97 }
 0x340   : > { %v1541_v5 = vmul.f32 %v1539_v55, %v4027_v22  ;;  %v1542_v44 = vmul.f32 %v1540_v17, %v4028_v8  ;;  %1776 = vperm.xlu2 %2158, %v3432_v14   ;;  %v1593_v9 = vpop.permute.xlu2 %1592  ;;  %v4045_v17 = vperm.slane %v3080_v35, 1  ;;  %vm4059_vm1 = vmmov %vm4058_vm0 }
 0x342   : > { %v1547_v39 = vmul.f32 %v3412_v18, %v1541_v5  ;;  %v1548_v15 = vmul.f32 %v3412_v18, %v1542_v44  ;;  %v2184_v18 = vld [vmem:[%s3827_s9] sm:$0xff] }
 0x344   : > { %v1549_v32 = vadd.f32 %v1547_v39, %v1533_v62  ;;  %v1550_v27 = vadd.f32 %v1548_v15, %v1534_v1  ;;  %v1650_v19 = vpop.permute.xlu1 %1649 }
 0x346   : > { %v1552_v10 = vpop.permute.xlu0 %1551 }
 0x347   : > { %v1555_v48 = vsel %vm4029_vm2, %v1552_v10, %v3555_v0  ;;  %v1556_v61 = vsel %vm4030_vm3, %v3555_v0, %v1552_v10  ;;  %vm4060_vm2 = vcmp.lt.s32.totalorder %v2807_v54, 96 }
 0x348   : > { %v1557_v14 = vmul.f32 %v1555_v48, %v4031_v36  ;;  %v1558_v7 = vmul.f32 %v1556_v61, %v4032_v6  ;;  %2161 = vset.pattern.permute.xlu2 %v4033_v59  ;;  %v4049_v48 = vperm.slane %v3080_v35, 2  ;;  %vm4061_vm3 = vmmov %vm4060_vm2 }
 0x349   : > { %1720 = vperm.xlu2 %2161, %v2184_v18   ;;  %v1609_v13 = vpop.permute.xlu2 %1608 }
 0x34a   : > { %v1563_v31 = vmul.f32 %v1561_v38, %v1557_v14  ;;  %v1564_v2 = vmul.f32 %v1561_v38, %v1558_v7 }
 0x34c   : > { %v1565_v46 = vadd.f32 %v1563_v31, %v1549_v32  ;;  %v1566_v26 = vadd.f32 %v1564_v2, %v1550_v27  ;;  %v1666_v22 = vpop.permute.xlu1 %1665  ;;  %v4048_v27 = vperm.slane %v3078_v47, 2 }
 0x34e   : > { %v1568_v0 = vpop.permute.xlu0 %1567 }
 0x34f   : > { %v1571_v51 = vsel %vm4034_vm4, %v1568_v0, %v3574_v29  ;;  %v1572_v21 = vsel %vm4035_vm5, %v3574_v29, %v1568_v0  ;;  %vm4066_vm4 = vcmp.lt.s32.totalorder %v2807_v54, 95 }
 0x350   : > { %v1573_v49 = vmul.f32 %v1571_v51, %v4036_v52  ;;  %v1574_v40 = vmul.f32 %v1572_v21, %v4037_v16  ;;  %vm4067_vm5 = vmmov %vm4066_vm4 }
 0x352   : > { %v1579_v53 = vmul.f32 %v1577_v56, %v1573_v49  ;;  %v1580_v38 = vmul.f32 %v1577_v56, %v1574_v40  ;;  %v1625_v57 = vpop.permute.xlu2 %1624 }
 0x354   : > { %v1581_v33 = vadd.f32 %v1579_v53, %v1565_v46  ;;  %v1582_v58 = vadd.f32 %v1580_v38, %v1566_v26  ;;  %v1682_v6 = vpop.permute.xlu1 %1681 }
 0x356   : > { %v1584_v4 = vpop.permute.xlu0 %1583 }
 0x357   : > { %v1587_v24 = vsel %vm4038_vm6, %v1584_v4, %v3592_v37  ;;  %v1588_v29 = vsel %vm4039_vm7, %v3592_v37, %v1584_v4  ;;  %v4044_v37 = vperm.slane %v3078_v47, 1  ;;  %v1799_v4 = vperm.slane %v3314_v41, 6 }
 0x358   : > { %v1589_v42 = vmul.f32 %v1587_v24, %v4040_v23  ;;  %v1590_v25 = vmul.f32 %v1588_v29, %v4041_v30  ;;  %v4052_v29 = vperm.slane %v3078_v47, 3  ;;  %vm4069_vm6 = vcmp.lt.s32.totalorder %v2807_v54, 94 }
 0x359   : > { %vm4070_vm7 = vmmov %vm4069_vm6 }
 0x35a   : > { %v1595_v56 = vmul.f32 %v1593_v9, %v1589_v42  ;;  %v1596_v20 = vmul.f32 %v1593_v9, %v1590_v25  ;;  %v4053_v42 = vperm.slane %v3080_v35, 3 }
 0x35b   : > { %v1641_v63 = vpop.permute.xlu2 %1640 }
 0x35c   : > { %v1597_v3 = vadd.f32 %v1595_v56, %v1581_v33  ;;  %v1598_v43 = vadd.f32 %v1596_v20, %v1582_v58  ;;  %v1698_v31 = vpop.permute.xlu1 %1697  ;;  %v1749_v33 = vperm.slane %v3314_v41, 1  ;;  %v1769_v58 = vperm.slane %v3314_v41, 3 }
 0x35d   : > { %v1770_v56 = vperm.slane %v3316_v45, 3  ;;  %v1800_v20 = vperm.slane %v3316_v45, 6 }
 0x35e   : > { %v1600_v60 = vpop.permute.xlu0 %1599 }
 0x35f   : > { %v1603_v62 = vsel %vm4042_vm8, %v1600_v60, %v1602_v28  ;;  %v1604_v1 = vsel %vm4043_vm9, %v1602_v28, %v1600_v60  ;;  %v1740_v60 = vperm.slane %v3316_v45, 0 }
 0x360   : > { %v1605_v55 = vmul.f32 %v1603_v62, %v4044_v37  ;;  %v1606_v11 = vmul.f32 %v1604_v1, %v4045_v17  ;;  %v1739_v62 = vperm.slane %v3314_v41, 0  ;;  %v1760_v1 = vperm.slane %v3316_v45, 2 }
 0x361   : > { %v1759_v37 = vperm.slane %v3314_v41, 2 }
 0x362   : > { %v1611_v5 = vmul.f32 %v1609_v13, %v1605_v55  ;;  %v1612_v8 = vmul.f32 %v1609_v13, %v1606_v11  ;;  %v4056_v55 = vperm.slane %v3078_v47, 4 }
 0x364   : > { %v1613_v44 = vadd.f32 %v1611_v5, %v1597_v3  ;;  %v1614_v9 = vadd.f32 %v1612_v8, %v1598_v43  ;;  %v3683_v39 = vpop.permute.xlu2 %1656  ;;  %v3699_v0 = vpop.permute.xlu1 %1713  ;;  %v1810_v3 = vperm.slane %v3316_v45, 7  ;;  %v1809_v43 = vperm.slane %v3314_v41, 7 }
 0x365   : > { %v1780_v5 = vperm.slane %v3316_v45, 4  ;;  %v1779_v8 = vperm.slane %v3314_v41, 4 }
 0x366   : > { %v1616_v15 = vpop.permute.xlu0 %1615 }
 0x367   : > { %v1619_v32 = vsel %vm4046_vm10, %v1616_v15, %v1618_v12  ;;  %v1620_v28 = vsel %vm4047_vm11, %v1618_v12, %v1616_v15 }
 0x368   : > { %v1621_v10 = vmul.f32 %v1619_v32, %v4048_v27  ;;  %v1622_v61 = vmul.f32 %v1620_v28, %v4049_v48 }
 0x36a   : > { %v1627_v36 = vmul.f32 %v1625_v57, %v1621_v10  ;;  %v1628_v14 = vmul.f32 %v1625_v57, %v1622_v61  ;;  %v1750_v57 = vperm.slane %v3316_v45, 1 }
 0x36c   : > { %v1629_v7 = vadd.f32 %v1627_v36, %v1613_v44  ;;  %v1630_v59 = vadd.f32 %v1628_v14, %v1614_v9  ;;  %v1747_v52 = vpop.permute.xlu1 %1746 }
 0x36d   : > { %v3693_v18 = vpop.permute.xlu2 %1672  ;;  %v1751_v28 = vmul.f32 %v1749_v33, %v1747_v52  ;;  %v1752_v27 = vmul.f32 %v1750_v57, %v1747_v52  ;;  %v4063_v52 = vperm.slane %v3080_v35, 5 }
 0x36e   : > { %v1632_v13 = vpop.permute.xlu0 %1631 }
 0x36f   : > { %v1635_v53 = vsel %vm4050_vm12, %v1632_v13, %v1634_v34  ;;  %v1636_v38 = vsel %vm4051_vm13, %v1634_v34, %v1632_v13 }
 0x370   : > { %v1637_v23 = vmul.f32 %v1635_v53, %v4052_v29  ;;  %v1638_v30 = vmul.f32 %v1636_v38, %v4053_v42 }
 0x372   : > { %v1643_v44 = vmul.f32 %v1641_v63, %v1637_v23  ;;  %v1644_v9 = vmul.f32 %v1641_v63, %v1638_v30 }
 0x374   : > { %v1767_v40 = vpop.permute.xlu1 %1766  ;;  %v1645_v33 = vadd.f32 %v1643_v44, %v1629_v7 }
 0x375   : > { %v1771_v10 = vmul.f32 %v1769_v58, %v1767_v40  ;;  %v1772_v48 = vmul.f32 %v1770_v56, %v1767_v40  ;;  %v1646_v58 = vadd.f32 %v1644_v9, %v1630_v59 }
 0x376   : > { %v1648_v2 = vpop.permute.xlu0 %1647  ;;  %v3695_v46 = vpop.permute.xlu2 %1688 }
 0x377   : > { %v1651_v25 = vsel %vm4054_vm14, %v1648_v2, %v1650_v19  ;;  %v1652_v34 = vsel %vm4055_vm15, %v1650_v19, %v1648_v2  ;;  %v4057_v19 = vperm.slane %v3080_v35, 4 }
 0x378   : > { %v1653_v17 = vmul.f32 %v1651_v25, %v4056_v55 }
 0x379   : > { %v1654_v11 = vmul.f32 %v1652_v34, %v4057_v19  ;;  %v4068_v19 = vperm.slane %v3080_v35, 7 }
 0x37a   : > { %v1659_v53 = vmul.f32 %v3683_v39, %v1653_v17 }
 0x37b   : > { %v1660_v38 = vmul.f32 %v3683_v39, %v1654_v11 }
 0x37c   : > { %v1797_v63 = vpop.permute.xlu1 %1796  ;;  %v1661_v7 = vadd.f32 %v1659_v53, %v1645_v33 }
 0x37d   : > { %v1662_v59 = vadd.f32 %v1660_v38, %v1646_v58  ;;  %v1802_v53 = vmul.f32 %v1800_v20, %v1797_v63 }
 0x37e   : > { %v1664_v26 = vpop.permute.xlu0 %1663 }
 0x37f   : > { %v3697_v12 = vpop.permute.xlu2 %1704  ;;  %v1667_v15 = vsel %vm4058_vm0, %v1664_v26, %v1666_v22  ;;  %v1668_v32 = vsel %vm4059_vm1, %v1666_v22, %v1664_v26  ;;  %v4062_v22 = vperm.slane %v3078_v47, 5 }
 0x380   : > { %v1670_v40 = vmul.f32 %v1668_v32, %v4063_v52  ;;  %v1790_v32 = vperm.slane %v3316_v45, 5 }
 0x381   : > { %v1669_v26 = vmul.f32 %v1667_v15, %v4062_v22 }
 0x382   : > { %v1676_v55 = vmul.f32 %v3693_v18, %v1670_v40 }
 0x384   : > { %v1678_v15 = vadd.f32 %v1676_v55, %v1662_v59  ;;  %v1807_v54 = vpop.permute.xlu1 %1806 }
 0x385   : > { %v1812_v33 = vmul.f32 %v1810_v3, %v1807_v54  ;;  %v2187_v3 = vld [vmem:[%s2578_s29 + $0x10] sm:$0xff] }
 0x386   : > { %v1680_v51 = vpop.permute.xlu0 %1679 }
 0x387   : > { %v1683_v61 = vsel %vm4060_vm2, %v1680_v51, %v1682_v6  ;;  %v1684_v36 = vsel %vm4061_vm3, %v1682_v6, %v1680_v51  ;;  %v4064_v6 = vperm.slane %v3078_v47, 6 }
 0x388   : > { %v1737_v21 = vpop.permute.xlu2 %1736 }
 0x389   : > { %v1741_v14 = vmul.f32 %v1739_v62, %v1737_v21  ;;  %v1742_v13 = vmul.f32 %v1740_v60, %v1737_v21  ;;  %v1685_v51 = vmul.f32 %v1683_v61, %v4064_v6  ;;  %v4065_v21 = vperm.slane %v3080_v35, 6 }
 0x38a   : > { %v1675_v62 = vmul.f32 %v3693_v18, %v1669_v26 }
 0x38b   : > { %v1686_v42 = vmul.f32 %v1684_v36, %v4065_v21  ;;  %v2188_v21 = vld [vmem:[%s2578_s29 + $0x18] sm:$0xff] }
 0x38c   : > { %v1677_v35 = vadd.f32 %v1675_v62, %v1661_v7 }
 0x38e   : > { %v1696_v49 = vpop.permute.xlu0 %1695 }
 0x38f   : > { %v1699_v39 = vsel %vm4066_vm4, %v1696_v49, %v1698_v31  ;;  %v1700_v30 = vsel %vm4067_vm5, %v1698_v31, %v1696_v49  ;;  %v1691_v31 = vmul.f32 %v3695_v46, %v1685_v51  ;;  %v1692_v49 = vmul.f32 %v3695_v46, %v1686_v42 }
 0x390   : > { %v1701_v17 = vmul.f32 %v1699_v39, %v1130_v50  ;;  %v1702_v11 = vmul.f32 %v1700_v30, %v4068_v19 }
 0x391   : > { %v1757_v16 = vpop.permute.xlu2 %1756  ;;  %v1693_v38 = vadd.f32 %v1691_v31, %v1677_v35 }
 0x392   : > { %v1761_v25 = vmul.f32 %v1759_v37, %v1757_v16  ;;  %v1762_v34 = vmul.f32 %v1760_v1, %v1757_v16  ;;  %v1707_v46 = vmul.f32 %v3697_v12, %v1701_v17 }
 0x396   : > { %v1712_v24 = vpop.permute.xlu0 %1711 }
 0x397   : > { %v1715_v16 = vsel %vm4069_vm6, %v1712_v24, %v3699_v0  ;;  %v1716_v18 = vsel %vm4070_vm7, %v3699_v0, %v1712_v24  ;;  %v2185_v0 = vld [vmem:[#allocation5 + $0x30] ss:$0 sm:$0xff] }
 0x398   : > { %v1717_v24 = vmul.f32 %v2185_v0, %v1715_v16 }
 0x39a   : > { %v1777_v2 = vpop.permute.xlu2 %1776 }
 0x39b   : > { %v1781_v1 = vmul.f32 %v1779_v8, %v1777_v2  ;;  %v1782_v47 = vmul.f32 %v1780_v5, %v1777_v2  ;;  %v2186_v5 = vld [vmem:[#allocation5 + $0x38] ss:$0 sm:$0xff]  ;;  %v1801_v2 = vmul.f32 %v1799_v4, %v1797_v63  ;;  %v1709_v4 = vadd.f32 %v1707_v46, %v1693_v38 }
 0x39c   : > { %v1718_v8 = vmul.f32 %v2186_v5, %v1716_v18 }
 0x39e   : > { %v1731_v57 = vpop.permute.xlu0 %1730 }
 0x39f   : > { %v1743_v29 = vadd.f32 %v1741_v14, %v1731_v57  ;;  %v1744_v23 = vadd.f32 %v1742_v13, %v1731_v57  ;;  %v1811_v57 = vmul.f32 %v1809_v43, %v1807_v54 }
 0x3a1   : > { %v1753_v56 = vadd.f32 %v1751_v28, %v1743_v29  ;;  %v1754_v60 = vadd.f32 %v1752_v27, %v1744_v23  ;;  %v1789_v28 = vperm.slane %v3314_v41, 5  ;;  %v1708_v27 = vmul.f32 %v3697_v12, %v1702_v11 }
 0x3a2   : > { %v1694_v12 = vadd.f32 %v1692_v49, %v1678_v15 }
 0x3a3   : > { %v1763_v44 = vadd.f32 %v1761_v25, %v1753_v56  ;;  %v1764_v9 = vadd.f32 %v1762_v34, %v1754_v60  ;;  %v1721_v61 = vpop.permute.xlu2 %1720 }
 0x3a4   : > { %v1723_v22 = vmul.f32 %v1721_v61, %v1717_v24  ;;  %v1724_v26 = vmul.f32 %v1721_v61, %v1718_v8  ;;  %v1710_v58 = vadd.f32 %v1708_v27, %v1694_v12 }
 0x3a5   : > { %v1773_v50 = vadd.f32 %v1771_v10, %v1763_v44  ;;  %v1774_v37 = vadd.f32 %v1772_v48, %v1764_v9 }
 0x3a6   : > { %v1725_v63 = vadd.f32 %v1723_v22, %v1709_v4  ;;  %v1726_v23 = vadd.f32 %v1724_v26, %v1710_v58 }
 0x3a7   : > { %v1787_v36 = vpop.permute.xlu0 %1786  ;;  %v1783_v14 = vadd.f32 %v1781_v1, %v1773_v50  ;;  %v1784_v13 = vadd.f32 %v1782_v47, %v1774_v37 }
 0x3a8   : > { %v1791_v10 = vmul.f32 %v1789_v28, %v1787_v36  ;;  %v1792_v48 = vmul.f32 %v1790_v32, %v1787_v36 }
 0x3aa   : > { %v1793_v52 = vadd.f32 %v1791_v10, %v1783_v14  ;;  %v1794_v40 = vadd.f32 %v1792_v48, %v1784_v13 }
 0x3ac   : > { %v1803_v29 = vadd.f32 %v1801_v2, %v1793_v52  ;;  %v1804_v20 = vadd.f32 %v1802_v53, %v1794_v40 }
 0x3ae   : > { %v1813_v41 = vadd.f32 %v1811_v57, %v1803_v29  ;;  %v1814_v6 = vadd.f32 %v1812_v33, %v1804_v20 }
 0x3b0   : > { %v1815_v43 = vadd.f32 %v1813_v41, %v1725_v63  ;;  %v1816_v45 = vadd.f32 %v1814_v6, %v1726_v23 }
 0x3b2   : > { %v1821_v51 = vadd.f32 %v2187_v3, %v1815_v43  ;;  %v1822_v42 = vadd.f32 %v2188_v21, %v1816_v45 }
 0x3b4   : > { %1823 = vst [vmem:[%s3332_s5 + $0x10] sm:$0xff] %v1821_v51 }
 0x3b5   : > { %1824 = vst [vmem:[%s3332_s5 + $0x18] sm:$0xff] %v1822_v42 }
 0x3b6   : > { %2306 = shalt.err (!%p2303_p10)
}
 0x3b7   : > { %s2404_s20 = smov 256  }
 0x3b8   : > { %1967 = dma.vmem_to_hbm [thread:$0]  (%p2539_p3), %s1839_s25, 512, %s1841_s30, %s1826_s28, %s2404_s20, %s2404_s20, %s3971_s14  }
 0x3b9 PF: > { %s1855_s5 = sand.u32 1, %s2337_s21   ;;  %p4072_p12 = scmp.ge.s32.totalorder %s2349_s24, 2 }
 0x3ba   : > { %s1856_s17 = scalar_lea.sflag [#allocation4], %s1855_s5 }
 0x3bb   : > { %p1981_p13 = pnand %p4072_p12, %p2505_p6 }
 0x3bd   : > { %p1982_p0 = pneg %p1981_p13 }
 0x3bf   : > { %2332 = dma.done.wait (%p1982_p0), %s1856_s17, 512  }
 0x3c0   : > { %2334 = vsyncadd (%p1982_p0), %s1856_s17, 4294966784  ;;  %s4073_s24 = sld [smem:[#allocation14_spill]]  ;;  %s4076_s21 = smov %s2341_s22 }
 0x3c1   : > { %s4074_s19 = sld [smem:[#allocation12_spill]] }
 0x3c2   : > { %s4075_s23 = sld [smem:[#allocation15_spill]] }
 0x3c6   : > { %p26_p5 = scmp.ge.s32.totalorder %s4073_s24, 4  }
 0x3c7   : > { %s4077_s22 = smov %s4074_s19 }
 0x3c8   :  { %28 = sbr.rel (!%p26_p5) target bundleno = 9 (0x9), region = 121 }
 0x3cd   :  { %1862 = vsyncpa [#allocation3], 1 }
 0x3ce   :  { %1864 = vsyncpa [#allocation3 + $0x1], 1 }
 0x3cf   :  { %1865 = vsyncpa [#allocation6], 1 }
 0x3d0   :  { %1866 = vsyncpa [#allocation4], 1 }
 0x3d1   :  { %1868 = vsyncpa [#allocation4 + $0x1], 1 }

</bundles_post_ra>
